<compile_context>
chip_gen: v6e
topology: v6e:2x2x1
jax: 0.10.0
libtpu: 0.0.40
codegen_flags: <defaults>
</compile_context>

<pallas_src>
import functools

import jax
import jax.numpy as jnp
from jax.experimental import pallas as pl
from jax.experimental.pallas import tpu as pltpu


CPAD = 128  # lane-dense padded channel width shared by every layer


def _round_up(x, m):
    return (x + m - 1) // m * m


def _fused_net_kernel(x_ref, w_ref, shift_ref, o_ref, act_ref, *, k, dilations,
                      relus, residuals, seq_len, pad0):
    """One batch element: the full CausalConvNet with activations in VMEM.

    x_ref     : (T, CPAD)          channel-padded input block
    w_ref     : (L, k*CPAD, CPAD)  BN-folded, channel-padded conv weights
    shift_ref : (L, 1, CPAD)       folded conv bias + eval-mode BN shift
    o_ref     : (T, CPAD)          final-layer output (padded channels)
    act_ref   : (pad0 + T, CPAD)   resident activation; rows [0, pad0) are the
                                   causal zero left-pad (pad0 is 8-aligned)
    """
    cpad = act_ref.shape[-1]
    num_layers = len(dilations)

    # Zero the causal left-pad rows, then stage this batch element's input.
    # (Re-zeroed every grid step so megacore batch-sharding stays correct.)
    act_ref[0:pad0, :] = jnp.zeros((pad0, cpad), jnp.float32)
    act_ref[pad0:pad0 + seq_len, :] = x_ref[...].astype(jnp.float32)

    for l in range(num_layers):          # L = 11, compile-time unrolled
        d = dilations[l]
        base = pad0 - d * (k - 1)        # start row of tap 0 inside act_ref
        # im2col: (T, k*CPAD) from k time-shifted views of the padded
        # activation.  Lane-axis concat at 128-multiples is vreg placement
        # (no cross-lane traffic); one deep-contraction MXU push per layer.
        taps = [act_ref[base + j * d: base + j * d + seq_len, :]
                for j in range(k)]
        im2col = jnp.concatenate(taps, axis=-1)
        y = jnp.dot(im2col, w_ref[l], preferred_element_type=jnp.float32)
        y = y + shift_ref[l]             # folded conv bias + BN affine
        if relus[l]:
            y = jnp.maximum(y, 0.0)
        if residuals[l]:                 # ResidualUnit: x + ReLU(BN(conv(x)))
            y = y + act_ref[pad0:pad0 + seq_len, :]
        if l == num_layers - 1:
            o_ref[...] = y.astype(o_ref.dtype)
        else:
            act_ref[pad0:pad0 + seq_len, :] = y


def pack_params(layers, cpad=CPAD):
    """Fold BN into the conv weights and pad/stack everything for the kernel."""
    k = layers[0]["w"].shape[0]
    w_all, shift_all = [], []
    for lp in layers:
        kk, cin, cout = lp["w"].shape
        w = lp["w"] * lp["scale"][None, None, :]          # fold BN scale
        shift = lp["b"] * lp["scale"] + lp["shift"]       # folded bias + shift
        w = jnp.pad(w, ((0, 0), (0, cpad - cin), (0, cpad - cout)))
        shift = jnp.pad(shift, ((0, cpad - cout),))
        w_all.append(w.reshape(kk * cpad, cpad))          # tap-major rows
        shift_all.append(shift.reshape(1, cpad))
    w_all = jnp.stack(w_all)                              # (L, k*cpad, cpad)
    shift_all = jnp.stack(shift_all)                      # (L, 1, cpad)
    dils = tuple(int(lp["dilation"]) for lp in layers)
    relus = tuple(bool(lp["relu"]) for lp in layers)
    resids = tuple(bool(lp["residual"]) for lp in layers)
    return w_all, shift_all, dils, relus, resids, k


def causal_conv_net(x_nct, layers, *, cpad=CPAD):
    """PyTorch-compatible entry point: x is NCW (B, C, T) -> (B, Cout, T)."""
    B, Cin, T = x_nct.shape
    Cout = layers[-1]["w"].shape[-1]
    w_all, shift_all, dils, relus, resids, k = pack_params(layers, cpad)
    L = len(layers)
    # 8-aligned causal left pad: live activation region starts on a sublane
    # boundary, so the input store / residual reads / writebacks are aligned.
    pad0 = _round_up(max(dils) * (k - 1), 8)
    # Time padded to a sublane multiple; trailing zeros never influence the
    # first T outputs of a causal conv, so we simply slice them off at the end.
    Tp = _round_up(T, 8)

    x = jnp.transpose(x_nct, (0, 2, 1))                   # NCW -> (B, T, Cin)
    x = jnp.pad(x, ((0, 0), (0, Tp - T), (0, cpad - Cin)))  # lane/sublane dense

    kernel = functools.partial(_fused_net_kernel, k=k, dilations=dils,
                               relus=relus, residuals=resids, seq_len=Tp,
                               pad0=pad0)
    out = pl.pallas_call(
        kernel,
        out_shape=jax.ShapeDtypeStruct((B, Tp, cpad), jnp.float32),
        grid_spec=pltpu.PrefetchScalarGridSpec(
            num_scalar_prefetch=0,
            grid=(B,),
            in_specs=[
                pl.BlockSpec((None, Tp, cpad), lambda b: (b, 0, 0)),
                pl.BlockSpec((L, k * cpad, cpad), lambda b: (0, 0, 0)),
                pl.BlockSpec((L, 1, cpad), lambda b: (0, 0, 0)),
            ],
            out_specs=pl.BlockSpec((None, Tp, cpad), lambda b: (b, 0, 0)),
            scratch_shapes=[pltpu.VMEM((pad0 + Tp, cpad), jnp.float32)],
        ),
        compiler_params=pltpu.CompilerParams(
            dimension_semantics=("parallel",)),
    )(x, w_all, shift_all)

    out = out[:, :T, :Cout]                               # strip time/chan pad
    return jnp.transpose(out, (0, 2, 1))                  # back to NCW


def make_params(key, in_channels, hidden_dim, out_channels, kernel_size):
    """Deterministic synthetic parameters mirroring CausalConvNet.__init__."""
    eps = 1e-5
    keys = iter(jax.random.split(key, 64))

    def conv_params(k_, cin, cout):
        kw, kb = jax.random.split(k_)
        w = jax.random.normal(kw, (kernel_size, cin, cout), jnp.float32)
        w = w / jnp.sqrt(float(cin * kernel_size))
        b = 0.05 * jax.random.normal(kb, (cout,), jnp.float32)
        return w, b

    def bn_params(k_, c):
        k1, k2, k3, k4 = jax.random.split(k_, 4)
        gamma = 1.0 + 0.1 * jax.random.normal(k1, (c,), jnp.float32)
        beta = 0.1 * jax.random.normal(k2, (c,), jnp.float32)
        mean = 0.1 * jax.random.normal(k3, (c,), jnp.float32)
        var = 1.0 + 0.1 * jax.random.uniform(k4, (c,), jnp.float32)
        scale = gamma / jnp.sqrt(var + eps)   # folded eval-mode BatchNorm1d
        shift = beta - mean * scale
        return scale, shift

    layers = []
    # Stem: CausalConv1d(in, hidden) -> BN -> ReLU
    w, b = conv_params(next(keys), in_channels, hidden_dim)
    s, sh = bn_params(next(keys), hidden_dim)
    layers.append(dict(w=w, b=b, scale=s, shift=sh, dilation=1,
                       relu=True, residual=False))
    # 3 EncoderBlocks x ResidualUnits with dilations (1, 3, 9)
    for _ in range(3):
        for d in (1, 3, 9):
            w, b = conv_params(next(keys), hidden_dim, hidden_dim)
            s, sh = bn_params(next(keys), hidden_dim)
            layers.append(dict(w=w, b=b, scale=s, shift=sh, dilation=d,
                               relu=True, residual=True))
    # Head: CausalConv1d(hidden, out) — no BN / ReLU / residual
    w, b = conv_params(next(keys), hidden_dim, out_channels)
    layers.append(dict(w=w, b=b,
                       scale=jnp.ones((out_channels,), jnp.float32),
                       shift=jnp.zeros((out_channels,), jnp.float32),
                       dilation=1, relu=False, residual=False))
    return layers


def reference_forward(x_nct, layers):
    """Pure-JAX reference (XLA conv) for correctness checking."""
    def conv(x, w_kio, b, d):
        w_oik = jnp.transpose(w_kio, (2, 1, 0))  # (Cout, Cin, k) like PyTorch
        kk = w_kio.shape[0]
        pad = d * (kk - 1)
        y = jax.lax.conv_general_dilated(
            x, w_oik, window_strides=(1,), padding=[(pad, 0)],
            rhs_dilation=(d,), dimension_numbers=("NCH", "OIH", "NCH"))
        return y + b[None, :, None]

    x = x_nct
    for lp in layers:
        y = conv(x, lp["w"], lp["b"], lp["dilation"])
        y = y * lp["scale"][None, :, None] + lp["shift"][None, :, None]
        if lp["relu"]:
            y = jnp.maximum(y, 0.0)
        if lp["residual"]:
            y = y + x
        x = y
    return x


if __name__ == "__main__":
    key = jax.random.PRNGKey(0)
    kx, kp = jax.random.split(key)

    B, Cin, T = 2, 4, 16
    hidden_dim, Cout, kernel_size = 32, 8, 3

    x = jax.random.normal(kx, (B, Cin, T), jnp.float32)   # NCW like PyTorch
    layers = make_params(kp, Cin, hidden_dim, Cout, kernel_size)

    out = jax.block_until_ready(causal_conv_net(x, layers))
    ref = jax.block_until_ready(reference_forward(x, layers))

    assert out.shape == (B, Cout, T), out.shape
    max_err = float(jnp.max(jnp.abs(out - ref)))
    tol = 1e-2 * max(1.0, float(jnp.max(jnp.abs(ref))))
    assert max_err < tol, f"max abs error too large: {max_err} (tol {tol})"
    print("KERNEL_OK")
</pallas_src>

<mosaic_0001>
module attributes {stable_mosaic.version = 11 : i64} {
  func.func @_fused_net_kernel(%arg0: i32, %arg1: memref<1x16x128xf32, #tpu.memory_space<vmem>>, %arg2: memref<11x384x128xf32, #tpu.memory_space<vmem>>, %arg3: memref<11x1x128xf32, #tpu.memory_space<vmem>>, %arg4: memref<1x16x128xf32, #tpu.memory_space<vmem>>, %arg5: memref<40x128xf32, #tpu.memory_space<vmem>>) attributes {dimension_semantics = [#tpu.dimension_semantics<parallel>], iteration_bounds = array<i64: 2>, scalar_prefetch = 0 : i64, scratch_operands = 1 : i64, tpu.core_type = #tpu.core_type<tc>, window_params = [{transform_indices = @transform_0, window_bounds = array<i64: 1, 16, 128>}, {pipeline_mode = #tpu.pipeline_mode<synchronous>, transform_indices = @transform_1, window_bounds = array<i64: 11, 384, 128>}, {pipeline_mode = #tpu.pipeline_mode<synchronous>, transform_indices = @transform_2, window_bounds = array<i64: 11, 1, 128>}, {transform_indices = @transform_3, window_bounds = array<i64: 1, 16, 128>}]} {
    %cst = arith.constant 0.000000e+00 : f32
    %0 = vector.broadcast %cst : f32 to vector<24x128xf32>
    %c0 = arith.constant 0 : index
    %c0_0 = arith.constant 0 : index
    %1 = vector.load %arg5[%c0, %c0_0] : memref<40x128xf32, #tpu.memory_space<vmem>>, vector<24x128xf32>
    tpu.vector_store %arg5[%c0, %c0_0], %0 {strides = array<i32>} : memref<40x128xf32, #tpu.memory_space<vmem>>, vector<24x128xf32>,
    %c0_1 = arith.constant 0 : index
    %c0_2 = arith.constant 0 : index
    %c0_3 = arith.constant 0 : index
    %2 = vector.load %arg1[%c0_1, %c0_2, %c0_3] : memref<1x16x128xf32, #tpu.memory_space<vmem>>, vector<1x16x128xf32>
    %3 = vector.shape_cast %2 : vector<1x16x128xf32> to vector<16x128xf32>
    %c24 = arith.constant 24 : index
    %c0_4 = arith.constant 0 : index
    %4 = vector.load %arg5[%c24, %c0_4] : memref<40x128xf32, #tpu.memory_space<vmem>>, vector<16x128xf32>
    tpu.vector_store %arg5[%c24, %c0_4], %3 {strides = array<i32>} : memref<40x128xf32, #tpu.memory_space<vmem>>, vector<16x128xf32>,
    %c22 = arith.constant 22 : index
    %c0_5 = arith.constant 0 : index
    %5 = vector.load %arg5[%c22, %c0_5] : memref<40x128xf32, #tpu.memory_space<vmem>>, vector<16x128xf32>
    %c23 = arith.constant 23 : index
    %c0_6 = arith.constant 0 : index
    %6 = vector.load %arg5[%c23, %c0_6] : memref<40x128xf32, #tpu.memory_space<vmem>>, vector<16x128xf32>
    %c24_7 = arith.constant 24 : index
    %c0_8 = arith.constant 0 : index
    %7 = vector.load %arg5[%c24_7, %c0_8] : memref<40x128xf32, #tpu.memory_space<vmem>>, vector<16x128xf32>
    %8 = tpu.concatenate %5, %6, %7 in 1 : vector<16x128xf32>, vector<16x128xf32>, vector<16x128xf32> -> vector<16x384xf32>
    %c0_9 = arith.constant 0 : index
    %c0_10 = arith.constant 0 : index
    %c0_11 = arith.constant 0 : index
    %9 = vector.load %arg2[%c0_9, %c0_10, %c0_11] : memref<11x384x128xf32, #tpu.memory_space<vmem>>, vector<1x384x128xf32>
    %10 = vector.shape_cast %9 : vector<1x384x128xf32> to vector<384x128xf32>
    %cst_12 = arith.constant dense<0.000000e+00> : vector<16x128xf32>
    %11 = tpu.matmul %8, %10, %cst_12 {dimension_numbers = #tpu.dot_dimension_numbers<[1], [0], [0], [1], [0, 0, 1, 1], [], []>} : vector<16x384xf32>, vector<384x128xf32>, vector<16x128xf32> -> vector<16x128xf32>
    %c0_13 = arith.constant 0 : index
    %c0_14 = arith.constant 0 : index
    %c0_15 = arith.constant 0 : index
    %12 = vector.load %arg3[%c0_13, %c0_14, %c0_15] : memref<11x1x128xf32, #tpu.memory_space<vmem>>, vector<1x1x128xf32>
    %13 = vector.shape_cast %12 : vector<1x1x128xf32> to vector<1x128xf32>
    %14 = vector.broadcast %13 : vector<1x128xf32> to vector<16x128xf32>
    %15 = arith.addf %11, %14 : vector<16x128xf32>
    %cst_16 = arith.constant 0.000000e+00 : f32
    %16 = vector.broadcast %cst_16 : f32 to vector<16x128xf32>
    %17 = arith.maximumf %15, %16 : vector<16x128xf32>
    %c24_17 = arith.constant 24 : index
    %c0_18 = arith.constant 0 : index
    %18 = vector.load %arg5[%c24_17, %c0_18] : memref<40x128xf32, #tpu.memory_space<vmem>>, vector<16x128xf32>
    tpu.vector_store %arg5[%c24_17, %c0_18], %17 {strides = array<i32>} : memref<40x128xf32, #tpu.memory_space<vmem>>, vector<16x128xf32>,
    %c22_19 = arith.constant 22 : index
    %c0_20 = arith.constant 0 : index
    %19 = vector.load %arg5[%c22_19, %c0_20] : memref<40x128xf32, #tpu.memory_space<vmem>>, vector<16x128xf32>
    %c23_21 = arith.constant 23 : index
    %c0_22 = arith.constant 0 : index
    %20 = vector.load %arg5[%c23_21, %c0_22] : memref<40x128xf32, #tpu.memory_space<vmem>>, vector<16x128xf32>
    %c24_23 = arith.constant 24 : index
    %c0_24 = arith.constant 0 : index
    %21 = vector.load %arg5[%c24_23, %c0_24] : memref<40x128xf32, #tpu.memory_space<vmem>>, vector<16x128xf32>
    %22 = tpu.concatenate %19, %20, %21 in 1 : vector<16x128xf32>, vector<16x128xf32>, vector<16x128xf32> -> vector<16x384xf32>
    %c1 = arith.constant 1 : index
    %c0_25 = arith.constant 0 : index
    %c0_26 = arith.constant 0 : index
    %23 = vector.load %arg2[%c1, %c0_25, %c0_26] : memref<11x384x128xf32, #tpu.memory_space<vmem>>, vector<1x384x128xf32>
    %24 = vector.shape_cast %23 : vector<1x384x128xf32> to vector<384x128xf32>
    %cst_27 = arith.constant dense<0.000000e+00> : vector<16x128xf32>
    %25 = tpu.matmul %22, %24, %cst_27 {dimension_numbers = #tpu.dot_dimension_numbers<[1], [0], [0], [1], [0, 0, 1, 1], [], []>} : vector<16x384xf32>, vector<384x128xf32>, vector<16x128xf32> -> vector<16x128xf32>
    %c1_28 = arith.constant 1 : index
    %c0_29 = arith.constant 0 : index
    %c0_30 = arith.constant 0 : index
    %26 = vector.load %arg3[%c1_28, %c0_29, %c0_30] : memref<11x1x128xf32, #tpu.memory_space<vmem>>, vector<1x1x128xf32>
    %27 = vector.shape_cast %26 : vector<1x1x128xf32> to vector<1x128xf32>
    %28 = vector.broadcast %27 : vector<1x128xf32> to vector<16x128xf32>
    %29 = arith.addf %25, %28 : vector<16x128xf32>
    %cst_31 = arith.constant 0.000000e+00 : f32
    %30 = vector.broadcast %cst_31 : f32 to vector<16x128xf32>
    %31 = arith.maximumf %29, %30 : vector<16x128xf32>
    %c24_32 = arith.constant 24 : index
    %c0_33 = arith.constant 0 : index
    %32 = vector.load %arg5[%c24_32, %c0_33] : memref<40x128xf32, #tpu.memory_space<vmem>>, vector<16x128xf32>
    %33 = arith.addf %31, %32 : vector<16x128xf32>
    %c24_34 = arith.constant 24 : index
    %c0_35 = arith.constant 0 : index
    %34 = vector.load %arg5[%c24_34, %c0_35] : memref<40x128xf32, #tpu.memory_space<vmem>>, vector<16x128xf32>
    tpu.vector_store %arg5[%c24_34, %c0_35], %33 {strides = array<i32>} : memref<40x128xf32, #tpu.memory_space<vmem>>, vector<16x128xf32>,
    %c18 = arith.constant 18 : index
    %c0_36 = arith.constant 0 : index
    %35 = vector.load %arg5[%c18, %c0_36] : memref<40x128xf32, #tpu.memory_space<vmem>>, vector<16x128xf32>
    %c21 = arith.constant 21 : index
    %c0_37 = arith.constant 0 : index
    %36 = vector.load %arg5[%c21, %c0_37] : memref<40x128xf32, #tpu.memory_space<vmem>>, vector<16x128xf32>
    %c24_38 = arith.constant 24 : index
    %c0_39 = arith.constant 0 : index
    %37 = vector.load %arg5[%c24_38, %c0_39] : memref<40x128xf32, #tpu.memory_space<vmem>>, vector<16x128xf32>
    %38 = tpu.concatenate %35, %36, %37 in 1 : vector<16x128xf32>, vector<16x128xf32>, vector<16x128xf32> -> vector<16x384xf32>
    %c2 = arith.constant 2 : index
    %c0_40 = arith.constant 0 : index
    %c0_41 = arith.constant 0 : index
    %39 = vector.load %arg2[%c2, %c0_40, %c0_41] : memref<11x384x128xf32, #tpu.memory_space<vmem>>, vector<1x384x128xf32>
    %40 = vector.shape_cast %39 : vector<1x384x128xf32> to vector<384x128xf32>
    %cst_42 = arith.constant dense<0.000000e+00> : vector<16x128xf32>
    %41 = tpu.matmul %38, %40, %cst_42 {dimension_numbers = #tpu.dot_dimension_numbers<[1], [0], [0], [1], [0, 0, 1, 1], [], []>} : vector<16x384xf32>, vector<384x128xf32>, vector<16x128xf32> -> vector<16x128xf32>
    %c2_43 = arith.constant 2 : index
    %c0_44 = arith.constant 0 : index
    %c0_45 = arith.constant 0 : index
    %42 = vector.load %arg3[%c2_43, %c0_44, %c0_45] : memref<11x1x128xf32, #tpu.memory_space<vmem>>, vector<1x1x128xf32>
    %43 = vector.shape_cast %42 : vector<1x1x128xf32> to vector<1x128xf32>
    %44 = vector.broadcast %43 : vector<1x128xf32> to vector<16x128xf32>
    %45 = arith.addf %41, %44 : vector<16x128xf32>
    %cst_46 = arith.constant 0.000000e+00 : f32
    %46 = vector.broadcast %cst_46 : f32 to vector<16x128xf32>
    %47 = arith.maximumf %45, %46 : vector<16x128xf32>
    %c24_47 = arith.constant 24 : index
    %c0_48 = arith.constant 0 : index
    %48 = vector.load %arg5[%c24_47, %c0_48] : memref<40x128xf32, #tpu.memory_space<vmem>>, vector<16x128xf32>
    %49 = arith.addf %47, %48 : vector<16x128xf32>
    %c24_49 = arith.constant 24 : index
    %c0_50 = arith.constant 0 : index
    %50 = vector.load %arg5[%c24_49, %c0_50] : memref<40x128xf32, #tpu.memory_space<vmem>>, vector<16x128xf32>
    tpu.vector_store %arg5[%c24_49, %c0_50], %49 {strides = array<i32>} : memref<40x128xf32, #tpu.memory_space<vmem>>, vector<16x128xf32>,
    %c6 = arith.constant 6 : index
    %c0_51 = arith.constant 0 : index
    %51 = vector.load %arg5[%c6, %c0_51] : memref<40x128xf32, #tpu.memory_space<vmem>>, vector<16x128xf32>
    %c15 = arith.constant 15 : index
    %c0_52 = arith.constant 0 : index
    %52 = vector.load %arg5[%c15, %c0_52] : memref<40x128xf32, #tpu.memory_space<vmem>>, vector<16x128xf32>
    %c24_53 = arith.constant 24 : index
    %c0_54 = arith.constant 0 : index
    %53 = vector.load %arg5[%c24_53, %c0_54] : memref<40x128xf32, #tpu.memory_space<vmem>>, vector<16x128xf32>
    %54 = tpu.concatenate %51, %52, %53 in 1 : vector<16x128xf32>, vector<16x128xf32>, vector<16x128xf32> -> vector<16x384xf32>
    %c3 = arith.constant 3 : index
    %c0_55 = arith.constant 0 : index
    %c0_56 = arith.constant 0 : index
    %55 = vector.load %arg2[%c3, %c0_55, %c0_56] : memref<11x384x128xf32, #tpu.memory_space<vmem>>, vector<1x384x128xf32>
    %56 = vector.shape_cast %55 : vector<1x384x128xf32> to vector<384x128xf32>
    %cst_57 = arith.constant dense<0.000000e+00> : vector<16x128xf32>
    %57 = tpu.matmul %54, %56, %cst_57 {dimension_numbers = #tpu.dot_dimension_numbers<[1], [0], [0], [1], [0, 0, 1, 1], [], []>} : vector<16x384xf32>, vector<384x128xf32>, vector<16x128xf32> -> vector<16x128xf32>
    %c3_58 = arith.constant 3 : index
    %c0_59 = arith.constant 0 : index
    %c0_60 = arith.constant 0 : index
    %58 = vector.load %arg3[%c3_58, %c0_59, %c0_60] : memref<11x1x128xf32, #tpu.memory_space<vmem>>, vector<1x1x128xf32>
    %59 = vector.shape_cast %58 : vector<1x1x128xf32> to vector<1x128xf32>
    %60 = vector.broadcast %59 : vector<1x128xf32> to vector<16x128xf32>
    %61 = arith.addf %57, %60 : vector<16x128xf32>
    %cst_61 = arith.constant 0.000000e+00 : f32
    %62 = vector.broadcast %cst_61 : f32 to vector<16x128xf32>
    %63 = arith.maximumf %61, %62 : vector<16x128xf32>
    %c24_62 = arith.constant 24 : index
    %c0_63 = arith.constant 0 : index
    %64 = vector.load %arg5[%c24_62, %c0_63] : memref<40x128xf32, #tpu.memory_space<vmem>>, vector<16x128xf32>
    %65 = arith.addf %63, %64 : vector<16x128xf32>
    %c24_64 = arith.constant 24 : index
    %c0_65 = arith.constant 0 : index
    %66 = vector.load %arg5[%c24_64, %c0_65] : memref<40x128xf32, #tpu.memory_space<vmem>>, vector<16x128xf32>
    tpu.vector_store %arg5[%c24_64, %c0_65], %65 {strides = array<i32>} : memref<40x128xf32, #tpu.memory_space<vmem>>, vector<16x128xf32>,
    %c22_66 = arith.constant 22 : index
    %c0_67 = arith.constant 0 : index
    %67 = vector.load %arg5[%c22_66, %c0_67] : memref<40x128xf32, #tpu.memory_space<vmem>>, vector<16x128xf32>
    %c23_68 = arith.constant 23 : index
    %c0_69 = arith.constant 0 : index
    %68 = vector.load %arg5[%c23_68, %c0_69] : memref<40x128xf32, #tpu.memory_space<vmem>>, vector<16x128xf32>
    %c24_70 = arith.constant 24 : index
    %c0_71 = arith.constant 0 : index
    %69 = vector.load %arg5[%c24_70, %c0_71] : memref<40x128xf32, #tpu.memory_space<vmem>>, vector<16x128xf32>
    %70 = tpu.concatenate %67, %68, %69 in 1 : vector<16x128xf32>, vector<16x128xf32>, vector<16x128xf32> -> vector<16x384xf32>
    %c4 = arith.constant 4 : index
    %c0_72 = arith.constant 0 : index
    %c0_73 = arith.constant 0 : index
    %71 = vector.load %arg2[%c4, %c0_72, %c0_73] : memref<11x384x128xf32, #tpu.memory_space<vmem>>, vector<1x384x128xf32>
    %72 = vector.shape_cast %71 : vector<1x384x128xf32> to vector<384x128xf32>
    %cst_74 = arith.constant dense<0.000000e+00> : vector<16x128xf32>
    %73 = tpu.matmul %70, %72, %cst_74 {dimension_numbers = #tpu.dot_dimension_numbers<[1], [0], [0], [1], [0, 0, 1, 1], [], []>} : vector<16x384xf32>, vector<384x128xf32>, vector<16x128xf32> -> vector<16x128xf32>
    %c4_75 = arith.constant 4 : index
    %c0_76 = arith.constant 0 : index
    %c0_77 = arith.constant 0 : index
    %74 = vector.load %arg3[%c4_75, %c0_76, %c0_77] : memref<11x1x128xf32, #tpu.memory_space<vmem>>, vector<1x1x128xf32>
    %75 = vector.shape_cast %74 : vector<1x1x128xf32> to vector<1x128xf32>
    %76 = vector.broadcast %75 : vector<1x128xf32> to vector<16x128xf32>
    %77 = arith.addf %73, %76 : vector<16x128xf32>
    %cst_78 = arith.constant 0.000000e+00 : f32
    %78 = vector.broadcast %cst_78 : f32 to vector<16x128xf32>
    %79 = arith.maximumf %77, %78 : vector<16x128xf32>
    %c24_79 = arith.constant 24 : index
    %c0_80 = arith.constant 0 : index
    %80 = vector.load %arg5[%c24_79, %c0_80] : memref<40x128xf32, #tpu.memory_space<vmem>>, vector<16x128xf32>
    %81 = arith.addf %79, %80 : vector<16x128xf32>
    %c24_81 = arith.constant 24 : index
    %c0_82 = arith.constant 0 : index
    %82 = vector.load %arg5[%c24_81, %c0_82] : memref<40x128xf32, #tpu.memory_space<vmem>>, vector<16x128xf32>
    tpu.vector_store %arg5[%c24_81, %c0_82], %81 {strides = array<i32>} : memref<40x128xf32, #tpu.memory_space<vmem>>, vector<16x128xf32>,
    %c18_83 = arith.constant 18 : index
    %c0_84 = arith.constant 0 : index
    %83 = vector.load %arg5[%c18_83, %c0_84] : memref<40x128xf32, #tpu.memory_space<vmem>>, vector<16x128xf32>
    %c21_85 = arith.constant 21 : index
    %c0_86 = arith.constant 0 : index
    %84 = vector.load %arg5[%c21_85, %c0_86] : memref<40x128xf32, #tpu.memory_space<vmem>>, vector<16x128xf32>
    %c24_87 = arith.constant 24 : index
    %c0_88 = arith.constant 0 : index
    %85 = vector.load %arg5[%c24_87, %c0_88] : memref<40x128xf32, #tpu.memory_space<vmem>>, vector<16x128xf32>
    %86 = tpu.concatenate %83, %84, %85 in 1 : vector<16x128xf32>, vector<16x128xf32>, vector<16x128xf32> -> vector<16x384xf32>
    %c5 = arith.constant 5 : index
    %c0_89 = arith.constant 0 : index
    %c0_90 = arith.constant 0 : index
    %87 = vector.load %arg2[%c5, %c0_89, %c0_90] : memref<11x384x128xf32, #tpu.memory_space<vmem>>, vector<1x384x128xf32>
    %88 = vector.shape_cast %87 : vector<1x384x128xf32> to vector<384x128xf32>
    %cst_91 = arith.constant dense<0.000000e+00> : vector<16x128xf32>
    %89 = tpu.matmul %86, %88, %cst_91 {dimension_numbers = #tpu.dot_dimension_numbers<[1], [0], [0], [1], [0, 0, 1, 1], [], []>} : vector<16x384xf32>, vector<384x128xf32>, vector<16x128xf32> -> vector<16x128xf32>
    %c5_92 = arith.constant 5 : index
    %c0_93 = arith.constant 0 : index
    %c0_94 = arith.constant 0 : index
    %90 = vector.load %arg3[%c5_92, %c0_93, %c0_94] : memref<11x1x128xf32, #tpu.memory_space<vmem>>, vector<1x1x128xf32>
    %91 = vector.shape_cast %90 : vector<1x1x128xf32> to vector<1x128xf32>
    %92 = vector.broadcast %91 : vector<1x128xf32> to vector<16x128xf32>
    %93 = arith.addf %89, %92 : vector<16x128xf32>
    %cst_95 = arith.constant 0.000000e+00 : f32
    %94 = vector.broadcast %cst_95 : f32 to vector<16x128xf32>
    %95 = arith.maximumf %93, %94 : vector<16x128xf32>
    %c24_96 = arith.constant 24 : index
    %c0_97 = arith.constant 0 : index
    %96 = vector.load %arg5[%c24_96, %c0_97] : memref<40x128xf32, #tpu.memory_space<vmem>>, vector<16x128xf32>
    %97 = arith.addf %95, %96 : vector<16x128xf32>
    %c24_98 = arith.constant 24 : index
    %c0_99 = arith.constant 0 : index
    %98 = vector.load %arg5[%c24_98, %c0_99] : memref<40x128xf32, #tpu.memory_space<vmem>>, vector<16x128xf32>
    tpu.vector_store %arg5[%c24_98, %c0_99], %97 {strides = array<i32>} : memref<40x128xf32, #tpu.memory_space<vmem>>, vector<16x128xf32>,
    %c6_100 = arith.constant 6 : index
    %c0_101 = arith.constant 0 : index
    %99 = vector.load %arg5[%c6_100, %c0_101] : memref<40x128xf32, #tpu.memory_space<vmem>>, vector<16x128xf32>
    %c15_102 = arith.constant 15 : index
    %c0_103 = arith.constant 0 : index
    %100 = vector.load %arg5[%c15_102, %c0_103] : memref<40x128xf32, #tpu.memory_space<vmem>>, vector<16x128xf32>
    %c24_104 = arith.constant 24 : index
    %c0_105 = arith.constant 0 : index
    %101 = vector.load %arg5[%c24_104, %c0_105] : memref<40x128xf32, #tpu.memory_space<vmem>>, vector<16x128xf32>
    %102 = tpu.concatenate %99, %100, %101 in 1 : vector<16x128xf32>, vector<16x128xf32>, vector<16x128xf32> -> vector<16x384xf32>
    %c6_106 = arith.constant 6 : index
    %c0_107 = arith.constant 0 : index
    %c0_108 = arith.constant 0 : index
    %103 = vector.load %arg2[%c6_106, %c0_107, %c0_108] : memref<11x384x128xf32, #tpu.memory_space<vmem>>, vector<1x384x128xf32>
    %104 = vector.shape_cast %103 : vector<1x384x128xf32> to vector<384x128xf32>
    %cst_109 = arith.constant dense<0.000000e+00> : vector<16x128xf32>
    %105 = tpu.matmul %102, %104, %cst_109 {dimension_numbers = #tpu.dot_dimension_numbers<[1], [0], [0], [1], [0, 0, 1, 1], [], []>} : vector<16x384xf32>, vector<384x128xf32>, vector<16x128xf32> -> vector<16x128xf32>
    %c6_110 = arith.constant 6 : index
    %c0_111 = arith.constant 0 : index
    %c0_112 = arith.constant 0 : index
    %106 = vector.load %arg3[%c6_110, %c0_111, %c0_112] : memref<11x1x128xf32, #tpu.memory_space<vmem>>, vector<1x1x128xf32>
    %107 = vector.shape_cast %106 : vector<1x1x128xf32> to vector<1x128xf32>
    %108 = vector.broadcast %107 : vector<1x128xf32> to vector<16x128xf32>
    %109 = arith.addf %105, %108 : vector<16x128xf32>
    %cst_113 = arith.constant 0.000000e+00 : f32
    %110 = vector.broadcast %cst_113 : f32 to vector<16x128xf32>
    %111 = arith.maximumf %109, %110 : vector<16x128xf32>
    %c24_114 = arith.constant 24 : index
    %c0_115 = arith.constant 0 : index
    %112 = vector.load %arg5[%c24_114, %c0_115] : memref<40x128xf32, #tpu.memory_space<vmem>>, vector<16x128xf32>
    %113 = arith.addf %111, %112 : vector<16x128xf32>
    %c24_116 = arith.constant 24 : index
    %c0_117 = arith.constant 0 : index
    %114 = vector.load %arg5[%c24_116, %c0_117] : memref<40x128xf32, #tpu.memory_space<vmem>>, vector<16x128xf32>
    tpu.vector_store %arg5[%c24_116, %c0_117], %113 {strides = array<i32>} : memref<40x128xf32, #tpu.memory_space<vmem>>, vector<16x128xf32>,
    %c22_118 = arith.constant 22 : index
    %c0_119 = arith.constant 0 : index
    %115 = vector.load %arg5[%c22_118, %c0_119] : memref<40x128xf32, #tpu.memory_space<vmem>>, vector<16x128xf32>
    %c23_120 = arith.constant 23 : index
    %c0_121 = arith.constant 0 : index
    %116 = vector.load %arg5[%c23_120, %c0_121] : memref<40x128xf32, #tpu.memory_space<vmem>>, vector<16x128xf32>
    %c24_122 = arith.constant 24 : index
    %c0_123 = arith.constant 0 : index
    %117 = vector.load %arg5[%c24_122, %c0_123] : memref<40x128xf32, #tpu.memory_space<vmem>>, vector<16x128xf32>
    %118 = tpu.concatenate %115, %116, %117 in 1 : vector<16x128xf32>, vector<16x128xf32>, vector<16x128xf32> -> vector<16x384xf32>
    %c7 = arith.constant 7 : index
    %c0_124 = arith.constant 0 : index
    %c0_125 = arith.constant 0 : index
    %119 = vector.load %arg2[%c7, %c0_124, %c0_125] : memref<11x384x128xf32, #tpu.memory_space<vmem>>, vector<1x384x128xf32>
    %120 = vector.shape_cast %119 : vector<1x384x128xf32> to vector<384x128xf32>
    %cst_126 = arith.constant dense<0.000000e+00> : vector<16x128xf32>
    %121 = tpu.matmul %118, %120, %cst_126 {dimension_numbers = #tpu.dot_dimension_numbers<[1], [0], [0], [1], [0, 0, 1, 1], [], []>} : vector<16x384xf32>, vector<384x128xf32>, vector<16x128xf32> -> vector<16x128xf32>
    %c7_127 = arith.constant 7 : index
    %c0_128 = arith.constant 0 : index
    %c0_129 = arith.constant 0 : index
    %122 = vector.load %arg3[%c7_127, %c0_128, %c0_129] : memref<11x1x128xf32, #tpu.memory_space<vmem>>, vector<1x1x128xf32>
    %123 = vector.shape_cast %122 : vector<1x1x128xf32> to vector<1x128xf32>
    %124 = vector.broadcast %123 : vector<1x128xf32> to vector<16x128xf32>
    %125 = arith.addf %121, %124 : vector<16x128xf32>
    %cst_130 = arith.constant 0.000000e+00 : f32
    %126 = vector.broadcast %cst_130 : f32 to vector<16x128xf32>
    %127 = arith.maximumf %125, %126 : vector<16x128xf32>
    %c24_131 = arith.constant 24 : index
    %c0_132 = arith.constant 0 : index
    %128 = vector.load %arg5[%c24_131, %c0_132] : memref<40x128xf32, #tpu.memory_space<vmem>>, vector<16x128xf32>
    %129 = arith.addf %127, %128 : vector<16x128xf32>
    %c24_133 = arith.constant 24 : index
    %c0_134 = arith.constant 0 : index
    %130 = vector.load %arg5[%c24_133, %c0_134] : memref<40x128xf32, #tpu.memory_space<vmem>>, vector<16x128xf32>
    tpu.vector_store %arg5[%c24_133, %c0_134], %129 {strides = array<i32>} : memref<40x128xf32, #tpu.memory_space<vmem>>, vector<16x128xf32>,
    %c18_135 = arith.constant 18 : index
    %c0_136 = arith.constant 0 : index
    %131 = vector.load %arg5[%c18_135, %c0_136] : memref<40x128xf32, #tpu.memory_space<vmem>>, vector<16x128xf32>
    %c21_137 = arith.constant 21 : index
    %c0_138 = arith.constant 0 : index
    %132 = vector.load %arg5[%c21_137, %c0_138] : memref<40x128xf32, #tpu.memory_space<vmem>>, vector<16x128xf32>
    %c24_139 = arith.constant 24 : index
    %c0_140 = arith.constant 0 : index
    %133 = vector.load %arg5[%c24_139, %c0_140] : memref<40x128xf32, #tpu.memory_space<vmem>>, vector<16x128xf32>
    %134 = tpu.concatenate %131, %132, %133 in 1 : vector<16x128xf32>, vector<16x128xf32>, vector<16x128xf32> -> vector<16x384xf32>
    %c8 = arith.constant 8 : index
    %c0_141 = arith.constant 0 : index
    %c0_142 = arith.constant 0 : index
    %135 = vector.load %arg2[%c8, %c0_141, %c0_142] : memref<11x384x128xf32, #tpu.memory_space<vmem>>, vector<1x384x128xf32>
    %136 = vector.shape_cast %135 : vector<1x384x128xf32> to vector<384x128xf32>
    %cst_143 = arith.constant dense<0.000000e+00> : vector<16x128xf32>
    %137 = tpu.matmul %134, %136, %cst_143 {dimension_numbers = #tpu.dot_dimension_numbers<[1], [0], [0], [1], [0, 0, 1, 1], [], []>} : vector<16x384xf32>, vector<384x128xf32>, vector<16x128xf32> -> vector<16x128xf32>
    %c8_144 = arith.constant 8 : index
    %c0_145 = arith.constant 0 : index
    %c0_146 = arith.constant 0 : index
    %138 = vector.load %arg3[%c8_144, %c0_145, %c0_146] : memref<11x1x128xf32, #tpu.memory_space<vmem>>, vector<1x1x128xf32>
    %139 = vector.shape_cast %138 : vector<1x1x128xf32> to vector<1x128xf32>
    %140 = vector.broadcast %139 : vector<1x128xf32> to vector<16x128xf32>
    %141 = arith.addf %137, %140 : vector<16x128xf32>
    %cst_147 = arith.constant 0.000000e+00 : f32
    %142 = vector.broadcast %cst_147 : f32 to vector<16x128xf32>
    %143 = arith.maximumf %141, %142 : vector<16x128xf32>
    %c24_148 = arith.constant 24 : index
    %c0_149 = arith.constant 0 : index
    %144 = vector.load %arg5[%c24_148, %c0_149] : memref<40x128xf32, #tpu.memory_space<vmem>>, vector<16x128xf32>
    %145 = arith.addf %143, %144 : vector<16x128xf32>
    %c24_150 = arith.constant 24 : index
    %c0_151 = arith.constant 0 : index
    %146 = vector.load %arg5[%c24_150, %c0_151] : memref<40x128xf32, #tpu.memory_space<vmem>>, vector<16x128xf32>
    tpu.vector_store %arg5[%c24_150, %c0_151], %145 {strides = array<i32>} : memref<40x128xf32, #tpu.memory_space<vmem>>, vector<16x128xf32>,
    %c6_152 = arith.constant 6 : index
    %c0_153 = arith.constant 0 : index
    %147 = vector.load %arg5[%c6_152, %c0_153] : memref<40x128xf32, #tpu.memory_space<vmem>>, vector<16x128xf32>
    %c15_154 = arith.constant 15 : index
    %c0_155 = arith.constant 0 : index
    %148 = vector.load %arg5[%c15_154, %c0_155] : memref<40x128xf32, #tpu.memory_space<vmem>>, vector<16x128xf32>
    %c24_156 = arith.constant 24 : index
    %c0_157 = arith.constant 0 : index
    %149 = vector.load %arg5[%c24_156, %c0_157] : memref<40x128xf32, #tpu.memory_space<vmem>>, vector<16x128xf32>
    %150 = tpu.concatenate %147, %148, %149 in 1 : vector<16x128xf32>, vector<16x128xf32>, vector<16x128xf32> -> vector<16x384xf32>
    %c9 = arith.constant 9 : index
    %c0_158 = arith.constant 0 : index
    %c0_159 = arith.constant 0 : index
    %151 = vector.load %arg2[%c9, %c0_158, %c0_159] : memref<11x384x128xf32, #tpu.memory_space<vmem>>, vector<1x384x128xf32>
    %152 = vector.shape_cast %151 : vector<1x384x128xf32> to vector<384x128xf32>
    %cst_160 = arith.constant dense<0.000000e+00> : vector<16x128xf32>
    %153 = tpu.matmul %150, %152, %cst_160 {dimension_numbers = #tpu.dot_dimension_numbers<[1], [0], [0], [1], [0, 0, 1, 1], [], []>} : vector<16x384xf32>, vector<384x128xf32>, vector<16x128xf32> -> vector<16x128xf32>
    %c9_161 = arith.constant 9 : index
    %c0_162 = arith.constant 0 : index
    %c0_163 = arith.constant 0 : index
    %154 = vector.load %arg3[%c9_161, %c0_162, %c0_163] : memref<11x1x128xf32, #tpu.memory_space<vmem>>, vector<1x1x128xf32>
    %155 = vector.shape_cast %154 : vector<1x1x128xf32> to vector<1x128xf32>
    %156 = vector.broadcast %155 : vector<1x128xf32> to vector<16x128xf32>
    %157 = arith.addf %153, %156 : vector<16x128xf32>
    %cst_164 = arith.constant 0.000000e+00 : f32
    %158 = vector.broadcast %cst_164 : f32 to vector<16x128xf32>
    %159 = arith.maximumf %157, %158 : vector<16x128xf32>
    %c24_165 = arith.constant 24 : index
    %c0_166 = arith.constant 0 : index
    %160 = vector.load %arg5[%c24_165, %c0_166] : memref<40x128xf32, #tpu.memory_space<vmem>>, vector<16x128xf32>
    %161 = arith.addf %159, %160 : vector<16x128xf32>
    %c24_167 = arith.constant 24 : index
    %c0_168 = arith.constant 0 : index
    %162 = vector.load %arg5[%c24_167, %c0_168] : memref<40x128xf32, #tpu.memory_space<vmem>>, vector<16x128xf32>
    tpu.vector_store %arg5[%c24_167, %c0_168], %161 {strides = array<i32>} : memref<40x128xf32, #tpu.memory_space<vmem>>, vector<16x128xf32>,
    %c22_169 = arith.constant 22 : index
    %c0_170 = arith.constant 0 : index
    %163 = vector.load %arg5[%c22_169, %c0_170] : memref<40x128xf32, #tpu.memory_space<vmem>>, vector<16x128xf32>
    %c23_171 = arith.constant 23 : index
    %c0_172 = arith.constant 0 : index
    %164 = vector.load %arg5[%c23_171, %c0_172] : memref<40x128xf32, #tpu.memory_space<vmem>>, vector<16x128xf32>
    %c24_173 = arith.constant 24 : index
    %c0_174 = arith.constant 0 : index
    %165 = vector.load %arg5[%c24_173, %c0_174] : memref<40x128xf32, #tpu.memory_space<vmem>>, vector<16x128xf32>
    %166 = tpu.concatenate %163, %164, %165 in 1 : vector<16x128xf32>, vector<16x128xf32>, vector<16x128xf32> -> vector<16x384xf32>
    %c10 = arith.constant 10 : index
    %c0_175 = arith.constant 0 : index
    %c0_176 = arith.constant 0 : index
    %167 = vector.load %arg2[%c10, %c0_175, %c0_176] : memref<11x384x128xf32, #tpu.memory_space<vmem>>, vector<1x384x128xf32>
    %168 = vector.shape_cast %167 : vector<1x384x128xf32> to vector<384x128xf32>
    %cst_177 = arith.constant dense<0.000000e+00> : vector<16x128xf32>
    %169 = tpu.matmul %166, %168, %cst_177 {dimension_numbers = #tpu.dot_dimension_numbers<[1], [0], [0], [1], [0, 0, 1, 1], [], []>} : vector<16x384xf32>, vector<384x128xf32>, vector<16x128xf32> -> vector<16x128xf32>
    %c10_178 = arith.constant 10 : index
    %c0_179 = arith.constant 0 : index
    %c0_180 = arith.constant 0 : index
    %170 = vector.load %arg3[%c10_178, %c0_179, %c0_180] : memref<11x1x128xf32, #tpu.memory_space<vmem>>, vector<1x1x128xf32>
    %171 = vector.shape_cast %170 : vector<1x1x128xf32> to vector<1x128xf32>
    %172 = vector.broadcast %171 : vector<1x128xf32> to vector<16x128xf32>
    %173 = arith.addf %169, %172 : vector<16x128xf32>
    %c0_181 = arith.constant 0 : index
    %c0_182 = arith.constant 0 : index
    %c0_183 = arith.constant 0 : index
    %174 = vector.load %arg4[%c0_181, %c0_182, %c0_183] : memref<1x16x128xf32, #tpu.memory_space<vmem>>, vector<1x16x128xf32>
    %175 = vector.shape_cast %174 : vector<1x16x128xf32> to vector<16x128xf32>
    %176 = vector.shape_cast %173 : vector<16x128xf32> to vector<1x16x128xf32>
    tpu.vector_store %arg4[%c0_181, %c0_182, %c0_183], %176 {strides = array<i32>} : memref<1x16x128xf32, #tpu.memory_space<vmem>>, vector<1x16x128xf32>,
    return
  }
  func.func @transform_0(%arg0: i32) -> (i32, i32, i32) {
    %c0_i32 = arith.constant 0 : i32
    %c0_i32_0 = arith.constant 0 : i32
    %c0_i32_1 = arith.constant 0 : i32
    return %arg0, %c0_i32, %c0_i32_0 : i32, i32, i32
  }
  func.func @transform_1(%arg0: i32) -> (i32, i32, i32) {
    %c0_i32 = arith.constant 0 : i32
    %c0_i32_0 = arith.constant 0 : i32
    %c0_i32_1 = arith.constant 0 : i32
    %c0_i32_2 = arith.constant 0 : i32
    return %c0_i32, %c0_i32_0, %c0_i32_1 : i32, i32, i32
  }
  func.func @transform_2(%arg0: i32) -> (i32, i32, i32) {
    %c0_i32 = arith.constant 0 : i32
    %c0_i32_0 = arith.constant 0 : i32
    %c0_i32_1 = arith.constant 0 : i32
    %c0_i32_2 = arith.constant 0 : i32
    return %c0_i32, %c0_i32_0, %c0_i32_1 : i32, i32, i32
  }
  func.func @transform_3(%arg0: i32) -> (i32, i32, i32) {
    %c0_i32 = arith.constant 0 : i32
    %c0_i32_0 = arith.constant 0 : i32
    %c0_i32_1 = arith.constant 0 : i32
    return %arg0, %c0_i32, %c0_i32_0 : i32, i32, i32
  }
}

</mosaic_0001>

<bundles_post_ra>
// kernel: tpu_custom_call.1
= control target key start
LH: loop header
LB: loop body
LE: loop exit
PB: predicated region body
PF: predicated region fallthrough
CT: control target
= control target key end

     0   :  { %8 = vsyncpa [#allocation4], 0  ;;  %s4336_s0 = inlined_call_operand.hbm [shape: f32[2,16,128], index: 0, kind: input, shape index: {}]   ;;  %s4337_s1 = inlined_call_operand.hbm [shape: f32[11,384,128], index: 1, kind: input, shape index: {}]   ;;  %s4338_s2 = inlined_call_operand.hbm [shape: f32[11,1,128], index: 2, kind: input, shape index: {}]   ;;  %s4339_s3 = inlined_call_operand.hbm [shape: f32[2,16,128], index: 3, kind: output, shape index: {}]  }
   0x1   :  { %10 = vsyncpa [#allocation4 + $0x1], 0 }
   0x2   :  { %11 = vsyncpa [#allocation7], 0 }
   0x3   :  { %12 = vsyncpa [#allocation5], 0 }
   0x4   :  { %14 = vsyncpa [#allocation5 + $0x1], 0  ;;  %s4019_s12 = smov 0   ;;  %s4021_s13 = smov 0  }
   0x5   :  { %s4023_s14 = smov 0   ;;  %s4025_s15 = smov 0  }
   0x6 LB: > { %s4040_s16 = sadd.s32 4294967295, %s3986_s15   ;;  %s2732_s17 = sadd.s32 4294967294, %s3986_s15   ;;  %s3986_s15 = sphi %s4025_s15, %s4360_s15   ;;  %s3982_s14 = sphi %s4023_s14, %s4359_s14   ;;  %s3978_s13 = sphi %s4021_s13, %s4358_s13   ;;  %s3974_s12 = sphi %s4019_s12, %s4357_s12  }
   0x7   : > { %p40_p0 = scmp.ne.s32.totalorder %s3978_s13, %s3974_s12  ;;  %p4340_p1 = scmp.eq.s32.totalorder %s4040_s16, 0 }
   0x8   : > { %p106_p2 = scmp.eq.s32.totalorder %s4040_s16, 1  ;;  %p112_p3 = scmp.eq.s32.totalorder %s2732_s17, 1 }
   0x9   : > { %p4049_p4 = por %p4340_p1, %p40_p0  ;;  %p2733_p5 = scmp.ge.s32.totalorder %s3986_s15, 1 }
   0xa   : > { %p4054_p6 = por %p112_p3, %p40_p0  ;;  %p119_p7 = scmp.lt.s32.totalorder %s3986_s15, 3 }
   0xb   : > { %s4344_s18 = scalar_select %p4049_p4, 1, 0 }
   0xc   : > { %s4345_s19 = scalar_select %p4054_p6, 1, 0 }
   0xd   : > { %p4059_p8 = pnand %p2733_p5, %p119_p7  ;;  %s3988_s21 = smov [#allocation6]  }
   0xe   : > { %s131_s22 = sshll.u32 %s3988_s21, 4  ;;  %s3989_s24 = smov [#allocation8]   ;;  %s132_s22 = int_to_ptr.vmem [resolvable:$true] %s131_s22 }
   0xf   : > { %s4346_s20 = scalar_select %p4059_p8, 1, 0 }
  0x10   : > { %p3776_p9 = pneg %p4059_p8  ;;  %s144_s25 = sshll.u32 %s3989_s24, 4  ;;  %s4072_s25 = int_to_ptr.vmem [resolvable:$true] %s144_s25 }
  0x11   : > { %s3849_s26 = scalar_lea.vmem %s132_s22, 67584  ;;  %p3857_p5 = scmp.lt.s32.totalorder %s132_s22, %s132_s22 }
  0x12   : > { %p4068_p11 = pnand %p3776_p9, %p4340_p1  ;;  %p3850_p13 = scmp.ne.s32.totalorder %s132_s22, %s3849_s26 }
  0x13   : > { %p3858_p7 = scmp.lt.s32.totalorder %s3849_s26, %s3849_s26 }
  0x14   : > { %p3840_p12 = pneg %p4068_p11 }
  0x15   : > { %p3859_p9 = por %p3858_p7, %p3857_p5 }
  0x16   : > { %p3852_p0 = pnand %p3850_p13, %p3840_p12 }
  0x18   : > { %p3853_p3 = pneg %p3852_p0 }
  0x1a   : > { %p3860_p10 = pnand %p3859_p9, %p3853_p3 }
  0x1c   : > { %3863 = shalt.err (!%p3860_p10)
}
  0x1d   : > { %s3990_s27 = smov 128   ;;  %s3991_s28 = smov 8  }
  0x1e   : > { %3779 = dma.hbm_to_vmem [thread:$0]  (!%p4068_p11), %s4337_s1, 67584, %s132_s22, [#allocation7], %s3990_s27, %s3990_s27, %s3991_s28  }
  0x1f   : > { %s3875_s4 = scalar_lea.vmem %s4072_s25, 176  ;;  %s3882_s5 = scalar_lea.vmem %s4072_s25, 192 }
  0x20   : > { %p3876_p13 = scmp.ne.s32.totalorder %s4072_s25, %s3875_s4  ;;  %p3883_p3 = scmp.lt.s32.totalorder %s4072_s25, %s4072_s25 }
  0x21   : > { %p3884_p5 = scmp.lt.s32.totalorder %s3882_s5, %s3875_s4 }
  0x22   : > { %p3878_p10 = pnand %p3876_p13, %p3840_p12 }
  0x23   : > { %p3885_p7 = por %p3884_p5, %p3883_p3 }
  0x24   : > { %p3879_p0 = pneg %p3878_p10 }
  0x26   : > { %p3886_p9 = pnand %p3885_p7, %p3879_p0 }
  0x28   : > { %3889 = shalt.err (!%p3886_p9)
}
  0x29   : > { %s3992_s6 = smov 16   ;;  %s3993_s7 = smov 1  }
  0x2a   : > { %3782 = dma.hbm_to_vmem [thread:$0]  (!%p4068_p11), %s4338_s2, 176, %s4072_s25, [#allocation7], %s3992_s6, %s3992_s6, %s3993_s7  }
  0x2b   : > { %s4102_s10 = sadd.s32 1, %s3986_s15   ;;  %s27_s17 = sadd.s32 1, %s3982_s14 }
  0x2c   : > { %s24_s11 = ssub.s32 %s3986_s15, %s4102_s10  ;;  %p34_p13 = scmp.ne.s32.totalorder %s3982_s14, %s3978_s13 }
  0x2d   : > { %p25_p12 = scmp.eq.s32.totalorder %s24_s11, 0  ;;  %p35_p10 = scmp.eq.s32.totalorder %s3986_s15, 0 }
  0x2e   : > { %p4115_p3 = por %p106_p2, %p34_p13  ;;  %p3793_p5 = scmp.lt.s32.totalorder %s3986_s15, 2 }
  0x2f   : > { %s4111_s21 = scalar_select %p25_p12, %s3982_s14, %s27_s17  }
  0x30   : > { %p36_p0 = por %p35_p10, %p34_p13  ;;  %s158_s23 = sand.u32 1, %s3982_s14  }
  0x31   : > { %s4348_s22 = scalar_select %p4115_p3, 1, 0 }
  0x32   : > { %s2737_s24 = sshll.u32 %s158_s23, 4  ;;  %s2761_s25 = sshll.u32 %s3986_s15, 8 }
  0x33   : > { %s4125_s30 = scalar_lea.hbm %s4336_s0, %s2761_s25  ;;  %s162_s4 = scalar_lea.vmem [#allocation3], %s2737_s24 }
  0x34   : > { %s169_s5 = sshll.u32 %s162_s4, 4  ;;  %p4129_p2 = pnand %p3793_p5, %p36_p0  ;;  %s4127_s5 = int_to_ptr.vmem [resolvable:$true] %s169_s5 }
  0x35   : > { %s4133_s7 = scalar_lea.sflag [#allocation4], %s158_s23  ;;  %s3890_s8 = scalar_lea.hbm %s4125_s30, 256 }
  0x36   : > { %p3891_p11 = scmp.ne.s32.totalorder %s4125_s30, %s3890_s8  ;;  %p3892_p7 = pneg %p4129_p2 }
  0x37   : > { %s3895_s17 = scalar_lea.hbm %s4336_s0, 512  ;;  %p3896_p13 = scmp.lt.s32.totalorder %s4125_s30, %s4336_s0 }
  0x38   : > { %p3893_p9 = pnand %p3892_p7, %p3891_p11  ;;  %p3897_p10 = scmp.lt.s32.totalorder %s3895_s17, %s3890_s8 }
  0x3a   : > { %p3894_p12 = pneg %p3893_p9  ;;  %p3898_p0 = por %p3897_p10, %p3896_p13 }
  0x3c   : > { %p3899_p5 = pnand %p3898_p0, %p3894_p12 }
  0x3e   : > { %3902 = shalt.err (!%p3899_p5)
}
  0x3f   : > { %s3903_s23 = scalar_lea.vmem %s4127_s5, 256  ;;  %s3994_s26 = smov [#allocation3]  }
  0x40   : > { %p3904_p1 = scmp.ne.s32.totalorder %s4127_s5, %s3903_s23  ;;  %s3908_s29 = sshll.u32 %s3994_s26, 4  ;;  %s3909_s29 = int_to_ptr.vmem [resolvable:$false] %s3908_s29 }
  0x41   : > { %s3910_s4 = scalar_lea.vmem %s3909_s29, 512  ;;  %p3911_p9 = scmp.lt.s32.totalorder %s4127_s5, %s3909_s29 }
  0x42   : > { %p3906_p6 = pnand %p3904_p1, %p3892_p7  ;;  %p3912_p3 = scmp.lt.s32.totalorder %s3910_s4, %s3903_s23 }
  0x44   : > { %p3907_p11 = pneg %p3906_p6  ;;  %p3913_p4 = por %p3912_p3, %p3911_p9 }
  0x46   : > { %p3914_p8 = pnand %p3913_p4, %p3907_p11 }
  0x48   : > { %3917 = shalt.err (!%p3914_p8)
}
  0x49   : > { %3786 = dma.hbm_to_vmem [thread:$0]  (!%p4129_p2), %s4125_s30, 256, %s4127_s5, %s4133_s7, %s3990_s27, %s3990_s27, %s3991_s28  }
  0x4a   : > { %p4350_p1 = scmp.ne.s32.totalorder %s4346_s20, 0 }
  0x4b   : > { %s4160_s8 = sand.u32 (!%p4350_p1), 1, %s3978_s13   ;;  %p4351_p4 = scmp.ne.s32.totalorder (!%p4350_p1), %s4344_s18, 0 }
  0x4c   : > { %181 = sbr.rel (%p4350_p1) target bundleno = 2458 (0x99a), region = 32  ;;  %s2741_s9 = sshll.u32 (!%p4350_p1), %s4160_s8, 4 }
  0x4d   : > { %s184_s11 = scalar_lea.sflag (!%p4350_p1), [#allocation4], %s4160_s8  ;;  %s4166_s6 = scalar_lea.vmem (!%p4350_p1), [#allocation3], %s2741_s9 }
  0x51   : > { %3961 = dma.done.wait (%p4351_p4), %s184_s11, 256  }
  0x52   : > { %3963 = vsyncadd (%p4351_p4), %s184_s11, 4294967040  ;;  %p4352_p6 = scmp.eq.s32.totalorder %s4040_s16, 0 }
  0x54   : > { %3965 = dma.done.wait (%p4352_p6), [#allocation7], 67760   ;;  %p4353_p8 = pmov %p4352_p6 }
  0x55   : > { %v3995_v0 = vmov 0.0   ;;  %v262_v1 = vld [vmem:[#allocation6 + $0xf8] sm:$0xff]  ;;  %v261_v3 = vld [vmem:[#allocation6 + $0xf0] sm:$0xff]  ;;  %v260_v6 = vld [vmem:[#allocation6 + $0xe8] sm:$0xff]  ;;  %s217_s18 = scalar_lea.vmem [#allocation9], %s2741_s9  ;;  %s2762_s27 = sshll.u32 %s4040_s16, 8 }
  0x56   : > { %3967 = vsyncadd (%p4353_p8), [#allocation7], 4294899536  ;;  %220 = vst [vmem:[#allocation2 + $0x10] sm:$0xff] %v3995_v0  ;;  %v246_v2 = vld [vmem:[#allocation6 + $0x78] sm:$0xff]  ;;  %2763 = vmatprep.subr.mxu0 %v262_v1  ;;  %v245_v5 = vld [vmem:[#allocation6 + $0x70] sm:$0xff]  ;;  %s2640_s20 = sshll.u32 %s217_s18, 4  ;;  %s4293_s5 = scalar_lea.hbm %s4339_s3, %s2762_s27  ;;  %s4288_s20 = int_to_ptr.vmem [resolvable:$true] %s2640_s20 }
  0x57   : > { %218 = vst [vmem:[#allocation2] sm:$0xff] %v3995_v0  ;;  %219 = vst [vmem:[#allocation2 + $0x8] sm:$0xff] %v3995_v0  ;;  %v278_v4 = vld [vmem:[#allocation6 + $0x178] sm:$0xff]  ;;  %2764 = vmatpush3.msra.mxu0 %v246_v2  ;;  %v277_v7 = vld [vmem:[#allocation6 + $0x170] sm:$0xff]  ;;  %s2627_s7 = scalar_lea.sflag [#allocation5], %s4160_s8  ;;  %s3918_s17 = scalar_lea.vmem %s4288_s20, 256 }
  0x58   : > { %3379 = vmatprep.subr.mxu1 %v278_v4  ;;  %2765 = vmatprep.subr.mxu0 %v261_v3  ;;  %v244_v8 = vld [vmem:[#allocation6 + $0x68] sm:$0xff]  ;;  %v259_v10 = vld [vmem:[#allocation6 + $0xe0] sm:$0xff]  ;;  %v258_v13 = vld [vmem:[#allocation6 + $0xd8] sm:$0xff]  ;;  %p3919_p3 = scmp.ne.s32.totalorder %s4288_s20, %s3918_s17  ;;  %p4354_p2 = scmp.ne.s32.totalorder %s4348_s22, 0 }
  0x59   : > { %3380 = vmatpush3.msra.mxu1 %v278_v4  ;;  %v276_v9 = vld [vmem:[#allocation6 + $0x168] sm:$0xff]  ;;  %2766 = vmatpush3.msra.mxu0 %v245_v5  ;;  %v243_v11 = vld [vmem:[#allocation6 + $0x60] sm:$0xff]  ;;  %v242_v14 = vld [vmem:[#allocation6 + $0x58] sm:$0xff]  ;;  %s3996_s16 = smov [#allocation9]  }
  0x5a   : > { %3381 = vmatprep.subr.mxu1 %v277_v7  ;;  %2767 = vmatprep.subr.mxu0 %v260_v6  ;;  %v275_v12 = vld [vmem:[#allocation6 + $0x160] sm:$0xff]  ;;  %v274_v15 = vld [vmem:[#allocation6 + $0x158] sm:$0xff]  ;;  %v257_v16 = vld [vmem:[#allocation6 + $0xd0] sm:$0xff]  ;;  %p3920_p7 = pnand %p3919_p3, %p4354_p2  ;;  %s3922_s24 = sshll.u32 %s3996_s16, 4  ;;  %s3923_s24 = int_to_ptr.vmem [resolvable:$false] %s3922_s24 }
  0x5b   : > { %3382 = vmatpush3.msra.mxu1 %v277_v7  ;;  %2768 = vmatpush3.msra.mxu0 %v244_v8  ;;  %v241_v17 = vld [vmem:[#allocation6 + $0x50] sm:$0xff]  ;;  %v256_v19 = vld [vmem:[#allocation6 + $0xc8] sm:$0xff]  ;;  %v255_v22 = vld [vmem:[#allocation6 + $0xc0] sm:$0xff]  ;;  %s3924_s25 = scalar_lea.vmem %s3923_s24, 512  ;;  %p3925_p13 = scmp.lt.s32.totalorder %s4288_s20, %s3923_s24 }
  0x5c   : > { %3383 = vmatprep.subr.mxu1 %v276_v9  ;;  %2769 = vmatprep.subr.mxu0 %v259_v10  ;;  %v273_v18 = vld [vmem:[#allocation6 + $0x150] sm:$0xff]  ;;  %v240_v20 = vld [vmem:[#allocation6 + $0x48] sm:$0xff]  ;;  %v239_v23 = vld [vmem:[#allocation6 + $0x40] sm:$0xff]  ;;  %p3921_p12 = pneg %p3920_p7  ;;  %p3926_p10 = scmp.lt.s32.totalorder %s3924_s25, %s3918_s17 }
  0x5d   : > { %3384 = vmatpush3.msra.mxu1 %v276_v9  ;;  %2770 = vmatpush3.msra.mxu0 %v243_v11  ;;  %v272_v21 = vld [vmem:[#allocation6 + $0x148] sm:$0xff]  ;;  %v271_v24 = vld [vmem:[#allocation6 + $0x140] sm:$0xff]  ;;  %v254_v25 = vld [vmem:[#allocation6 + $0xb8] sm:$0xff] }
  0x5e   : > { %3385 = vmatprep.subr.mxu1 %v275_v12  ;;  %2771 = vmatprep.subr.mxu0 %v258_v13  ;;  %v238_v26 = vld [vmem:[#allocation6 + $0x38] sm:$0xff]  ;;  %v4177_v28 = vld [vmem:[%s4166_s6] sm:$0xff]  ;;  %v252_v33 = vld [vmem:[#allocation6 + $0xa8] sm:$0xff]  ;;  %p3927_p0 = por %p3926_p10, %p3925_p13 }
  0x5f   : > { %3386 = vmatpush3.msra.mxu1 %v275_v12  ;;  %2772 = vmatpush3.msra.mxu0 %v242_v14  ;;  %v270_v27 = vld [vmem:[#allocation6 + $0x138] sm:$0xff]  ;;  %v253_v29 = vld [vmem:[#allocation6 + $0xb0] sm:$0xff]  ;;  %223 = vst [vmem:[#allocation2 + $0x18] sm:$0xff] %v4177_v28  ;;  %v236_v34 = vld [vmem:[#allocation6 + $0x28] sm:$0xff] }
  0x60   : > { %3387 = vmatprep.subr.mxu1 %v274_v15  ;;  %2773 = vmatprep.subr.mxu0 %v257_v16  ;;  %v4181_v30 = vld [vmem:[%s4166_s6 + $0x8] sm:$0xff]  ;;  %v237_v31 = vld [vmem:[#allocation6 + $0x30] sm:$0xff]  ;;  %v251_v36 = vld [vmem:[#allocation6 + $0xa0] sm:$0xff]  ;;  %p3928_p5 = pnand %p3927_p0, %p3921_p12 }
  0x61   : > { %3388 = vmatpush3.msra.mxu1 %v274_v15  ;;  %2774 = vmatpush3.msra.mxu0 %v241_v17  ;;  %v269_v32 = vld [vmem:[#allocation6 + $0x130] sm:$0xff]  ;;  %224 = vst [vmem:[#allocation2 + $0x20] sm:$0xff] %v4181_v30  ;;  %v268_v35 = vld [vmem:[#allocation6 + $0x128] sm:$0xff]  ;;  %v235_v37 = vld [vmem:[#allocation6 + $0x20] sm:$0xff] }
  0x62   : > { %3389 = vmatprep.subr.mxu1 %v273_v18  ;;  %2775 = vmatprep.subr.mxu0 %v256_v19  ;;  %v267_v38 = vld [vmem:[#allocation6 + $0x120] sm:$0xff]  ;;  %v250_v39 = vld [vmem:[#allocation6 + $0x98] sm:$0xff]  ;;  %v249_v42 = vld [vmem:[#allocation6 + $0x90] sm:$0xff] }
  0x63   : > { %3390 = vmatpush3.msra.mxu1 %v273_v18  ;;  %2776 = vmatpush3.msra.mxu0 %v240_v20  ;;  %v234_v40 = vld [vmem:[#allocation6 + $0x18] sm:$0xff]  ;;  %v233_v43 = vld [vmem:[#allocation6 + $0x10] sm:$0xff]  ;;  %v248_v45 = vld [vmem:[#allocation6 + $0x88] sm:$0xff] }
  0x64   : > { %3391 = vmatprep.subr.mxu1 %v272_v21  ;;  %2777 = vmatprep.subr.mxu0 %v255_v22  ;;  %v266_v41 = vld [vmem:[#allocation6 + $0x118] sm:$0xff]  ;;  %v265_v44 = vld [vmem:[#allocation6 + $0x110] sm:$0xff]  ;;  %v232_v46 = vld [vmem:[#allocation6 + $0x8] sm:$0xff] }
  0x65   : > { %3392 = vmatpush3.msra.mxu1 %v272_v21  ;;  %2778 = vmatpush3.msra.mxu0 %v239_v23  ;;  %v264_v47 = vld [vmem:[#allocation6 + $0x108] sm:$0xff]  ;;  %v247_v48 = vld [vmem:[#allocation6 + $0x80] sm:$0xff]  ;;  %v478_v54 = vld [vmem:[#allocation6 + $0x278] sm:$0xff] }
  0x66   : > { %3393 = vmatprep.subr.mxu1 %v271_v24  ;;  %2779 = vmatprep.subr.mxu0 %v254_v25  ;;  %v227_v49 = vld [vmem:[#allocation2 + $0x17] sm:$0xff]  ;;  %v231_v50 = vld [vmem:[#allocation6] sm:$0xff]  ;;  %v494_v55 = vld [vmem:[#allocation6 + $0x2f8] sm:$0xff] }
  0x67   : > { %3394 = vmatpush3.msra.mxu1 %v271_v24  ;;  %2780 = vmatpush3.msra.mxu0 %v238_v26  ;;  %v225_v51 = vld [vmem:[#allocation2 + $0x16] sm:$0xff]  ;;  %v263_v52 = vld [vmem:[#allocation6 + $0x100] sm:$0xff]  ;;  %v462_v57 = vld [vmem:[#allocation6 + $0x1f8] sm:$0xff] }
  0x68   : > { %3395 = vmatprep.subr.mxu1 %v270_v27  ;;  %2781 = vmatprep.subr.mxu0 %v253_v29  ;;  %v228_v53 = vld [vmem:[#allocation2 + $0x1f] sm:$0xff]  ;;  %v492_v61 = vld [vmem:[#allocation6 + $0x2e8] sm:$0xff]  ;;  %v491_v0 = vld [vmem:[#allocation6 + $0x2e0] sm:$0xff] }
  0x69   : > { %3396 = vmatpush3.msra.mxu1 %v270_v27  ;;  %2782 = vmatpush3.msra.mxu0 %v237_v31  ;;  %v226_v56 = vld [vmem:[#allocation2 + $0x1e] sm:$0xff]  ;;  %v476_v62 = vld [vmem:[#allocation6 + $0x268] sm:$0xff]  ;;  %v475_v1 = vld [vmem:[#allocation6 + $0x260] sm:$0xff] }
  0x6a   : > { %3397 = vmatprep.subr.mxu1 %v269_v32  ;;  %2783 = vmatprep.subr.mxu0 %v252_v33  ;;  %v493_v58 = vld [vmem:[#allocation6 + $0x2f0] sm:$0xff]  ;;  %v460_v63 = vld [vmem:[#allocation6 + $0x1e8] sm:$0xff]  ;;  %v459_v2 = vld [vmem:[#allocation6 + $0x1e0] sm:$0xff] }
  0x6b   : > { %3398 = vmatpush3.msra.mxu1 %v269_v32  ;;  %2784 = vmatpush3.msra.mxu0 %v236_v34  ;;  %v477_v59 = vld [vmem:[#allocation6 + $0x270] sm:$0xff]  ;;  %v490_v3 = vld [vmem:[#allocation6 + $0x2d8] sm:$0xff]  ;;  %v488_v9 = vld [vmem:[#allocation6 + $0x2c8] sm:$0xff] }
  0x6c   : > { %3399 = vmatprep.subr.mxu1 %v268_v35  ;;  %2785 = vmatprep.subr.mxu0 %v251_v36  ;;  %v461_v60 = vld [vmem:[#allocation6 + $0x1f0] sm:$0xff]  ;;  %v474_v4 = vld [vmem:[#allocation6 + $0x258] sm:$0xff]  ;;  %v487_v10 = vld [vmem:[#allocation6 + $0x2c0] sm:$0xff] }
  0x6d   : > { %3400 = vmatpush3.msra.mxu1 %v268_v35  ;;  %2786 = vmatpush3.msra.mxu0 %v235_v37  ;;  %v458_v5 = vld [vmem:[#allocation6 + $0x1d8] sm:$0xff]  ;;  %v473_v6 = vld [vmem:[#allocation6 + $0x250] sm:$0xff]  ;;  %v472_v12 = vld [vmem:[#allocation6 + $0x248] sm:$0xff] }
  0x6e   : > { %3401 = vmatprep.subr.mxu1 %v267_v38  ;;  %2787 = vmatprep.subr.mxu0 %v250_v39  ;;  %v457_v7 = vld [vmem:[#allocation6 + $0x1d0] sm:$0xff]  ;;  %v486_v11 = vld [vmem:[#allocation6 + $0x2b8] sm:$0xff]  ;;  %v456_v13 = vld [vmem:[#allocation6 + $0x1c8] sm:$0xff] }
  0x6f   : > { %3402 = vmatpush3.msra.mxu1 %v267_v38  ;;  %2788 = vmatpush3.msra.mxu0 %v234_v40  ;;  %v489_v8 = vld [vmem:[#allocation6 + $0x2d0] sm:$0xff]  ;;  %v471_v15 = vld [vmem:[#allocation6 + $0x240] sm:$0xff]  ;;  %v484_v17 = vld [vmem:[#allocation6 + $0x2a8] sm:$0xff] }
  0x70   : > { %3403 = vmatprep.subr.mxu1 %v266_v41  ;;  %2789 = vmatprep.subr.mxu0 %v249_v42  ;;  %v485_v14 = vld [vmem:[#allocation6 + $0x2b0] sm:$0xff]  ;;  %v455_v16 = vld [vmem:[#allocation6 + $0x1c0] sm:$0xff]  ;;  %v470_v18 = vld [vmem:[#allocation6 + $0x238] sm:$0xff] }
  0x71   : > { %3404 = vmatpush3.msra.mxu1 %v266_v41  ;;  %2790 = vmatpush3.msra.mxu0 %v233_v43  ;;  %v454_v19 = vld [vmem:[#allocation6 + $0x1b8] sm:$0xff]  ;;  %v483_v20 = vld [vmem:[#allocation6 + $0x2a0] sm:$0xff]  ;;  %v469_v21 = vld [vmem:[#allocation6 + $0x230] sm:$0xff] }
  0x72   : > { %3405 = vmatprep.subr.mxu1 %v265_v44  ;;  %2791 = vmatprep.subr.mxu0 %v248_v45  ;;  %v453_v22 = vld [vmem:[#allocation6 + $0x1b0] sm:$0xff]  ;;  %v482_v23 = vld [vmem:[#allocation6 + $0x298] sm:$0xff]  ;;  %v468_v24 = vld [vmem:[#allocation6 + $0x228] sm:$0xff] }
  0x73   : > { %3406 = vmatpush3.msra.mxu1 %v265_v44  ;;  %2792 = vmatpush3.msra.mxu0 %v232_v46  ;;  %v452_v25 = vld [vmem:[#allocation6 + $0x1a8] sm:$0xff]  ;;  %v481_v26 = vld [vmem:[#allocation6 + $0x290] sm:$0xff]  ;;  %v467_v27 = vld [vmem:[#allocation6 + $0x220] sm:$0xff] }
  0x74   : > { %3407 = vmatprep.subr.mxu1 %v264_v47  ;;  %2793 = vmatprep.subr.mxu0 %v247_v48  ;;  %v480_v29 = vld [vmem:[#allocation6 + $0x288] sm:$0xff]  ;;  %v450_v31 = vld [vmem:[#allocation6 + $0x198] sm:$0xff]  ;;  %v479_v32 = vld [vmem:[#allocation6 + $0x280] sm:$0xff] }
  0x75   : > { %350 = vmatprep.mubr.f32.mxu0 %v227_v49  ;;  %2794 = vmatpush3.msra.mxu0 %v231_v50  ;;  %v465_v33 = vld [vmem:[#allocation6 + $0x210] sm:$0xff]  ;;  %v464_v35 = vld [vmem:[#allocation6 + $0x208] sm:$0xff]  ;;  %v463_v37 = vld [vmem:[#allocation6 + $0x200] sm:$0xff] }
  0x76   : > { %3408 = vmatpush3.msra.mxu1 %v264_v47  ;;  %351 = vmatmul.mubr.f32.vlgmr.msra.gmra.mxu0 %v225_v51  ;;  %v449_v34 = vld [vmem:[#allocation6 + $0x190] sm:$0xff]  ;;  %v448_v36 = vld [vmem:[#allocation6 + $0x188] sm:$0xff]  ;;  %v447_v38 = vld [vmem:[#allocation6 + $0x180] sm:$0xff] }
  0x77   : > { %3409 = vmatprep.subr.mxu1 %v263_v52  ;;  %3411 = vmatprep.mubr.f32.mxu1 %v4177_v28  ;;  %v451_v28 = vld [vmem:[#allocation6 + $0x1a0] sm:$0xff]  ;;  %v697_v39 = vld [vmem:[#allocation6 + $0x3f8] sm:$0xff] }
  0x78   : > { %3410 = vmatpush3.msra.mxu1 %v263_v52  ;;  %355 = vmatprep.mubr.f32.mxu0 %v228_v53  ;;  %v713_v40 = vld [vmem:[#allocation6 + $0x478] sm:$0xff]  ;;  %v2745_v44 = vld [vmem:[#allocation8] ss:$0 sm:$0xff] }
  0x79   : > { %3412 = vmatmul.mubr.f32.vlgmr.msra.gmra.mxu1 %v4181_v30  ;;  %2819 = vmatprep.subr.mxu0 %v478_v54  ;;  %v466_v30 = vld [vmem:[#allocation6 + $0x218] sm:$0xff] }
  0x7a   : > { %3414 = vmatprep.subr.mxu1 %v494_v55  ;;  %356 = vmatmul.mubr.f32.gmra.mxu0 %v226_v56  ;;  %v712_v56 = vld [vmem:[#allocation6 + $0x470] sm:$0xff] }
  0x7b   : > { %3415 = vmatpush3.msra.mxu1 %v494_v55  ;;  %2820 = vmatpush3.msra.mxu0 %v462_v57  ;;  %v711_v57 = vld [vmem:[#allocation6 + $0x468] sm:$0xff] }
  0x7c   : > { %3416 = vmatprep.subr.mxu1 %v493_v58  ;;  %2821 = vmatprep.subr.mxu0 %v477_v59 }
  0x7d   : > { %3417 = vmatpush3.msra.mxu1 %v493_v58  ;;  %2822 = vmatpush3.msra.mxu0 %v461_v60  ;;  %v681_v58 = vld [vmem:[#allocation6 + $0x378] sm:$0xff] }
  0x7e   : > { %3418 = vmatprep.subr.mxu1 %v492_v61  ;;  %2823 = vmatprep.subr.mxu0 %v476_v62  ;;  %v696_v62 = vld [vmem:[#allocation6 + $0x3f0] sm:$0xff] }
  0x7f   : > { %3419 = vmatpush3.msra.mxu1 %v492_v61  ;;  %2824 = vmatpush3.msra.mxu0 %v460_v63  ;;  %v710_v61 = vld [vmem:[#allocation6 + $0x460] sm:$0xff]  ;;  %v680_v63 = vld [vmem:[#allocation6 + $0x370] sm:$0xff] }
  0x80   : > { %3420 = vmatprep.subr.mxu1 %v491_v0  ;;  %2825 = vmatprep.subr.mxu0 %v475_v1 }
  0x81   : > { %3421 = vmatpush3.msra.mxu1 %v491_v0  ;;  %2826 = vmatpush3.msra.mxu0 %v459_v2  ;;  %v695_v0 = vld [vmem:[#allocation6 + $0x3e8] sm:$0xff] }
  0x82   : > { %3422 = vmatprep.subr.mxu1 %v490_v3  ;;  %2827 = vmatprep.subr.mxu0 %v474_v4  ;;  %v694_v4 = vld [vmem:[#allocation6 + $0x3e0] sm:$0xff] }
  0x83   : > { %3423 = vmatpush3.msra.mxu1 %v490_v3  ;;  %2828 = vmatpush3.msra.mxu0 %v458_v5  ;;  %v679_v3 = vld [vmem:[#allocation6 + $0x368] sm:$0xff]  ;;  %v678_v5 = vld [vmem:[#allocation6 + $0x360] sm:$0xff] }
  0x84   : > { %2829 = vmatprep.subr.mxu0 %v473_v6  ;;  %3424 = vmatprep.subr.mxu1 %v489_v8  ;;  %v693_v6 = vld [vmem:[#allocation6 + $0x3d8] sm:$0xff] }
  0x85   : > { %2830 = vmatpush3.msra.mxu0 %v457_v7  ;;  %3425 = vmatpush3.msra.mxu1 %v489_v8  ;;  %v677_v7 = vld [vmem:[#allocation6 + $0x358] sm:$0xff] }
  0x86   : > { %3426 = vmatprep.subr.mxu1 %v488_v9  ;;  %2831 = vmatprep.subr.mxu0 %v472_v12  ;;  %v709_v8 = vld [vmem:[#allocation6 + $0x458] sm:$0xff]  ;;  %v692_v12 = vld [vmem:[#allocation6 + $0x3d0] sm:$0xff] }
  0x87   : > { %3427 = vmatpush3.msra.mxu1 %v488_v9  ;;  %2832 = vmatpush3.msra.mxu0 %v456_v13  ;;  %v708_v9 = vld [vmem:[#allocation6 + $0x450] sm:$0xff] }
  0x88   : > { %3428 = vmatprep.subr.mxu1 %v487_v10  ;;  %2833 = vmatprep.subr.mxu0 %v471_v15  ;;  %v676_v13 = vld [vmem:[#allocation6 + $0x350] sm:$0xff]  ;;  %v691_v15 = vld [vmem:[#allocation6 + $0x3c8] sm:$0xff] }
  0x89   : > { %3429 = vmatpush3.msra.mxu1 %v487_v10  ;;  %2834 = vmatpush3.msra.mxu0 %v455_v16  ;;  %v707_v10 = vld [vmem:[#allocation6 + $0x448] sm:$0xff] }
  0x8a   : > { %3430 = vmatprep.subr.mxu1 %v486_v11  ;;  %2835 = vmatprep.subr.mxu0 %v470_v18  ;;  %v675_v16 = vld [vmem:[#allocation6 + $0x348] sm:$0xff]  ;;  %v690_v18 = vld [vmem:[#allocation6 + $0x3c0] sm:$0xff] }
  0x8b   : > { %3431 = vmatpush3.msra.mxu1 %v486_v11  ;;  %2836 = vmatpush3.msra.mxu0 %v454_v19  ;;  %v706_v11 = vld [vmem:[#allocation6 + $0x440] sm:$0xff] }
  0x8c   : > { %3432 = vmatprep.subr.mxu1 %v485_v14  ;;  %2837 = vmatprep.subr.mxu0 %v469_v21  ;;  %v674_v19 = vld [vmem:[#allocation6 + $0x340] sm:$0xff]  ;;  %v689_v21 = vld [vmem:[#allocation6 + $0x3b8] sm:$0xff] }
  0x8d   : > { %3433 = vmatpush3.msra.mxu1 %v485_v14  ;;  %2838 = vmatpush3.msra.mxu0 %v453_v22  ;;  %v705_v14 = vld [vmem:[#allocation6 + $0x438] sm:$0xff] }
  0x8e   : > { %3434 = vmatprep.subr.mxu1 %v484_v17  ;;  %2839 = vmatprep.subr.mxu0 %v468_v24  ;;  %v673_v22 = vld [vmem:[#allocation6 + $0x338] sm:$0xff]  ;;  %v688_v24 = vld [vmem:[#allocation6 + $0x3b0] sm:$0xff] }
  0x8f   : > { %3435 = vmatpush3.msra.mxu1 %v484_v17  ;;  %2840 = vmatpush3.msra.mxu0 %v452_v25  ;;  %v704_v17 = vld [vmem:[#allocation6 + $0x430] sm:$0xff] }
  0x90   : > { %3436 = vmatprep.subr.mxu1 %v483_v20  ;;  %2841 = vmatprep.subr.mxu0 %v467_v27  ;;  %v672_v25 = vld [vmem:[#allocation6 + $0x330] sm:$0xff]  ;;  %v687_v27 = vld [vmem:[#allocation6 + $0x3a8] sm:$0xff] }
  0x91   : > { %3437 = vmatpush3.msra.mxu1 %v483_v20  ;;  %2842 = vmatpush3.msra.mxu0 %v451_v28  ;;  %v703_v20 = vld [vmem:[#allocation6 + $0x428] sm:$0xff] }
  0x92   : > { %3438 = vmatprep.subr.mxu1 %v482_v23  ;;  %2843 = vmatprep.subr.mxu0 %v466_v30  ;;  %v671_v28 = vld [vmem:[#allocation6 + $0x328] sm:$0xff]  ;;  %v686_v30 = vld [vmem:[#allocation6 + $0x3a0] sm:$0xff] }
  0x93   : > { %3439 = vmatpush3.msra.mxu1 %v482_v23  ;;  %2844 = vmatpush3.msra.mxu0 %v450_v31  ;;  %v702_v23 = vld [vmem:[#allocation6 + $0x420] sm:$0xff] }
  0x94   : > { %3440 = vmatprep.subr.mxu1 %v481_v26  ;;  %2845 = vmatprep.subr.mxu0 %v465_v33  ;;  %v670_v31 = vld [vmem:[#allocation6 + $0x320] sm:$0xff]  ;;  %v685_v33 = vld [vmem:[#allocation6 + $0x398] sm:$0xff] }
  0x95   : > { %3441 = vmatpush3.msra.mxu1 %v481_v26  ;;  %2846 = vmatpush3.msra.mxu0 %v449_v34  ;;  %v701_v26 = vld [vmem:[#allocation6 + $0x418] sm:$0xff] }
  0x96   : > { %3442 = vmatprep.subr.mxu1 %v480_v29  ;;  %2847 = vmatprep.subr.mxu0 %v464_v35  ;;  %v669_v34 = vld [vmem:[#allocation6 + $0x318] sm:$0xff]  ;;  %v698_v35 = vld [vmem:[#allocation6 + $0x400] sm:$0xff] }
  0x97   : > { %3443 = vmatpush3.msra.mxu1 %v480_v29  ;;  %2848 = vmatpush3.msra.mxu0 %v448_v36  ;;  %v700_v29 = vld [vmem:[#allocation6 + $0x410] sm:$0xff] }
  0x98   : > { %3444 = vmatprep.subr.mxu1 %v479_v32  ;;  %2849 = vmatprep.subr.mxu0 %v463_v37  ;;  %v684_v36 = vld [vmem:[#allocation6 + $0x390] sm:$0xff] }
  0x99   : > { %3445 = vmatpush3.msra.mxu1 %v479_v32  ;;  %2850 = vmatpush3.msra.mxu0 %v447_v38  ;;  %v699_v32 = vld [vmem:[#allocation6 + $0x408] sm:$0xff]  ;;  %v668_v37 = vld [vmem:[#allocation6 + $0x310] sm:$0xff] }
  0x9a   : > { %2875 = vmatprep.subr.mxu0 %v697_v39  ;;  %3449 = vmatprep.subr.mxu1 %v713_v40  ;;  %v683_v38 = vld [vmem:[#allocation6 + $0x388] sm:$0xff] }
  0x9b   : > { %v667_v39 = vld [vmem:[#allocation6 + $0x308] sm:$0xff] }
 0x136   : > { %v2795_v41 = vpop.f32.mrf.mxu0 }
 0x138   : > { %v2796_v42 = vpop.f32.mrf.mxu0 }
 0x139   : > { %v3413_v43 = vpop.f32.mrf.mxu1  ;;  %v2797_v45 = vadd.f32 %v2796_v42, %v2795_v41  ;;  %v666_v41 = vld [vmem:[#allocation6 + $0x300] sm:$0xff]  ;;  %v916_v42 = vld [vmem:[#allocation6 + $0x578] sm:$0xff] }
 0x13a   : > { %v2798_v46 = vpop.f32.mrf.mxu0 }
 0x13b   : > { %v353_v47 = vadd.f32 %v2797_v45, %v2745_v44  ;;  %v427_v48 = vpop.f32.mrf.mxu1 }
 0x13c   : > { %v2799_v49 = vpop.f32.mrf.mxu0 }
 0x13d   : > { %v428_v50 = vadd.f32 %v427_v48, %v353_v47  ;;  %v2800_v51 = vadd.f32 %v2799_v49, %v2798_v46  ;;  %v2746_v47 = vld [vmem:[#allocation8 + $0x1] ss:$0 sm:$0xff] }
 0x13f   : > { %v4186_v52 = vmax.f32 %v428_v50, 0.0  ;;  %v358_v53 = vadd.f32 %v2800_v51, %v2745_v44 }
 0x141   : > { %438 = vst [vmem:[#allocation2 + $0x18] sm:$0xff] %v4186_v52  ;;  %v433_v54 = vadd.f32 %v3413_v43, %v358_v53  ;;  %3446 = vmatprep.mubr.f32.mxu1 %v4186_v52  ;;  %v932_v43 = vld [vmem:[#allocation6 + $0x5f8] sm:$0xff] }
 0x143   : > { %v4190_v55 = vmax.f32 %v433_v54, 0.0 }
 0x145   : > { %439 = vst [vmem:[#allocation2 + $0x20] sm:$0xff] %v4190_v55  ;;  %3447 = vmatmul.mubr.f32.vlgmr.msra.gmra.mxu1 %v4190_v55 }
 0x146   : > { %3450 = vmatpush3.msra.mxu1 %v713_v40  ;;  %v682_v40 = vld [vmem:[#allocation6 + $0x380] sm:$0xff] }
 0x147   : > { %3451 = vmatprep.subr.mxu1 %v712_v56 }
 0x148   : > { %v442_v59 = vld [vmem:[#allocation2 + $0x17] sm:$0xff]  ;;  %3452 = vmatpush3.msra.mxu1 %v712_v56 }
 0x149   : > { %v440_v60 = vld [vmem:[#allocation2 + $0x16] sm:$0xff]  ;;  %567 = vmatprep.mubr.f32.mxu0 %v442_v59  ;;  %3453 = vmatprep.subr.mxu1 %v711_v57 }
 0x14a   : > { %568 = vmatmul.mubr.f32.vlgmr.msra.gmra.mxu0 %v440_v60  ;;  %3454 = vmatpush3.msra.mxu1 %v711_v57 }
 0x14b   : > { %2876 = vmatpush3.msra.mxu0 %v681_v58  ;;  %3455 = vmatprep.subr.mxu1 %v710_v61 }
 0x14c   : > { %v441_v1 = vld [vmem:[#allocation2 + $0x1e] sm:$0xff]  ;;  %2877 = vmatprep.subr.mxu0 %v696_v62  ;;  %3456 = vmatpush3.msra.mxu1 %v710_v61 }
 0x14d   : > { %v443_v2 = vld [vmem:[#allocation2 + $0x1f] sm:$0xff]  ;;  %2878 = vmatpush3.msra.mxu0 %v680_v63  ;;  %3457 = vmatprep.subr.mxu1 %v709_v8 }
 0x14e   : > { %572 = vmatprep.mubr.f32.mxu0 %v443_v2  ;;  %2879 = vmatprep.subr.mxu0 %v695_v0  ;;  %v931_v63 = vld [vmem:[#allocation6 + $0x5f0] sm:$0xff]  ;;  %v930_v0 = vld [vmem:[#allocation6 + $0x5e8] sm:$0xff] }
 0x14f   : > { %573 = vmatmul.mubr.f32.gmra.mxu0 %v441_v1  ;;  %3458 = vmatpush3.msra.mxu1 %v709_v8  ;;  %v900_v1 = vld [vmem:[#allocation6 + $0x4f8] sm:$0xff]  ;;  %v898_v8 = vld [vmem:[#allocation6 + $0x4e8] sm:$0xff] }
 0x150   : > { %2880 = vmatpush3.msra.mxu0 %v679_v3  ;;  %3459 = vmatprep.subr.mxu1 %v708_v9  ;;  %v929_v3 = vld [vmem:[#allocation6 + $0x5e0] sm:$0xff] }
 0x151   : > { %2881 = vmatprep.subr.mxu0 %v694_v4  ;;  %3460 = vmatpush3.msra.mxu1 %v708_v9  ;;  %v915_v4 = vld [vmem:[#allocation6 + $0x570] sm:$0xff]  ;;  %v913_v9 = vld [vmem:[#allocation6 + $0x560] sm:$0xff] }
 0x152   : > { %2882 = vmatpush3.msra.mxu0 %v678_v5  ;;  %3461 = vmatprep.subr.mxu1 %v707_v10  ;;  %v899_v5 = vld [vmem:[#allocation6 + $0x4f0] sm:$0xff] }
 0x153   : > { %2883 = vmatprep.subr.mxu0 %v693_v6  ;;  %3462 = vmatpush3.msra.mxu1 %v707_v10  ;;  %v897_v10 = vld [vmem:[#allocation6 + $0x4e0] sm:$0xff] }
 0x154   : > { %2884 = vmatpush3.msra.mxu0 %v677_v7  ;;  %3463 = vmatprep.subr.mxu1 %v706_v11 }
 0x155   : > { %2885 = vmatprep.subr.mxu0 %v692_v12  ;;  %3464 = vmatpush3.msra.mxu1 %v706_v11  ;;  %v912_v11 = vld [vmem:[#allocation6 + $0x558] sm:$0xff] }
 0x156   : > { %2886 = vmatpush3.msra.mxu0 %v676_v13  ;;  %3465 = vmatprep.subr.mxu1 %v705_v14  ;;  %v896_v12 = vld [vmem:[#allocation6 + $0x4d8] sm:$0xff]  ;;  %v911_v13 = vld [vmem:[#allocation6 + $0x550] sm:$0xff] }
 0x157   : > { %2887 = vmatprep.subr.mxu0 %v691_v15  ;;  %3466 = vmatpush3.msra.mxu1 %v705_v14  ;;  %v895_v14 = vld [vmem:[#allocation6 + $0x4d0] sm:$0xff]  ;;  %v910_v15 = vld [vmem:[#allocation6 + $0x548] sm:$0xff] }
 0x158   : > { %2888 = vmatpush3.msra.mxu0 %v675_v16  ;;  %3467 = vmatprep.subr.mxu1 %v704_v17  ;;  %v894_v16 = vld [vmem:[#allocation6 + $0x4c8] sm:$0xff] }
 0x159   : > { %2889 = vmatprep.subr.mxu0 %v690_v18  ;;  %3468 = vmatpush3.msra.mxu1 %v704_v17  ;;  %v928_v17 = vld [vmem:[#allocation6 + $0x5d8] sm:$0xff]  ;;  %v909_v18 = vld [vmem:[#allocation6 + $0x540] sm:$0xff] }
 0x15a   : > { %2890 = vmatpush3.msra.mxu0 %v674_v19  ;;  %3469 = vmatprep.subr.mxu1 %v703_v20  ;;  %v927_v19 = vld [vmem:[#allocation6 + $0x5d0] sm:$0xff] }
 0x15b   : > { %2891 = vmatprep.subr.mxu0 %v689_v21  ;;  %3470 = vmatpush3.msra.mxu1 %v703_v20  ;;  %v893_v20 = vld [vmem:[#allocation6 + $0x4c0] sm:$0xff]  ;;  %v908_v21 = vld [vmem:[#allocation6 + $0x538] sm:$0xff] }
 0x15c   : > { %2892 = vmatpush3.msra.mxu0 %v673_v22  ;;  %3471 = vmatprep.subr.mxu1 %v702_v23  ;;  %v926_v22 = vld [vmem:[#allocation6 + $0x5c8] sm:$0xff] }
 0x15d   : > { %2893 = vmatprep.subr.mxu0 %v688_v24  ;;  %3472 = vmatpush3.msra.mxu1 %v702_v23  ;;  %v892_v23 = vld [vmem:[#allocation6 + $0x4b8] sm:$0xff]  ;;  %v907_v24 = vld [vmem:[#allocation6 + $0x530] sm:$0xff] }
 0x15e   : > { %2894 = vmatpush3.msra.mxu0 %v672_v25  ;;  %3473 = vmatprep.subr.mxu1 %v701_v26  ;;  %v925_v25 = vld [vmem:[#allocation6 + $0x5c0] sm:$0xff] }
 0x15f   : > { %2895 = vmatprep.subr.mxu0 %v687_v27  ;;  %3474 = vmatpush3.msra.mxu1 %v701_v26  ;;  %v891_v26 = vld [vmem:[#allocation6 + $0x4b0] sm:$0xff]  ;;  %v906_v27 = vld [vmem:[#allocation6 + $0x528] sm:$0xff] }
 0x160   : > { %2896 = vmatpush3.msra.mxu0 %v671_v28  ;;  %3475 = vmatprep.subr.mxu1 %v700_v29  ;;  %v924_v28 = vld [vmem:[#allocation6 + $0x5b8] sm:$0xff] }
 0x161   : > { %2897 = vmatprep.subr.mxu0 %v686_v30  ;;  %3476 = vmatpush3.msra.mxu1 %v700_v29  ;;  %v890_v29 = vld [vmem:[#allocation6 + $0x4a8] sm:$0xff]  ;;  %v905_v30 = vld [vmem:[#allocation6 + $0x520] sm:$0xff] }
 0x162   : > { %2898 = vmatpush3.msra.mxu0 %v670_v31  ;;  %3477 = vmatprep.subr.mxu1 %v699_v32  ;;  %v923_v31 = vld [vmem:[#allocation6 + $0x5b0] sm:$0xff] }
 0x163   : > { %2899 = vmatprep.subr.mxu0 %v685_v33  ;;  %3478 = vmatpush3.msra.mxu1 %v699_v32  ;;  %v889_v32 = vld [vmem:[#allocation6 + $0x4a0] sm:$0xff]  ;;  %v904_v33 = vld [vmem:[#allocation6 + $0x518] sm:$0xff] }
 0x164   : > { %2900 = vmatpush3.msra.mxu0 %v669_v34  ;;  %3479 = vmatprep.subr.mxu1 %v698_v35  ;;  %v922_v34 = vld [vmem:[#allocation6 + $0x5a8] sm:$0xff] }
 0x165   : > { %2901 = vmatprep.subr.mxu0 %v684_v36  ;;  %3480 = vmatpush3.msra.mxu1 %v698_v35  ;;  %v888_v35 = vld [vmem:[#allocation6 + $0x498] sm:$0xff]  ;;  %v903_v36 = vld [vmem:[#allocation6 + $0x510] sm:$0xff] }
 0x166   : > { %2902 = vmatpush3.msra.mxu0 %v668_v37  ;;  %3484 = vmatprep.subr.mxu1 %v932_v43  ;;  %v921_v37 = vld [vmem:[#allocation6 + $0x5a0] sm:$0xff] }
 0x167   : > { %2903 = vmatprep.subr.mxu0 %v683_v38  ;;  %v887_v38 = vld [vmem:[#allocation6 + $0x490] sm:$0xff] }
 0x168   : > { %2904 = vmatpush3.msra.mxu0 %v667_v39  ;;  %v902_v39 = vld [vmem:[#allocation6 + $0x508] sm:$0xff] }
 0x169   : > { %2905 = vmatprep.subr.mxu0 %v682_v40  ;;  %v920_v40 = vld [vmem:[#allocation6 + $0x598] sm:$0xff] }
 0x16a   : > { %2906 = vmatpush3.msra.mxu0 %v666_v41  ;;  %v886_v41 = vld [vmem:[#allocation6 + $0x488] sm:$0xff] }
 0x16b   : > { %2931 = vmatprep.subr.mxu0 %v916_v42  ;;  %v901_v42 = vld [vmem:[#allocation6 + $0x500] sm:$0xff] }
 0x205   : > { %v3448_v46 = vpop.f32.mrf.mxu1 }
 0x207   : > { %v644_v51 = vpop.f32.mrf.mxu1 }
 0x20a   : > { %v2851_v44 = vpop.f32.mrf.mxu0 }
 0x20c   : > { %v2852_v45 = vpop.f32.mrf.mxu0 }
 0x20d   : > { %v2853_v48 = vadd.f32 %v2852_v45, %v2851_v44  ;;  %v885_v44 = vld [vmem:[#allocation6 + $0x480] sm:$0xff] }
 0x20e   : > { %v4204_v45 = vld [vmem:[#allocation2 + $0xf] sm:$0xff] }
 0x20f   : > { %v2854_v49 = vpop.f32.mrf.mxu0  ;;  %v570_v50 = vadd.f32 %v2853_v48, %v2746_v47  ;;  %v917_v48 = vld [vmem:[#allocation6 + $0x580] sm:$0xff] }
 0x211   : > { %v2855_v53 = vpop.f32.mrf.mxu0  ;;  %v645_v54 = vadd.f32 %v644_v51, %v570_v50  ;;  %v1151_v50 = vld [vmem:[#allocation6 + $0x778] sm:$0xff] }
 0x212   : > { %v2856_v56 = vadd.f32 %v2855_v53, %v2854_v49  ;;  %v1135_v49 = vld [vmem:[#allocation6 + $0x6f8] sm:$0xff]  ;;  %v1134_v53 = vld [vmem:[#allocation6 + $0x6f0] sm:$0xff] }
 0x213   : > { %v653_v57 = vmax.f32 %v645_v54, 0.0  ;;  %v1119_v51 = vld [vmem:[#allocation6 + $0x678] sm:$0xff]  ;;  %v1118_v54 = vld [vmem:[#allocation6 + $0x670] sm:$0xff] }
 0x214   : > { %v575_v58 = vadd.f32 %v2856_v56, %v2746_v47  ;;  %v918_v47 = vld [vmem:[#allocation6 + $0x588] sm:$0xff] }
 0x215   : > { %v4195_v59 = vadd.f32 %v653_v57, %v4186_v52  ;;  %v1133_v56 = vld [vmem:[#allocation6 + $0x6e8] sm:$0xff] }
 0x216   : > { %v650_v60 = vadd.f32 %v3448_v46, %v575_v58  ;;  %v4207_v46 = vld [vmem:[#allocation2 + $0x6] sm:$0xff]  ;;  %v1117_v57 = vld [vmem:[#allocation6 + $0x668] sm:$0xff] }
 0x217   : > { %657 = vst [vmem:[#allocation2 + $0x18] sm:$0xff] %v4195_v59  ;;  %3481 = vmatprep.mubr.f32.mxu1 %v4195_v59  ;;  %v1132_v58 = vld [vmem:[#allocation6 + $0x6e0] sm:$0xff] }
 0x218   : > { %v654_v61 = vmax.f32 %v650_v60, 0.0  ;;  %v1116_v60 = vld [vmem:[#allocation6 + $0x660] sm:$0xff] }
 0x21a   : > { %v4200_v62 = vadd.f32 %v654_v61, %v4190_v55  ;;  %v914_v55 = vld [vmem:[#allocation6 + $0x568] sm:$0xff]  ;;  %v1131_v61 = vld [vmem:[#allocation6 + $0x6d8] sm:$0xff] }
 0x21c   : > { %658 = vst [vmem:[#allocation2 + $0x20] sm:$0xff] %v4200_v62  ;;  %3482 = vmatmul.mubr.f32.vlgmr.msra.gmra.mxu1 %v4200_v62 }
 0x21d   : > { %3485 = vmatpush3.msra.mxu1 %v932_v43  ;;  %v919_v43 = vld [vmem:[#allocation6 + $0x590] sm:$0xff] }
 0x21e   : > { %3486 = vmatprep.subr.mxu1 %v931_v63  ;;  %v661_v52 = vld [vmem:[#allocation2 + $0x15] sm:$0xff] }
 0x21f   : > { %v659_v2 = vld [vmem:[#allocation2 + $0x12] sm:$0xff]  ;;  %3487 = vmatpush3.msra.mxu1 %v931_v63  ;;  %786 = vmatprep.mubr.f32.mxu0 %v661_v52  ;;  %v1115_v63 = vld [vmem:[#allocation6 + $0x658] sm:$0xff] }
 0x220   : > { %3488 = vmatprep.subr.mxu1 %v930_v0  ;;  %787 = vmatmul.mubr.f32.vlgmr.msra.gmra.mxu0 %v659_v2 }
 0x221   : > { %3489 = vmatpush3.msra.mxu1 %v930_v0  ;;  %2932 = vmatpush3.msra.mxu0 %v900_v1  ;;  %v1130_v0 = vld [vmem:[#allocation6 + $0x6d0] sm:$0xff] }
 0x222   : > { %3490 = vmatprep.subr.mxu1 %v929_v3  ;;  %2933 = vmatprep.subr.mxu0 %v915_v4 }
 0x223   : > { %v662_v6 = vld [vmem:[#allocation2 + $0x1d] sm:$0xff]  ;;  %3491 = vmatpush3.msra.mxu1 %v929_v3  ;;  %2934 = vmatpush3.msra.mxu0 %v899_v5  ;;  %v2747_v3 = vld [vmem:[#allocation8 + $0x2] ss:$0 sm:$0xff] }
 0x224   : > { %v660_v7 = vld [vmem:[#allocation2 + $0x1a] sm:$0xff]  ;;  %791 = vmatprep.mubr.f32.mxu0 %v662_v6  ;;  %2935 = vmatprep.subr.mxu0 %v914_v55 }
 0x225   : > { %792 = vmatmul.mubr.f32.gmra.mxu0 %v660_v7  ;;  %3492 = vmatprep.subr.mxu1 %v928_v17 }
 0x226   : > { %2936 = vmatpush3.msra.mxu0 %v898_v8  ;;  %3493 = vmatpush3.msra.mxu1 %v928_v17  ;;  %v1149_v17 = vld [vmem:[#allocation6 + $0x768] sm:$0xff] }
 0x227   : > { %2937 = vmatprep.subr.mxu0 %v913_v9  ;;  %3494 = vmatprep.subr.mxu1 %v927_v19 }
 0x228   : > { %2938 = vmatpush3.msra.mxu0 %v897_v10  ;;  %3495 = vmatpush3.msra.mxu1 %v927_v19 }
 0x229   : > { %2939 = vmatprep.subr.mxu0 %v912_v11  ;;  %3496 = vmatprep.subr.mxu1 %v926_v22 }
 0x22a   : > { %2940 = vmatpush3.msra.mxu0 %v896_v12  ;;  %3497 = vmatpush3.msra.mxu1 %v926_v22  ;;  %v1129_v22 = vld [vmem:[#allocation6 + $0x6c8] sm:$0xff] }
 0x22b   : > { %2941 = vmatprep.subr.mxu0 %v911_v13  ;;  %3498 = vmatprep.subr.mxu1 %v925_v25 }
 0x22c   : > { %2942 = vmatpush3.msra.mxu0 %v895_v14  ;;  %3499 = vmatpush3.msra.mxu1 %v925_v25  ;;  %v1128_v25 = vld [vmem:[#allocation6 + $0x6c0] sm:$0xff] }
 0x22d   : > { %2943 = vmatprep.subr.mxu0 %v910_v15  ;;  %3500 = vmatprep.subr.mxu1 %v924_v28 }
 0x22e   : > { %2944 = vmatpush3.msra.mxu0 %v894_v16  ;;  %3501 = vmatpush3.msra.mxu1 %v924_v28  ;;  %v1150_v16 = vld [vmem:[#allocation6 + $0x770] sm:$0xff]  ;;  %v1127_v28 = vld [vmem:[#allocation6 + $0x6b8] sm:$0xff] }
 0x22f   : > { %2945 = vmatprep.subr.mxu0 %v909_v18  ;;  %3502 = vmatprep.subr.mxu1 %v923_v31  ;;  %v4219_v18 = vld [vmem:[#allocation2 + $0xe] sm:$0xff] }
 0x230   : > { %2946 = vmatpush3.msra.mxu0 %v893_v20  ;;  %3503 = vmatpush3.msra.mxu1 %v923_v31  ;;  %v1147_v20 = vld [vmem:[#allocation6 + $0x758] sm:$0xff]  ;;  %v1126_v31 = vld [vmem:[#allocation6 + $0x6b0] sm:$0xff] }
 0x231   : > { %2947 = vmatprep.subr.mxu0 %v908_v21  ;;  %3504 = vmatprep.subr.mxu1 %v922_v34  ;;  %v1114_v21 = vld [vmem:[#allocation6 + $0x650] sm:$0xff] }
 0x232   : > { %2948 = vmatpush3.msra.mxu0 %v892_v23  ;;  %3505 = vmatpush3.msra.mxu1 %v922_v34  ;;  %v1145_v23 = vld [vmem:[#allocation6 + $0x748] sm:$0xff] }
 0x233   : > { %2949 = vmatprep.subr.mxu0 %v907_v24  ;;  %3506 = vmatprep.subr.mxu1 %v921_v37  ;;  %v1113_v24 = vld [vmem:[#allocation6 + $0x648] sm:$0xff] }
 0x234   : > { %2950 = vmatpush3.msra.mxu0 %v891_v26  ;;  %3507 = vmatpush3.msra.mxu1 %v921_v37  ;;  %v1144_v26 = vld [vmem:[#allocation6 + $0x740] sm:$0xff]  ;;  %v1125_v34 = vld [vmem:[#allocation6 + $0x6a8] sm:$0xff] }
 0x235   : > { %2951 = vmatprep.subr.mxu0 %v906_v27  ;;  %3508 = vmatprep.subr.mxu1 %v920_v40  ;;  %v1112_v27 = vld [vmem:[#allocation6 + $0x640] sm:$0xff] }
 0x236   : > { %2952 = vmatpush3.msra.mxu0 %v890_v29  ;;  %3509 = vmatpush3.msra.mxu1 %v920_v40  ;;  %v1143_v29 = vld [vmem:[#allocation6 + $0x738] sm:$0xff]  ;;  %v1124_v37 = vld [vmem:[#allocation6 + $0x6a0] sm:$0xff] }
 0x237   : > { %2953 = vmatprep.subr.mxu0 %v905_v30  ;;  %3510 = vmatprep.subr.mxu1 %v919_v43  ;;  %v1111_v30 = vld [vmem:[#allocation6 + $0x638] sm:$0xff] }
 0x238   : > { %2954 = vmatpush3.msra.mxu0 %v889_v32  ;;  %1005 = vmatprep.mubr.f32.mxu0 %v4204_v45  ;;  %v1142_v32 = vld [vmem:[#allocation6 + $0x730] sm:$0xff]  ;;  %v1123_v40 = vld [vmem:[#allocation6 + $0x698] sm:$0xff] }
 0x239   : > { %2955 = vmatprep.subr.mxu0 %v904_v33  ;;  %3511 = vmatpush3.msra.mxu1 %v919_v43  ;;  %v1110_v33 = vld [vmem:[#allocation6 + $0x630] sm:$0xff] }
 0x23a   : > { %2956 = vmatpush3.msra.mxu0 %v888_v35  ;;  %3512 = vmatprep.subr.mxu1 %v918_v47  ;;  %v1141_v35 = vld [vmem:[#allocation6 + $0x728] sm:$0xff]  ;;  %v1122_v43 = vld [vmem:[#allocation6 + $0x690] sm:$0xff] }
 0x23b   : > { %2957 = vmatprep.subr.mxu0 %v903_v36  ;;  %3513 = vmatpush3.msra.mxu1 %v918_v47  ;;  %v1109_v36 = vld [vmem:[#allocation6 + $0x628] sm:$0xff]  ;;  %v1106_v47 = vld [vmem:[#allocation6 + $0x610] sm:$0xff] }
 0x23c   : > { %2958 = vmatpush3.msra.mxu0 %v887_v38  ;;  %3514 = vmatprep.subr.mxu1 %v917_v48  ;;  %v1140_v38 = vld [vmem:[#allocation6 + $0x720] sm:$0xff] }
 0x23d   : > { %2959 = vmatprep.subr.mxu0 %v902_v39  ;;  %3515 = vmatpush3.msra.mxu1 %v917_v48  ;;  %v1108_v39 = vld [vmem:[#allocation6 + $0x620] sm:$0xff]  ;;  %v1121_v48 = vld [vmem:[#allocation6 + $0x688] sm:$0xff] }
 0x23e   : > { %2960 = vmatpush3.msra.mxu0 %v886_v41  ;;  %3519 = vmatprep.subr.mxu1 %v1151_v50  ;;  %v1139_v41 = vld [vmem:[#allocation6 + $0x718] sm:$0xff] }
 0x23f   : > { %2961 = vmatprep.subr.mxu0 %v901_v42  ;;  %v1107_v42 = vld [vmem:[#allocation6 + $0x618] sm:$0xff] }
 0x240   : > { %2962 = vmatpush3.msra.mxu0 %v885_v44  ;;  %v1138_v44 = vld [vmem:[#allocation6 + $0x710] sm:$0xff] }
 0x241   : > { %1006 = vmatmul.mubr.f32.vlgmr.msra.gmra.mxu0 %v4207_v46  ;;  %2987 = vmatprep.subr.mxu0 %v1135_v49  ;;  %v1137_v49 = vld [vmem:[#allocation6 + $0x708] sm:$0xff] }
 0x242   : > { %2988 = vmatpush3.msra.mxu0 %v1119_v51  ;;  %v1120_v51 = vld [vmem:[#allocation6 + $0x680] sm:$0xff] }
 0x243   : > { %2989 = vmatprep.subr.mxu0 %v1134_v53  ;;  %v1136_v53 = vld [vmem:[#allocation6 + $0x700] sm:$0xff] }
 0x244   : > { %2990 = vmatpush3.msra.mxu0 %v1118_v54  ;;  %v1104_v54 = vld [vmem:[#allocation6 + $0x600] sm:$0xff] }
 0x245   : > { %2991 = vmatprep.subr.mxu0 %v1133_v56  ;;  %v1354_v56 = vld [vmem:[#allocation6 + $0x878] sm:$0xff] }
 0x246   : > { %2992 = vmatpush3.msra.mxu0 %v1117_v57  ;;  %v1370_v57 = vld [vmem:[#allocation6 + $0x8f8] sm:$0xff] }
 0x247   : > { %2993 = vmatprep.subr.mxu0 %v1132_v58 }
 0x248   : > { %2994 = vmatpush3.msra.mxu0 %v1116_v60 }
 0x249   : > { %2995 = vmatprep.subr.mxu0 %v1131_v61 }
 0x24a   : > { %2996 = vmatpush3.msra.mxu0 %v1115_v63  ;;  %v2748_v63 = vld [vmem:[#allocation8 + $0x3] ss:$0 sm:$0xff] }
 0x24b   : > { %2997 = vmatprep.subr.mxu0 %v1130_v0 }
 0x24c   : > { %2998 = vmatpush3.msra.mxu0 %v1114_v21  ;;  %v1335_v21 = vld [vmem:[#allocation6 + $0x7e0] sm:$0xff] }
 0x24d   : > { %2999 = vmatprep.subr.mxu0 %v1129_v22  ;;  %v1350_v22 = vld [vmem:[#allocation6 + $0x858] sm:$0xff] }
 0x24e   : > { %3000 = vmatpush3.msra.mxu0 %v1113_v24 }
 0x24f   : > { %3001 = vmatprep.subr.mxu0 %v1128_v25  ;;  %v1334_v25 = vld [vmem:[#allocation6 + $0x7d8] sm:$0xff] }
 0x250   : > { %3002 = vmatpush3.msra.mxu0 %v1112_v27  ;;  %v1349_v27 = vld [vmem:[#allocation6 + $0x850] sm:$0xff] }
 0x251   : > { %3003 = vmatprep.subr.mxu0 %v1127_v28  ;;  %v1365_v28 = vld [vmem:[#allocation6 + $0x8d0] sm:$0xff] }
 0x252   : > { %3004 = vmatpush3.msra.mxu0 %v1111_v30  ;;  %v1348_v30 = vld [vmem:[#allocation6 + $0x848] sm:$0xff] }
 0x253   : > { %3005 = vmatprep.subr.mxu0 %v1126_v31  ;;  %v1364_v31 = vld [vmem:[#allocation6 + $0x8c8] sm:$0xff] }
 0x254   : > { %3006 = vmatpush3.msra.mxu0 %v1110_v33  ;;  %v1347_v33 = vld [vmem:[#allocation6 + $0x840] sm:$0xff] }
 0x255   : > { %3007 = vmatprep.subr.mxu0 %v1125_v34  ;;  %v1363_v34 = vld [vmem:[#allocation6 + $0x8c0] sm:$0xff] }
 0x256   : > { %3008 = vmatpush3.msra.mxu0 %v1109_v36  ;;  %v1346_v36 = vld [vmem:[#allocation6 + $0x838] sm:$0xff] }
 0x257   : > { %3009 = vmatprep.subr.mxu0 %v1124_v37  ;;  %v1362_v37 = vld [vmem:[#allocation6 + $0x8b8] sm:$0xff] }
 0x258   : > { %3010 = vmatpush3.msra.mxu0 %v1108_v39  ;;  %v1345_v39 = vld [vmem:[#allocation6 + $0x830] sm:$0xff] }
 0x259   : > { %3011 = vmatprep.subr.mxu0 %v1123_v40  ;;  %v1361_v40 = vld [vmem:[#allocation6 + $0x8b0] sm:$0xff] }
 0x25a   : > { %3012 = vmatpush3.msra.mxu0 %v1107_v42  ;;  %v1344_v42 = vld [vmem:[#allocation6 + $0x828] sm:$0xff] }
 0x25b   : > { %3013 = vmatprep.subr.mxu0 %v1122_v43  ;;  %v1360_v43 = vld [vmem:[#allocation6 + $0x8a8] sm:$0xff] }
 0x25c   : > { %3014 = vmatpush3.msra.mxu0 %v1106_v47  ;;  %v1343_v47 = vld [vmem:[#allocation6 + $0x820] sm:$0xff] }
 0x25d   : > { %3015 = vmatprep.subr.mxu0 %v1121_v48  ;;  %v1359_v48 = vld [vmem:[#allocation6 + $0x8a0] sm:$0xff] }
 0x2dc   : > { %v3483_v2 = vpop.f32.mrf.mxu1 }
 0x2de   : > { %v863_v6 = vpop.f32.mrf.mxu1 }
 0x2e0   : > { %v2907_v1 = vpop.f32.mrf.mxu0 }
 0x2e2   : > { %v2908_v52 = vpop.f32.mrf.mxu0 }
 0x2e3   : > { %v2909_v4 = vadd.f32 %v2908_v52, %v2907_v1 }
 0x2e5   : > { %v2910_v5 = vpop.f32.mrf.mxu0  ;;  %v789_v55 = vadd.f32 %v2909_v4, %v2747_v3 }
 0x2e7   : > { %v2911_v7 = vpop.f32.mrf.mxu0  ;;  %v864_v8 = vadd.f32 %v863_v6, %v789_v55 }
 0x2e8   : > { %v2912_v9 = vadd.f32 %v2911_v7, %v2910_v5 }
 0x2e9   : > { %v872_v10 = vmax.f32 %v864_v8, 0.0 }
 0x2ea   : > { %v794_v11 = vadd.f32 %v2912_v9, %v2747_v3 }
 0x2eb   : > { %v4211_v12 = vadd.f32 %v872_v10, %v4195_v59  ;;  %v1148_v59 = vld [vmem:[#allocation6 + $0x760] sm:$0xff] }
 0x2ec   : > { %v869_v13 = vadd.f32 %v3483_v2, %v794_v11 }
 0x2ed   : > { %876 = vst [vmem:[#allocation2 + $0x18] sm:$0xff] %v4211_v12  ;;  %3516 = vmatprep.mubr.f32.mxu1 %v4211_v12 }
 0x2ee   : > { %v873_v14 = vmax.f32 %v869_v13, 0.0 }
 0x2f0   : > { %v4216_v15 = vadd.f32 %v873_v14, %v4200_v62  ;;  %v1146_v62 = vld [vmem:[#allocation6 + $0x750] sm:$0xff]  ;;  %v1338_v14 = vld [vmem:[#allocation6 + $0x7f8] sm:$0xff] }
 0x2f2   : > { %3517 = vmatmul.mubr.f32.vlgmr.msra.gmra.mxu1 %v4216_v15 }
 0x2f3   : > { %3520 = vmatpush3.msra.mxu1 %v1151_v50  ;;  %v1105_v50 = vld [vmem:[#allocation6 + $0x608] sm:$0xff] }
 0x2f4   : > { %3521 = vmatprep.subr.mxu1 %v1150_v16  ;;  %v881_v19 = vld [vmem:[#allocation2 + $0x17] sm:$0xff]  ;;  %3016 = vmatpush3.msra.mxu0 %v1105_v50  ;;  %v1342_v50 = vld [vmem:[#allocation6 + $0x818] sm:$0xff] }
 0x2f5   : > { %3522 = vmatpush3.msra.mxu1 %v1150_v16  ;;  %1010 = vmatprep.mubr.f32.mxu0 %v881_v19  ;;  %v1353_v16 = vld [vmem:[#allocation6 + $0x870] sm:$0xff]  ;;  %v1352_v19 = vld [vmem:[#allocation6 + $0x868] sm:$0xff] }
 0x2f6   : > { %3523 = vmatprep.subr.mxu1 %v1149_v17  ;;  %1011 = vmatmul.mubr.f32.gmra.mxu0 %v4219_v18 }
 0x2f7   : > { %3524 = vmatpush3.msra.mxu1 %v1149_v17  ;;  %3017 = vmatprep.subr.mxu0 %v1120_v51  ;;  %v1369_v17 = vld [vmem:[#allocation6 + $0x8f0] sm:$0xff]  ;;  %v1358_v51 = vld [vmem:[#allocation6 + $0x898] sm:$0xff] }
 0x2f8   : > { %3525 = vmatprep.subr.mxu1 %v1148_v59  ;;  %3018 = vmatpush3.msra.mxu0 %v1104_v54  ;;  %v1341_v54 = vld [vmem:[#allocation6 + $0x810] sm:$0xff] }
 0x2f9   : > { %3526 = vmatpush3.msra.mxu1 %v1148_v59  ;;  %3043 = vmatprep.subr.mxu0 %v1354_v56  ;;  %v1368_v59 = vld [vmem:[#allocation6 + $0x8e8] sm:$0xff]  ;;  %v1357_v56 = vld [vmem:[#allocation6 + $0x890] sm:$0xff] }
 0x2fa   : > { %3527 = vmatprep.subr.mxu1 %v1147_v20 }
 0x2fb   : > { %3528 = vmatpush3.msra.mxu1 %v1147_v20  ;;  %v1336_v20 = vld [vmem:[#allocation6 + $0x7e8] sm:$0xff] }
 0x2fc   : > { %3529 = vmatprep.subr.mxu1 %v1146_v62 }
 0x2fd   : > { %3530 = vmatpush3.msra.mxu1 %v1146_v62  ;;  %v1367_v62 = vld [vmem:[#allocation6 + $0x8e0] sm:$0xff] }
 0x2fe   : > { %3531 = vmatprep.subr.mxu1 %v1145_v23 }
 0x2ff   : > { %3532 = vmatpush3.msra.mxu1 %v1145_v23 }
 0x300   : > { %3533 = vmatprep.subr.mxu1 %v1144_v26 }
 0x301   : > { %3534 = vmatpush3.msra.mxu1 %v1144_v26  ;;  %v2963_v58 = vpop.f32.mrf.mxu0  ;;  %v1366_v26 = vld [vmem:[#allocation6 + $0x8d8] sm:$0xff] }
 0x302   : > { %3535 = vmatprep.subr.mxu1 %v1143_v29 }
 0x303   : > { %3536 = vmatpush3.msra.mxu1 %v1143_v29  ;;  %v2964_v60 = vpop.f32.mrf.mxu0  ;;  %v1333_v29 = vld [vmem:[#allocation6 + $0x7d0] sm:$0xff] }
 0x304   : > { %3537 = vmatprep.subr.mxu1 %v1142_v32  ;;  %v2965_v61 = vadd.f32 %v2964_v60, %v2963_v58  ;;  %v1340_v58 = vld [vmem:[#allocation6 + $0x808] sm:$0xff] }
 0x305   : > { %3538 = vmatpush3.msra.mxu1 %v1142_v32  ;;  %v1332_v32 = vld [vmem:[#allocation6 + $0x7c8] sm:$0xff] }
 0x306   : > { %3539 = vmatprep.subr.mxu1 %v1141_v35  ;;  %v1008_v0 = vadd.f32 %v2965_v61, %v2748_v63  ;;  %v1356_v60 = vld [vmem:[#allocation6 + $0x888] sm:$0xff] }
 0x307   : > { %3540 = vmatpush3.msra.mxu1 %v1141_v35  ;;  %v1331_v35 = vld [vmem:[#allocation6 + $0x7c0] sm:$0xff]  ;;  %v1324_v61 = vld [vmem:[#allocation6 + $0x788] sm:$0xff] }
 0x308   : > { %3541 = vmatprep.subr.mxu1 %v1140_v38 }
 0x309   : > { %3542 = vmatpush3.msra.mxu1 %v1140_v38  ;;  %v1330_v38 = vld [vmem:[#allocation6 + $0x7b8] sm:$0xff] }
 0x30a   : > { %3543 = vmatprep.subr.mxu1 %v1139_v41 }
 0x30b   : > { %3544 = vmatpush3.msra.mxu1 %v1139_v41  ;;  %v1329_v41 = vld [vmem:[#allocation6 + $0x7b0] sm:$0xff] }
 0x30c   : > { %3545 = vmatprep.subr.mxu1 %v1138_v44 }
 0x30d   : > { %3546 = vmatpush3.msra.mxu1 %v1138_v44  ;;  %v1328_v44 = vld [vmem:[#allocation6 + $0x7a8] sm:$0xff] }
 0x30e   : > { %3547 = vmatprep.subr.mxu1 %v1137_v49 }
 0x30f   : > { %3548 = vmatpush3.msra.mxu1 %v1137_v49  ;;  %v1327_v49 = vld [vmem:[#allocation6 + $0x7a0] sm:$0xff] }
 0x310   : > { %3549 = vmatprep.subr.mxu1 %v1136_v53 }
 0x311   : > { %3550 = vmatpush3.msra.mxu1 %v1136_v53  ;;  %v1326_v53 = vld [vmem:[#allocation6 + $0x798] sm:$0xff] }
 0x312   : > { %3554 = vmatprep.subr.mxu1 %v1370_v57 }
 0x3b2   : > { %v3518_v1 = vpop.f32.mrf.mxu1 }
 0x3b4   : > { %v1082_v52 = vpop.f32.mrf.mxu1 }
 0x3b5   : > { %v1083_v2 = vadd.f32 %v1082_v52, %v1008_v0  ;;  %v1355_v0 = vld [vmem:[#allocation6 + $0x880] sm:$0xff]  ;;  %v1573_v52 = vld [vmem:[#allocation6 + $0x9f8] sm:$0xff] }
 0x3b6   : > { %v2966_v3 = vpop.f32.mrf.mxu0 }
 0x3b7   : > { %v1091_v4 = vmax.f32 %v1083_v2, 0.0  ;;  %v1589_v2 = vld [vmem:[#allocation6 + $0xa78] sm:$0xff] }
 0x3b8   : > { %v2967_v5 = vpop.f32.mrf.mxu0 }
 0x3b9   : > { %v4223_v55 = vadd.f32 %v1091_v4, %v4211_v12  ;;  %v2968_v6 = vadd.f32 %v2967_v5, %v2966_v3  ;;  %v1337_v12 = vld [vmem:[#allocation6 + $0x7f0] sm:$0xff] }
 0x3bb   : > { %1095 = vst [vmem:[#allocation2 + $0x18] sm:$0xff] %v4223_v55  ;;  %3551 = vmatprep.mubr.f32.mxu1 %v4223_v55  ;;  %v1013_v7 = vadd.f32 %v2968_v6, %v2748_v63  ;;  %v1339_v63 = vld [vmem:[#allocation6 + $0x800] sm:$0xff] }
 0x3bc   : > { %v2749_v6 = vld [vmem:[#allocation8 + $0x4] ss:$0 sm:$0xff] }
 0x3bd   : > { %v1088_v8 = vadd.f32 %v3518_v1, %v1013_v7  ;;  %v1323_v1 = vld [vmem:[#allocation6 + $0x780] sm:$0xff] }
 0x3bf   : > { %v1092_v9 = vmax.f32 %v1088_v8, 0.0 }
 0x3c1   : > { %v4228_v10 = vadd.f32 %v1092_v9, %v4216_v15  ;;  %v1351_v15 = vld [vmem:[#allocation6 + $0x860] sm:$0xff] }
 0x3c2   : > { %v1099_v11 = vld [vmem:[#allocation2 + $0x17] sm:$0xff] }
 0x3c3   : > { %v1097_v13 = vld [vmem:[#allocation2 + $0x16] sm:$0xff]  ;;  %1224 = vmatprep.mubr.f32.mxu0 %v1099_v11  ;;  %1096 = vst [vmem:[#allocation2 + $0x20] sm:$0xff] %v4228_v10  ;;  %3552 = vmatmul.mubr.f32.vlgmr.msra.gmra.mxu1 %v4228_v10 }
 0x3c4   : > { %1225 = vmatmul.mubr.f32.vlgmr.msra.gmra.mxu0 %v1097_v13  ;;  %3555 = vmatpush3.msra.mxu1 %v1370_v57  ;;  %v1325_v57 = vld [vmem:[#allocation6 + $0x790] sm:$0xff] }
 0x3c5   : > { %3044 = vmatpush3.msra.mxu0 %v1338_v14  ;;  %3556 = vmatprep.subr.mxu1 %v1369_v17 }
 0x3c6   : > { %3045 = vmatprep.subr.mxu0 %v1353_v16  ;;  %3557 = vmatpush3.msra.mxu1 %v1369_v17 }
 0x3c7   : > { %3046 = vmatpush3.msra.mxu0 %v1337_v12  ;;  %3558 = vmatprep.subr.mxu1 %v1368_v59 }
 0x3c8   : > { %3047 = vmatprep.subr.mxu0 %v1352_v19  ;;  %3559 = vmatpush3.msra.mxu1 %v1368_v59 }
 0x3c9   : > { %3048 = vmatpush3.msra.mxu0 %v1336_v20  ;;  %3560 = vmatprep.subr.mxu1 %v1367_v62 }
 0x3ca   : > { %3049 = vmatprep.subr.mxu0 %v1351_v15  ;;  %v1100_v23 = vld [vmem:[#allocation2 + $0x1f] sm:$0xff]  ;;  %3561 = vmatpush3.msra.mxu1 %v1367_v62 }
 0x3cb   : > { %v1098_v24 = vld [vmem:[#allocation2 + $0x1e] sm:$0xff]  ;;  %3050 = vmatpush3.msra.mxu0 %v1335_v21  ;;  %1229 = vmatprep.mubr.f32.mxu0 %v1100_v23 }
 0x3cc   : > { %3051 = vmatprep.subr.mxu0 %v1350_v22  ;;  %1230 = vmatmul.mubr.f32.gmra.mxu0 %v1098_v24  ;;  %v1557_v22 = vld [vmem:[#allocation6 + $0x978] sm:$0xff]  ;;  %v1572_v23 = vld [vmem:[#allocation6 + $0x9f0] sm:$0xff] }
 0x3cd   : > { %3052 = vmatpush3.msra.mxu0 %v1334_v25  ;;  %3562 = vmatprep.subr.mxu1 %v1366_v26  ;;  %v1588_v24 = vld [vmem:[#allocation6 + $0xa70] sm:$0xff]  ;;  %v1571_v25 = vld [vmem:[#allocation6 + $0x9e8] sm:$0xff] }
 0x3ce   : > { %3563 = vmatpush3.msra.mxu1 %v1366_v26  ;;  %3053 = vmatprep.subr.mxu0 %v1349_v27  ;;  %v1587_v26 = vld [vmem:[#allocation6 + $0xa68] sm:$0xff] }
 0x3cf   : > { %3564 = vmatprep.subr.mxu1 %v1365_v28  ;;  %3054 = vmatpush3.msra.mxu0 %v1333_v29  ;;  %v1555_v27 = vld [vmem:[#allocation6 + $0x968] sm:$0xff]  ;;  %v1554_v29 = vld [vmem:[#allocation6 + $0x960] sm:$0xff] }
 0x3d0   : > { %3565 = vmatpush3.msra.mxu1 %v1365_v28  ;;  %3055 = vmatprep.subr.mxu0 %v1348_v30  ;;  %v1586_v28 = vld [vmem:[#allocation6 + $0xa60] sm:$0xff]  ;;  %v1569_v30 = vld [vmem:[#allocation6 + $0x9d8] sm:$0xff] }
 0x3d1   : > { %3566 = vmatprep.subr.mxu1 %v1364_v31  ;;  %3056 = vmatpush3.msra.mxu0 %v1332_v32 }
 0x3d2   : > { %3567 = vmatpush3.msra.mxu1 %v1364_v31  ;;  %3057 = vmatprep.subr.mxu0 %v1347_v33  ;;  %v1553_v33 = vld [vmem:[#allocation6 + $0x958] sm:$0xff] }
 0x3d3   : > { %3568 = vmatprep.subr.mxu1 %v1363_v34  ;;  %3058 = vmatpush3.msra.mxu0 %v1331_v35  ;;  %v1552_v35 = vld [vmem:[#allocation6 + $0x950] sm:$0xff] }
 0x3d4   : > { %3569 = vmatpush3.msra.mxu1 %v1363_v34  ;;  %3059 = vmatprep.subr.mxu0 %v1346_v36  ;;  %v1568_v34 = vld [vmem:[#allocation6 + $0x9d0] sm:$0xff]  ;;  %v1567_v36 = vld [vmem:[#allocation6 + $0x9c8] sm:$0xff] }
 0x3d5   : > { %3570 = vmatprep.subr.mxu1 %v1362_v37  ;;  %3060 = vmatpush3.msra.mxu0 %v1330_v38  ;;  %v1566_v38 = vld [vmem:[#allocation6 + $0x9c0] sm:$0xff] }
 0x3d6   : > { %3571 = vmatpush3.msra.mxu1 %v1362_v37  ;;  %3061 = vmatprep.subr.mxu0 %v1345_v39  ;;  %v1551_v37 = vld [vmem:[#allocation6 + $0x948] sm:$0xff]  ;;  %v1585_v39 = vld [vmem:[#allocation6 + $0xa58] sm:$0xff] }
 0x3d7   : > { %3572 = vmatprep.subr.mxu1 %v1361_v40  ;;  %3062 = vmatpush3.msra.mxu0 %v1329_v41  ;;  %v1565_v41 = vld [vmem:[#allocation6 + $0x9b8] sm:$0xff] }
 0x3d8   : > { %3573 = vmatpush3.msra.mxu1 %v1361_v40  ;;  %3063 = vmatprep.subr.mxu0 %v1344_v42  ;;  %v1550_v40 = vld [vmem:[#allocation6 + $0x940] sm:$0xff]  ;;  %v1584_v42 = vld [vmem:[#allocation6 + $0xa50] sm:$0xff] }
 0x3d9   : > { %3574 = vmatprep.subr.mxu1 %v1360_v43  ;;  %3064 = vmatpush3.msra.mxu0 %v1328_v44  ;;  %v1564_v44 = vld [vmem:[#allocation6 + $0x9b0] sm:$0xff] }
 0x3da   : > { %3575 = vmatpush3.msra.mxu1 %v1360_v43  ;;  %3065 = vmatprep.subr.mxu0 %v1343_v47  ;;  %v1549_v43 = vld [vmem:[#allocation6 + $0x938] sm:$0xff]  ;;  %v1548_v47 = vld [vmem:[#allocation6 + $0x930] sm:$0xff] }
 0x3db   : > { %3576 = vmatprep.subr.mxu1 %v1359_v48  ;;  %3066 = vmatpush3.msra.mxu0 %v1327_v49  ;;  %v1582_v49 = vld [vmem:[#allocation6 + $0xa40] sm:$0xff] }
 0x3dc   : > { %3577 = vmatpush3.msra.mxu1 %v1359_v48  ;;  %3067 = vmatprep.subr.mxu0 %v1342_v50  ;;  %v1563_v48 = vld [vmem:[#allocation6 + $0x9a8] sm:$0xff] }
 0x3dd   : > { %3578 = vmatprep.subr.mxu1 %v1358_v51  ;;  %3068 = vmatpush3.msra.mxu0 %v1326_v53  ;;  %v1547_v50 = vld [vmem:[#allocation6 + $0x928] sm:$0xff]  ;;  %v1581_v53 = vld [vmem:[#allocation6 + $0xa38] sm:$0xff] }
 0x3de   : > { %3579 = vmatpush3.msra.mxu1 %v1358_v51  ;;  %3069 = vmatprep.subr.mxu0 %v1341_v54  ;;  %v1562_v51 = vld [vmem:[#allocation6 + $0x9a0] sm:$0xff] }
 0x3df   : > { %3580 = vmatprep.subr.mxu1 %v1357_v56  ;;  %3070 = vmatpush3.msra.mxu0 %v1325_v57  ;;  %v1546_v54 = vld [vmem:[#allocation6 + $0x920] sm:$0xff]  ;;  %v1580_v57 = vld [vmem:[#allocation6 + $0xa30] sm:$0xff] }
 0x3e0   : > { %3581 = vmatpush3.msra.mxu1 %v1357_v56  ;;  %3071 = vmatprep.subr.mxu0 %v1340_v58  ;;  %v1561_v56 = vld [vmem:[#allocation6 + $0x998] sm:$0xff] }
 0x3e1   : > { %3582 = vmatprep.subr.mxu1 %v1356_v60  ;;  %3072 = vmatpush3.msra.mxu0 %v1324_v61  ;;  %v1545_v58 = vld [vmem:[#allocation6 + $0x918] sm:$0xff]  ;;  %v1579_v61 = vld [vmem:[#allocation6 + $0xa28] sm:$0xff] }
 0x3e2   : > { %3583 = vmatpush3.msra.mxu1 %v1356_v60  ;;  %3073 = vmatprep.subr.mxu0 %v1339_v63  ;;  %v1560_v60 = vld [vmem:[#allocation6 + $0x990] sm:$0xff] }
 0x3e3   : > { %3584 = vmatprep.subr.mxu1 %v1355_v0  ;;  %3074 = vmatpush3.msra.mxu0 %v1323_v1  ;;  %v1544_v63 = vld [vmem:[#allocation6 + $0x910] sm:$0xff]  ;;  %v1578_v1 = vld [vmem:[#allocation6 + $0xa20] sm:$0xff] }
 0x3e4   : > { %3585 = vmatpush3.msra.mxu1 %v1355_v0  ;;  %3099 = vmatprep.subr.mxu0 %v1573_v52  ;;  %v1559_v0 = vld [vmem:[#allocation6 + $0x988] sm:$0xff] }
 0x3e5   : > { %3589 = vmatprep.subr.mxu1 %v1589_v2  ;;  %v1543_v52 = vld [vmem:[#allocation6 + $0x908] sm:$0xff] }
 0x483   : > { %v3553_v4 = vpop.f32.mrf.mxu1 }
 0x484   : > { %v3019_v3 = vpop.f32.mrf.mxu0 }
 0x485   : > { %v1301_v9 = vpop.f32.mrf.mxu1 }
 0x486   : > { %v3020_v5 = vpop.f32.mrf.mxu0 }
 0x487   : > { %v3021_v7 = vadd.f32 %v3020_v5, %v3019_v3  ;;  %v1577_v3 = vld [vmem:[#allocation6 + $0xa18] sm:$0xff]  ;;  %v1576_v5 = vld [vmem:[#allocation6 + $0xa10] sm:$0xff] }
 0x489   : > { %v1227_v8 = vadd.f32 %v3021_v7, %v2749_v6  ;;  %v1574_v7 = vld [vmem:[#allocation6 + $0xa00] sm:$0xff] }
 0x48b   : > { %v1302_v11 = vadd.f32 %v1301_v9, %v1227_v8  ;;  %v1792_v8 = vld [vmem:[#allocation6 + $0xb78] sm:$0xff] }
 0x48c   : > { %v3022_v14 = vpop.f32.mrf.mxu0  ;;  %v1808_v9 = vld [vmem:[#allocation6 + $0xbf8] sm:$0xff] }
 0x48d   : > { %v1310_v13 = vmax.f32 %v1302_v11, 0.0  ;;  %v1776_v11 = vld [vmem:[#allocation6 + $0xaf8] sm:$0xff] }
 0x48e   : > { %v3023_v17 = vpop.f32.mrf.mxu0 }
 0x48f   : > { %v4233_v16 = vadd.f32 %v1310_v13, %v4223_v55  ;;  %v3024_v12 = vadd.f32 %v3023_v17, %v3022_v14  ;;  %v1556_v55 = vld [vmem:[#allocation6 + $0x970] sm:$0xff]  ;;  %v1790_v17 = vld [vmem:[#allocation6 + $0xb68] sm:$0xff] }
 0x490   : > { %v1791_v13 = vld [vmem:[#allocation6 + $0xb70] sm:$0xff] }
 0x491   : > { %1314 = vst [vmem:[#allocation2 + $0x18] sm:$0xff] %v4233_v16  ;;  %3586 = vmatprep.mubr.f32.mxu1 %v4233_v16  ;;  %v1232_v19 = vadd.f32 %v3024_v12, %v2749_v6  ;;  %v1575_v6 = vld [vmem:[#allocation6 + $0xa08] sm:$0xff]  ;;  %v1775_v14 = vld [vmem:[#allocation6 + $0xaf0] sm:$0xff]  ;;  %v1789_v12 = vld [vmem:[#allocation6 + $0xb60] sm:$0xff] }
 0x493   : > { %v1307_v59 = vadd.f32 %v3553_v4, %v1232_v19  ;;  %v1542_v4 = vld [vmem:[#allocation6 + $0x900] sm:$0xff] }
 0x494   : > { %v1773_v19 = vld [vmem:[#allocation6 + $0xae0] sm:$0xff] }
 0x495   : > { %v1311_v20 = vmax.f32 %v1307_v59, 0.0  ;;  %v1788_v59 = vld [vmem:[#allocation6 + $0xb58] sm:$0xff] }
 0x497   : > { %v4238_v15 = vadd.f32 %v1311_v20, %v4228_v10  ;;  %v1570_v10 = vld [vmem:[#allocation6 + $0x9e0] sm:$0xff]  ;;  %v1772_v20 = vld [vmem:[#allocation6 + $0xad8] sm:$0xff] }
 0x498   : > { %v1318_v62 = vld [vmem:[#allocation2 + $0x15] sm:$0xff] }
 0x499   : > { %v1316_v21 = vld [vmem:[#allocation2 + $0x12] sm:$0xff]  ;;  %1443 = vmatprep.mubr.f32.mxu0 %v1318_v62  ;;  %1315 = vst [vmem:[#allocation2 + $0x20] sm:$0xff] %v4238_v15  ;;  %3587 = vmatmul.mubr.f32.vlgmr.msra.gmra.mxu1 %v4238_v15 }
 0x49a   : > { %1444 = vmatmul.mubr.f32.vlgmr.msra.gmra.mxu0 %v1316_v21  ;;  %3590 = vmatpush3.msra.mxu1 %v1589_v2  ;;  %v1558_v2 = vld [vmem:[#allocation6 + $0x980] sm:$0xff]  ;;  %v1787_v62 = vld [vmem:[#allocation6 + $0xb50] sm:$0xff] }
 0x49b   : > { %3100 = vmatpush3.msra.mxu0 %v1557_v22  ;;  %3591 = vmatprep.subr.mxu1 %v1588_v24 }
 0x49c   : > { %3101 = vmatprep.subr.mxu0 %v1572_v23  ;;  %3592 = vmatpush3.msra.mxu1 %v1588_v24  ;;  %v2750_v24 = vld [vmem:[#allocation8 + $0x5] ss:$0 sm:$0xff] }
 0x49d   : > { %3102 = vmatpush3.msra.mxu0 %v1556_v55  ;;  %3593 = vmatprep.subr.mxu1 %v1587_v26 }
 0x49e   : > { %3103 = vmatprep.subr.mxu0 %v1571_v25  ;;  %3594 = vmatpush3.msra.mxu1 %v1587_v26 }
 0x49f   : > { %3104 = vmatpush3.msra.mxu0 %v1555_v27  ;;  %3595 = vmatprep.subr.mxu1 %v1586_v28 }
 0x4a0   : > { %3105 = vmatprep.subr.mxu0 %v1570_v10  ;;  %v1319_v31 = vld [vmem:[#allocation2 + $0x1d] sm:$0xff]  ;;  %3596 = vmatpush3.msra.mxu1 %v1586_v28 }
 0x4a1   : > { %v1317_v32 = vld [vmem:[#allocation2 + $0x1a] sm:$0xff]  ;;  %3106 = vmatpush3.msra.mxu0 %v1554_v29  ;;  %1448 = vmatprep.mubr.f32.mxu0 %v1319_v31 }
 0x4a2   : > { %3107 = vmatprep.subr.mxu0 %v1569_v30  ;;  %1449 = vmatmul.mubr.f32.gmra.mxu0 %v1317_v32 }
 0x4a3   : > { %3108 = vmatpush3.msra.mxu0 %v1553_v33  ;;  %1662 = vmatprep.mubr.f32.mxu0 %v4204_v45  ;;  %v1583_v45 = vld [vmem:[#allocation6 + $0xa48] sm:$0xff] }
 0x4a4   : > { %3109 = vmatprep.subr.mxu0 %v1568_v34  ;;  %3597 = vmatprep.subr.mxu1 %v1585_v39 }
 0x4a5   : > { %3110 = vmatpush3.msra.mxu0 %v1552_v35  ;;  %3598 = vmatpush3.msra.mxu1 %v1585_v39  ;;  %v1804_v39 = vld [vmem:[#allocation6 + $0xbd8] sm:$0xff] }
 0x4a6   : > { %3111 = vmatprep.subr.mxu0 %v1567_v36  ;;  %3599 = vmatprep.subr.mxu1 %v1584_v42 }
 0x4a7   : > { %3112 = vmatpush3.msra.mxu0 %v1551_v37  ;;  %3600 = vmatpush3.msra.mxu1 %v1584_v42  ;;  %v1807_v37 = vld [vmem:[#allocation6 + $0xbf0] sm:$0xff]  ;;  %v1800_v42 = vld [vmem:[#allocation6 + $0xbb8] sm:$0xff] }
 0x4a8   : > { %3113 = vmatprep.subr.mxu0 %v1566_v38  ;;  %3601 = vmatprep.subr.mxu1 %v1583_v45  ;;  %v1805_v38 = vld [vmem:[#allocation6 + $0xbe0] sm:$0xff] }
 0x4a9   : > { %3114 = vmatpush3.msra.mxu0 %v1550_v40  ;;  %3602 = vmatpush3.msra.mxu1 %v1583_v45  ;;  %v1803_v40 = vld [vmem:[#allocation6 + $0xbd0] sm:$0xff] }
 0x4aa   : > { %3115 = vmatprep.subr.mxu0 %v1565_v41  ;;  %3603 = vmatprep.subr.mxu1 %v1582_v49  ;;  %v1771_v41 = vld [vmem:[#allocation6 + $0xad0] sm:$0xff] }
 0x4ab   : > { %3116 = vmatpush3.msra.mxu0 %v1549_v43  ;;  %3604 = vmatpush3.msra.mxu1 %v1582_v49  ;;  %v1786_v43 = vld [vmem:[#allocation6 + $0xb48] sm:$0xff]  ;;  %v1799_v45 = vld [vmem:[#allocation6 + $0xbb0] sm:$0xff] }
 0x4ac   : > { %3117 = vmatprep.subr.mxu0 %v1564_v44  ;;  %3605 = vmatprep.subr.mxu1 %v1581_v53  ;;  %v1770_v44 = vld [vmem:[#allocation6 + $0xac8] sm:$0xff] }
 0x4ad   : > { %3118 = vmatpush3.msra.mxu0 %v1548_v47  ;;  %3606 = vmatpush3.msra.mxu1 %v1581_v53  ;;  %v1785_v47 = vld [vmem:[#allocation6 + $0xb40] sm:$0xff]  ;;  %v1798_v49 = vld [vmem:[#allocation6 + $0xba8] sm:$0xff] }
 0x4ae   : > { %3119 = vmatprep.subr.mxu0 %v1563_v48  ;;  %3607 = vmatprep.subr.mxu1 %v1580_v57  ;;  %v1769_v48 = vld [vmem:[#allocation6 + $0xac0] sm:$0xff] }
 0x4af   : > { %3120 = vmatpush3.msra.mxu0 %v1547_v50  ;;  %3608 = vmatpush3.msra.mxu1 %v1580_v57  ;;  %v1784_v50 = vld [vmem:[#allocation6 + $0xb38] sm:$0xff]  ;;  %v1797_v53 = vld [vmem:[#allocation6 + $0xba0] sm:$0xff] }
 0x4b0   : > { %3121 = vmatprep.subr.mxu0 %v1562_v51  ;;  %3609 = vmatprep.subr.mxu1 %v1579_v61  ;;  %v1768_v51 = vld [vmem:[#allocation6 + $0xab8] sm:$0xff] }
 0x4b1   : > { %3122 = vmatpush3.msra.mxu0 %v1546_v54  ;;  %3610 = vmatpush3.msra.mxu1 %v1579_v61  ;;  %v1783_v54 = vld [vmem:[#allocation6 + $0xb30] sm:$0xff]  ;;  %v1796_v57 = vld [vmem:[#allocation6 + $0xb98] sm:$0xff] }
 0x4b2   : > { %3123 = vmatprep.subr.mxu0 %v1561_v56  ;;  %3611 = vmatprep.subr.mxu1 %v1578_v1  ;;  %v1767_v56 = vld [vmem:[#allocation6 + $0xab0] sm:$0xff] }
 0x4b3   : > { %3124 = vmatpush3.msra.mxu0 %v1545_v58  ;;  %3612 = vmatpush3.msra.mxu1 %v1578_v1  ;;  %v1782_v58 = vld [vmem:[#allocation6 + $0xb28] sm:$0xff]  ;;  %v1795_v61 = vld [vmem:[#allocation6 + $0xb90] sm:$0xff] }
 0x4b4   : > { %3125 = vmatprep.subr.mxu0 %v1560_v60  ;;  %3613 = vmatprep.subr.mxu1 %v1577_v3  ;;  %v1766_v60 = vld [vmem:[#allocation6 + $0xaa8] sm:$0xff] }
 0x4b5   : > { %3126 = vmatpush3.msra.mxu0 %v1544_v63  ;;  %3614 = vmatpush3.msra.mxu1 %v1577_v3  ;;  %v1781_v63 = vld [vmem:[#allocation6 + $0xb20] sm:$0xff]  ;;  %v1794_v1 = vld [vmem:[#allocation6 + $0xb88] sm:$0xff] }
 0x4b6   : > { %3127 = vmatprep.subr.mxu0 %v1559_v0  ;;  %3615 = vmatprep.subr.mxu1 %v1576_v5  ;;  %v1765_v0 = vld [vmem:[#allocation6 + $0xaa0] sm:$0xff] }
 0x4b7   : > { %3128 = vmatpush3.msra.mxu0 %v1543_v52  ;;  %3616 = vmatpush3.msra.mxu1 %v1576_v5  ;;  %v1780_v52 = vld [vmem:[#allocation6 + $0xb18] sm:$0xff]  ;;  %v1793_v3 = vld [vmem:[#allocation6 + $0xb80] sm:$0xff]  ;;  %v1763_v5 = vld [vmem:[#allocation6 + $0xa90] sm:$0xff] }
 0x4b8   : > { %3129 = vmatprep.subr.mxu0 %v1558_v2  ;;  %3617 = vmatprep.subr.mxu1 %v1575_v6  ;;  %v1764_v2 = vld [vmem:[#allocation6 + $0xa98] sm:$0xff] }
 0x4b9   : > { %3130 = vmatpush3.msra.mxu0 %v1542_v4  ;;  %3618 = vmatpush3.msra.mxu1 %v1575_v6  ;;  %v1779_v4 = vld [vmem:[#allocation6 + $0xb10] sm:$0xff]  ;;  %v1778_v6 = vld [vmem:[#allocation6 + $0xb08] sm:$0xff] }
 0x4ba   : > { %1663 = vmatmul.mubr.f32.vlgmr.msra.gmra.mxu0 %v4207_v46  ;;  %3619 = vmatprep.subr.mxu1 %v1574_v7  ;;  %v1774_v46 = vld [vmem:[#allocation6 + $0xae8] sm:$0xff] }
 0x4bb   : > { %3620 = vmatpush3.msra.mxu1 %v1574_v7  ;;  %3155 = vmatprep.subr.mxu0 %v1792_v8  ;;  %v1762_v7 = vld [vmem:[#allocation6 + $0xa88] sm:$0xff]  ;;  %v1777_v8 = vld [vmem:[#allocation6 + $0xb00] sm:$0xff] }
 0x4bc   : > { %3624 = vmatprep.subr.mxu1 %v1808_v9  ;;  %3156 = vmatpush3.msra.mxu0 %v1776_v11  ;;  %v2011_v11 = vld [vmem:[#allocation6 + $0xcf8] sm:$0xff] }
 0x4bd   : > { %3157 = vmatprep.subr.mxu0 %v1791_v13  ;;  %v2027_v13 = vld [vmem:[#allocation6 + $0xd78] sm:$0xff] }
 0x4be   : > { %3158 = vmatpush3.msra.mxu0 %v1775_v14 }
 0x4bf   : > { %3159 = vmatprep.subr.mxu0 %v1790_v17 }
 0x4c0   : > { %3160 = vmatpush3.msra.mxu0 %v1774_v46 }
 0x4c1   : > { %3161 = vmatprep.subr.mxu0 %v1789_v12  ;;  %v2751_v12 = vld [vmem:[#allocation8 + $0x6] ss:$0 sm:$0xff] }
 0x4c2   : > { %3162 = vmatpush3.msra.mxu0 %v1773_v19 }
 0x4c3   : > { %3163 = vmatprep.subr.mxu0 %v1788_v59 }
 0x4c4   : > { %3164 = vmatpush3.msra.mxu0 %v1772_v20 }
 0x4c5   : > { %3165 = vmatprep.subr.mxu0 %v1787_v62 }
 0x4c6   : > { %3166 = vmatpush3.msra.mxu0 %v1771_v41  ;;  %v2023_v41 = vld [vmem:[#allocation6 + $0xd58] sm:$0xff] }
 0x4c7   : > { %3167 = vmatprep.subr.mxu0 %v1786_v43  ;;  %v2021_v43 = vld [vmem:[#allocation6 + $0xd48] sm:$0xff] }
 0x4c8   : > { %3168 = vmatpush3.msra.mxu0 %v1770_v44  ;;  %v2020_v44 = vld [vmem:[#allocation6 + $0xd40] sm:$0xff] }
 0x4c9   : > { %3169 = vmatprep.subr.mxu0 %v1785_v47  ;;  %v1990_v47 = vld [vmem:[#allocation6 + $0xc50] sm:$0xff] }
 0x4ca   : > { %3170 = vmatpush3.msra.mxu0 %v1769_v48  ;;  %v2019_v48 = vld [vmem:[#allocation6 + $0xd38] sm:$0xff] }
 0x4cb   : > { %3171 = vmatprep.subr.mxu0 %v1784_v50  ;;  %v1989_v50 = vld [vmem:[#allocation6 + $0xc48] sm:$0xff] }
 0x4cc   : > { %3172 = vmatpush3.msra.mxu0 %v1768_v51  ;;  %v2018_v51 = vld [vmem:[#allocation6 + $0xd30] sm:$0xff] }
 0x4cd   : > { %3173 = vmatprep.subr.mxu0 %v1783_v54  ;;  %v1988_v54 = vld [vmem:[#allocation6 + $0xc40] sm:$0xff] }
 0x4ce   : > { %3174 = vmatpush3.msra.mxu0 %v1767_v56  ;;  %v2017_v56 = vld [vmem:[#allocation6 + $0xd28] sm:$0xff] }
 0x4cf   : > { %3175 = vmatprep.subr.mxu0 %v1782_v58  ;;  %v1987_v58 = vld [vmem:[#allocation6 + $0xc38] sm:$0xff] }
 0x4d0   : > { %3176 = vmatpush3.msra.mxu0 %v1766_v60  ;;  %v2016_v60 = vld [vmem:[#allocation6 + $0xd20] sm:$0xff] }
 0x4d1   : > { %3177 = vmatprep.subr.mxu0 %v1781_v63  ;;  %v1986_v63 = vld [vmem:[#allocation6 + $0xc30] sm:$0xff] }
 0x4d2   : > { %3178 = vmatpush3.msra.mxu0 %v1765_v0  ;;  %v2015_v0 = vld [vmem:[#allocation6 + $0xd18] sm:$0xff] }
 0x4d3   : > { %3179 = vmatprep.subr.mxu0 %v1780_v52  ;;  %v1985_v52 = vld [vmem:[#allocation6 + $0xc28] sm:$0xff] }
 0x4d4   : > { %3180 = vmatpush3.msra.mxu0 %v1764_v2  ;;  %v2014_v2 = vld [vmem:[#allocation6 + $0xd10] sm:$0xff] }
 0x4d5   : > { %3181 = vmatprep.subr.mxu0 %v1779_v4  ;;  %v1984_v4 = vld [vmem:[#allocation6 + $0xc20] sm:$0xff] }
 0x4d6   : > { %3182 = vmatpush3.msra.mxu0 %v1763_v5  ;;  %v2013_v5 = vld [vmem:[#allocation6 + $0xd08] sm:$0xff] }
 0x4d7   : > { %3183 = vmatprep.subr.mxu0 %v1778_v6  ;;  %v1999_v6 = vld [vmem:[#allocation6 + $0xc98] sm:$0xff] }
 0x4d8   : > { %3184 = vmatpush3.msra.mxu0 %v1762_v7  ;;  %v1983_v7 = vld [vmem:[#allocation6 + $0xc18] sm:$0xff] }
 0x4d9   : > { %3185 = vmatprep.subr.mxu0 %v1777_v8  ;;  %v2012_v8 = vld [vmem:[#allocation6 + $0xd00] sm:$0xff] }
 0x559   : > { %v3588_v23 = vpop.f32.mrf.mxu1 }
 0x55a   : > { %v3075_v21 = vpop.f32.mrf.mxu0 }
 0x55b   : > { %v1520_v26 = vpop.f32.mrf.mxu1 }
 0x55c   : > { %v3076_v22 = vpop.f32.mrf.mxu0 }
 0x55d   : > { %v3077_v55 = vadd.f32 %v3076_v22, %v3075_v21 }
 0x55f   : > { %v1446_v25 = vadd.f32 %v3077_v55, %v2750_v24 }
 0x561   : > { %v1521_v27 = vadd.f32 %v1520_v26, %v1446_v25 }
 0x562   : > { %v3078_v10 = vpop.f32.mrf.mxu0 }
 0x563   : > { %v1529_v28 = vmax.f32 %v1521_v27, 0.0 }
 0x564   : > { %v3079_v30 = vpop.f32.mrf.mxu0 }
 0x565   : > { %v4245_v29 = vadd.f32 %v1529_v28, %v4233_v16  ;;  %v3080_v31 = vadd.f32 %v3079_v30, %v3078_v10  ;;  %v1806_v16 = vld [vmem:[#allocation6 + $0xbe8] sm:$0xff]  ;;  %v2026_v28 = vld [vmem:[#allocation6 + $0xd70] sm:$0xff] }
 0x566   : > { %v2025_v30 = vld [vmem:[#allocation6 + $0xd68] sm:$0xff] }
 0x567   : > { %1533 = vst [vmem:[#allocation2 + $0x18] sm:$0xff] %v4245_v29  ;;  %3621 = vmatprep.mubr.f32.mxu1 %v4245_v29  ;;  %v1451_v32 = vadd.f32 %v3080_v31, %v2750_v24  ;;  %v1995_v31 = vld [vmem:[#allocation6 + $0xc78] sm:$0xff] }
 0x569   : > { %v1526_v33 = vadd.f32 %v3588_v23, %v1451_v32 }
 0x56b   : > { %v1530_v34 = vmax.f32 %v1526_v33, 0.0  ;;  %v2024_v33 = vld [vmem:[#allocation6 + $0xd60] sm:$0xff] }
 0x56d   : > { %v4250_v35 = vadd.f32 %v1530_v34, %v4238_v15  ;;  %v1802_v15 = vld [vmem:[#allocation6 + $0xbc8] sm:$0xff]  ;;  %v2010_v34 = vld [vmem:[#allocation6 + $0xcf0] sm:$0xff] }
 0x56e   : > { %v1538_v36 = vld [vmem:[#allocation2 + $0x17] sm:$0xff] }
 0x56f   : > { %1667 = vmatprep.mubr.f32.mxu0 %v1538_v36  ;;  %3622 = vmatmul.mubr.f32.vlgmr.msra.gmra.mxu1 %v4250_v35  ;;  %v1994_v36 = vld [vmem:[#allocation6 + $0xc70] sm:$0xff] }
 0x570   : > { %1668 = vmatmul.mubr.f32.gmra.mxu0 %v4219_v18  ;;  %3625 = vmatpush3.msra.mxu1 %v1808_v9  ;;  %v1801_v18 = vld [vmem:[#allocation6 + $0xbc0] sm:$0xff] }
 0x571   : > { %3626 = vmatprep.subr.mxu1 %v1807_v37  ;;  %v1761_v9 = vld [vmem:[#allocation6 + $0xa80] sm:$0xff] }
 0x572   : > { %3627 = vmatpush3.msra.mxu1 %v1807_v37  ;;  %3186 = vmatpush3.msra.mxu0 %v1761_v9  ;;  %v1998_v9 = vld [vmem:[#allocation6 + $0xc90] sm:$0xff] }
 0x573   : > { %3628 = vmatprep.subr.mxu1 %v1806_v16  ;;  %3211 = vmatprep.subr.mxu0 %v2011_v11  ;;  %v1982_v11 = vld [vmem:[#allocation6 + $0xc10] sm:$0xff] }
 0x574   : > { %3629 = vmatpush3.msra.mxu1 %v1806_v16 }
 0x575   : > { %3630 = vmatprep.subr.mxu1 %v1805_v38 }
 0x576   : > { %3631 = vmatpush3.msra.mxu1 %v1805_v38  ;;  %v1993_v38 = vld [vmem:[#allocation6 + $0xc68] sm:$0xff] }
 0x577   : > { %3632 = vmatprep.subr.mxu1 %v1804_v39 }
 0x578   : > { %3633 = vmatpush3.msra.mxu1 %v1804_v39  ;;  %v2008_v39 = vld [vmem:[#allocation6 + $0xce0] sm:$0xff] }
 0x579   : > { %3634 = vmatprep.subr.mxu1 %v1803_v40 }
 0x57a   : > { %3635 = vmatpush3.msra.mxu1 %v1803_v40  ;;  %v3131_v14 = vpop.f32.mrf.mxu0  ;;  %v1992_v40 = vld [vmem:[#allocation6 + $0xc60] sm:$0xff] }
 0x57b   : > { %3636 = vmatprep.subr.mxu1 %v1802_v15 }
 0x57c   : > { %3637 = vmatpush3.msra.mxu1 %v1802_v15  ;;  %v3132_v17 = vpop.f32.mrf.mxu0  ;;  %v2007_v15 = vld [vmem:[#allocation6 + $0xcd8] sm:$0xff] }
 0x57d   : > { %3638 = vmatprep.subr.mxu1 %v1801_v18  ;;  %v3133_v46 = vadd.f32 %v3132_v17, %v3131_v14  ;;  %v1981_v14 = vld [vmem:[#allocation6 + $0xc08] sm:$0xff]  ;;  %v1996_v17 = vld [vmem:[#allocation6 + $0xc80] sm:$0xff] }
 0x57e   : > { %3639 = vmatpush3.msra.mxu1 %v1801_v18  ;;  %v1991_v18 = vld [vmem:[#allocation6 + $0xc58] sm:$0xff] }
 0x57f   : > { %3640 = vmatprep.subr.mxu1 %v1800_v42  ;;  %v1665_v20 = vadd.f32 %v3133_v46, %v2751_v12  ;;  %v1980_v46 = vld [vmem:[#allocation6 + $0xc00] sm:$0xff] }
 0x580   : > { %3641 = vmatpush3.msra.mxu1 %v1800_v42  ;;  %v2022_v42 = vld [vmem:[#allocation6 + $0xd50] sm:$0xff] }
 0x581   : > { %3642 = vmatprep.subr.mxu1 %v1799_v45 }
 0x582   : > { %3643 = vmatpush3.msra.mxu1 %v1799_v45  ;;  %v2006_v45 = vld [vmem:[#allocation6 + $0xcd0] sm:$0xff] }
 0x583   : > { %3644 = vmatprep.subr.mxu1 %v1798_v49 }
 0x584   : > { %3645 = vmatpush3.msra.mxu1 %v1798_v49  ;;  %v2005_v49 = vld [vmem:[#allocation6 + $0xcc8] sm:$0xff] }
 0x585   : > { %3646 = vmatprep.subr.mxu1 %v1797_v53 }
 0x586   : > { %3647 = vmatpush3.msra.mxu1 %v1797_v53  ;;  %v2004_v53 = vld [vmem:[#allocation6 + $0xcc0] sm:$0xff] }
 0x587   : > { %3648 = vmatprep.subr.mxu1 %v1796_v57 }
 0x588   : > { %3649 = vmatpush3.msra.mxu1 %v1796_v57  ;;  %v2003_v57 = vld [vmem:[#allocation6 + $0xcb8] sm:$0xff] }
 0x589   : > { %3650 = vmatprep.subr.mxu1 %v1795_v61 }
 0x58a   : > { %3651 = vmatpush3.msra.mxu1 %v1795_v61  ;;  %v2002_v61 = vld [vmem:[#allocation6 + $0xcb0] sm:$0xff] }
 0x58b   : > { %3652 = vmatprep.subr.mxu1 %v1794_v1 }
 0x58c   : > { %3653 = vmatpush3.msra.mxu1 %v1794_v1  ;;  %v2001_v1 = vld [vmem:[#allocation6 + $0xca8] sm:$0xff] }
 0x58d   : > { %3654 = vmatprep.subr.mxu1 %v1793_v3 }
 0x58e   : > { %3655 = vmatpush3.msra.mxu1 %v1793_v3  ;;  %v2000_v3 = vld [vmem:[#allocation6 + $0xca0] sm:$0xff] }
 0x58f   : > { %3659 = vmatprep.subr.mxu1 %v2027_v13 }
 0x62f   : > { %v3623_v59 = vpop.f32.mrf.mxu1 }
 0x630   : > { %v3134_v19 = vpop.f32.mrf.mxu0 }
 0x631   : > { %v1739_v21 = vpop.f32.mrf.mxu1 }
 0x632   : > { %v3135_v62 = vpop.f32.mrf.mxu0  ;;  %v1740_v23 = vadd.f32 %v1739_v21, %v1665_v20  ;;  %v2752_v21 = vld [vmem:[#allocation8 + $0x7] ss:$0 sm:$0xff] }
 0x633   : > { %v3136_v22 = vadd.f32 %v3135_v62, %v3134_v19  ;;  %v2246_v19 = vld [vmem:[#allocation6 + $0xef8] sm:$0xff] }
 0x634   : > { %v1748_v55 = vmax.f32 %v1740_v23, 0.0 }
 0x635   : > { %v1670_v24 = vadd.f32 %v3136_v22, %v2751_v12  ;;  %v2230_v12 = vld [vmem:[#allocation6 + $0xe78] sm:$0xff] }
 0x636   : > { %v4255_v26 = vadd.f32 %v1748_v55, %v4245_v29 }
 0x637   : > { %v1745_v25 = vadd.f32 %v3623_v59, %v1670_v24 }
 0x638   : > { %1752 = vst [vmem:[#allocation2 + $0x18] sm:$0xff] %v4255_v26  ;;  %3656 = vmatprep.mubr.f32.mxu1 %v4255_v26 }
 0x639   : > { %v1749_v27 = vmax.f32 %v1745_v25, 0.0 }
 0x63b   : > { %v4260_v10 = vadd.f32 %v1749_v27, %v4250_v35  ;;  %v2009_v35 = vld [vmem:[#allocation6 + $0xce8] sm:$0xff] }
 0x63d   : > { %1753 = vst [vmem:[#allocation2 + $0x20] sm:$0xff] %v4260_v10  ;;  %3657 = vmatmul.mubr.f32.vlgmr.msra.gmra.mxu1 %v4260_v10 }
 0x63e   : > { %3660 = vmatpush3.msra.mxu1 %v2027_v13  ;;  %v1997_v13 = vld [vmem:[#allocation6 + $0xc88] sm:$0xff] }
 0x63f   : > { %3661 = vmatprep.subr.mxu1 %v2026_v28  ;;  %v1756_v32 = vld [vmem:[#allocation2 + $0x17] sm:$0xff] }
 0x640   : > { %v1754_v29 = vld [vmem:[#allocation2 + $0x16] sm:$0xff]  ;;  %3662 = vmatpush3.msra.mxu1 %v2026_v28  ;;  %1881 = vmatprep.mubr.f32.mxu0 %v1756_v32 }
 0x641   : > { %3663 = vmatprep.subr.mxu1 %v2025_v30  ;;  %1882 = vmatmul.mubr.f32.vlgmr.msra.gmra.mxu0 %v1754_v29 }
 0x642   : > { %3664 = vmatpush3.msra.mxu1 %v2025_v30  ;;  %3212 = vmatpush3.msra.mxu0 %v1995_v31 }
 0x643   : > { %3665 = vmatprep.subr.mxu1 %v2024_v33  ;;  %3213 = vmatprep.subr.mxu0 %v2010_v34 }
 0x644   : > { %v1757_v37 = vld [vmem:[#allocation2 + $0x1f] sm:$0xff]  ;;  %3666 = vmatpush3.msra.mxu1 %v2024_v33  ;;  %3214 = vmatpush3.msra.mxu0 %v1994_v36 }
 0x645   : > { %v1755_v16 = vld [vmem:[#allocation2 + $0x1e] sm:$0xff]  ;;  %1886 = vmatprep.mubr.f32.mxu0 %v1757_v37  ;;  %3215 = vmatprep.subr.mxu0 %v2009_v35  ;;  %v2244_v35 = vld [vmem:[#allocation6 + $0xee8] sm:$0xff] }
 0x646   : > { %1887 = vmatmul.mubr.f32.gmra.mxu0 %v1755_v16  ;;  %3667 = vmatprep.subr.mxu1 %v2023_v41  ;;  %v2245_v36 = vld [vmem:[#allocation6 + $0xef0] sm:$0xff]  ;;  %v2214_v37 = vld [vmem:[#allocation6 + $0xdf8] sm:$0xff] }
 0x647   : > { %3216 = vmatpush3.msra.mxu0 %v1993_v38  ;;  %3668 = vmatpush3.msra.mxu1 %v2023_v41  ;;  %v2243_v38 = vld [vmem:[#allocation6 + $0xee0] sm:$0xff]  ;;  %v2212_v41 = vld [vmem:[#allocation6 + $0xde8] sm:$0xff] }
 0x648   : > { %3217 = vmatprep.subr.mxu0 %v2008_v39  ;;  %3669 = vmatprep.subr.mxu1 %v2022_v42  ;;  %v2229_v39 = vld [vmem:[#allocation6 + $0xe70] sm:$0xff] }
 0x649   : > { %3218 = vmatpush3.msra.mxu0 %v1992_v40  ;;  %3670 = vmatpush3.msra.mxu1 %v2022_v42  ;;  %v2213_v40 = vld [vmem:[#allocation6 + $0xdf0] sm:$0xff]  ;;  %v2227_v42 = vld [vmem:[#allocation6 + $0xe60] sm:$0xff] }
 0x64a   : > { %3219 = vmatprep.subr.mxu0 %v2007_v15  ;;  %3671 = vmatprep.subr.mxu1 %v2021_v43 }
 0x64b   : > { %3220 = vmatpush3.msra.mxu0 %v1991_v18  ;;  %3672 = vmatpush3.msra.mxu1 %v2021_v43  ;;  %v2211_v43 = vld [vmem:[#allocation6 + $0xde0] sm:$0xff] }
 0x64c   : > { %3673 = vmatprep.subr.mxu1 %v2020_v44  ;;  %3221 = vmatprep.subr.mxu0 %v2006_v45  ;;  %v2210_v45 = vld [vmem:[#allocation6 + $0xdd8] sm:$0xff] }
 0x64d   : > { %3674 = vmatpush3.msra.mxu1 %v2020_v44  ;;  %3222 = vmatpush3.msra.mxu0 %v1990_v47  ;;  %v2226_v44 = vld [vmem:[#allocation6 + $0xe58] sm:$0xff]  ;;  %v2225_v47 = vld [vmem:[#allocation6 + $0xe50] sm:$0xff] }
 0x64e   : > { %3675 = vmatprep.subr.mxu1 %v2019_v48  ;;  %3223 = vmatprep.subr.mxu0 %v2005_v49  ;;  %v2224_v49 = vld [vmem:[#allocation6 + $0xe48] sm:$0xff] }
 0x64f   : > { %3676 = vmatpush3.msra.mxu1 %v2019_v48  ;;  %3224 = vmatpush3.msra.mxu0 %v1989_v50  ;;  %v2209_v48 = vld [vmem:[#allocation6 + $0xdd0] sm:$0xff]  ;;  %v2208_v50 = vld [vmem:[#allocation6 + $0xdc8] sm:$0xff] }
 0x650   : > { %3677 = vmatprep.subr.mxu1 %v2018_v51  ;;  %3225 = vmatprep.subr.mxu0 %v2004_v53  ;;  %v2223_v53 = vld [vmem:[#allocation6 + $0xe40] sm:$0xff] }
 0x651   : > { %3678 = vmatpush3.msra.mxu1 %v2018_v51  ;;  %3226 = vmatpush3.msra.mxu0 %v1988_v54  ;;  %v2242_v51 = vld [vmem:[#allocation6 + $0xed8] sm:$0xff]  ;;  %v2241_v54 = vld [vmem:[#allocation6 + $0xed0] sm:$0xff] }
 0x652   : > { %3679 = vmatprep.subr.mxu1 %v2017_v56  ;;  %3227 = vmatprep.subr.mxu0 %v2003_v57  ;;  %v2222_v57 = vld [vmem:[#allocation6 + $0xe38] sm:$0xff] }
 0x653   : > { %3680 = vmatpush3.msra.mxu1 %v2017_v56  ;;  %3228 = vmatpush3.msra.mxu0 %v1987_v58  ;;  %v2207_v56 = vld [vmem:[#allocation6 + $0xdc0] sm:$0xff]  ;;  %v2240_v58 = vld [vmem:[#allocation6 + $0xec8] sm:$0xff] }
 0x654   : > { %3681 = vmatprep.subr.mxu1 %v2016_v60  ;;  %3229 = vmatprep.subr.mxu0 %v2002_v61  ;;  %v2221_v61 = vld [vmem:[#allocation6 + $0xe30] sm:$0xff] }
 0x655   : > { %3682 = vmatpush3.msra.mxu1 %v2016_v60  ;;  %3230 = vmatpush3.msra.mxu0 %v1986_v63  ;;  %v2206_v60 = vld [vmem:[#allocation6 + $0xdb8] sm:$0xff]  ;;  %v2239_v63 = vld [vmem:[#allocation6 + $0xec0] sm:$0xff] }
 0x656   : > { %3683 = vmatprep.subr.mxu1 %v2015_v0  ;;  %3231 = vmatprep.subr.mxu0 %v2001_v1  ;;  %v2220_v1 = vld [vmem:[#allocation6 + $0xe28] sm:$0xff] }
 0x657   : > { %3684 = vmatpush3.msra.mxu1 %v2015_v0  ;;  %3232 = vmatpush3.msra.mxu0 %v1985_v52  ;;  %v2205_v0 = vld [vmem:[#allocation6 + $0xdb0] sm:$0xff]  ;;  %v2238_v52 = vld [vmem:[#allocation6 + $0xeb8] sm:$0xff] }
 0x658   : > { %3685 = vmatprep.subr.mxu1 %v2014_v2  ;;  %3233 = vmatprep.subr.mxu0 %v2000_v3  ;;  %v2219_v3 = vld [vmem:[#allocation6 + $0xe20] sm:$0xff] }
 0x659   : > { %3686 = vmatpush3.msra.mxu1 %v2014_v2  ;;  %3234 = vmatpush3.msra.mxu0 %v1984_v4  ;;  %v2204_v2 = vld [vmem:[#allocation6 + $0xda8] sm:$0xff]  ;;  %v2237_v4 = vld [vmem:[#allocation6 + $0xeb0] sm:$0xff] }
 0x65a   : > { %3687 = vmatprep.subr.mxu1 %v2013_v5  ;;  %3235 = vmatprep.subr.mxu0 %v1999_v6  ;;  %v2218_v6 = vld [vmem:[#allocation6 + $0xe18] sm:$0xff] }
 0x65b   : > { %3688 = vmatpush3.msra.mxu1 %v2013_v5  ;;  %3236 = vmatpush3.msra.mxu0 %v1983_v7  ;;  %v2203_v5 = vld [vmem:[#allocation6 + $0xda0] sm:$0xff]  ;;  %v2236_v7 = vld [vmem:[#allocation6 + $0xea8] sm:$0xff] }
 0x65c   : > { %3689 = vmatprep.subr.mxu1 %v2012_v8  ;;  %3237 = vmatprep.subr.mxu0 %v1998_v9  ;;  %v2217_v9 = vld [vmem:[#allocation6 + $0xe10] sm:$0xff] }
 0x65d   : > { %3690 = vmatpush3.msra.mxu1 %v2012_v8  ;;  %3238 = vmatpush3.msra.mxu0 %v1982_v11  ;;  %v2202_v8 = vld [vmem:[#allocation6 + $0xd98] sm:$0xff]  ;;  %v2235_v11 = vld [vmem:[#allocation6 + $0xea0] sm:$0xff] }
 0x65e   : > { %3239 = vmatprep.subr.mxu0 %v1997_v13  ;;  %3694 = vmatprep.subr.mxu1 %v2246_v19  ;;  %v2201_v13 = vld [vmem:[#allocation6 + $0xd90] sm:$0xff] }
 0x65f   : > { %3240 = vmatpush3.msra.mxu0 %v1981_v14  ;;  %v2216_v14 = vld [vmem:[#allocation6 + $0xe08] sm:$0xff] }
 0x660   : > { %3241 = vmatprep.subr.mxu0 %v1996_v17  ;;  %v2234_v17 = vld [vmem:[#allocation6 + $0xe98] sm:$0xff] }
 0x661   : > { %3242 = vmatpush3.msra.mxu0 %v1980_v46  ;;  %v2200_v46 = vld [vmem:[#allocation6 + $0xd88] sm:$0xff] }
 0x662   : > { %3267 = vmatprep.subr.mxu0 %v2230_v12  ;;  %v2215_v12 = vld [vmem:[#allocation6 + $0xe00] sm:$0xff] }
 0x6fd   : > { %v3658_v20 = vpop.f32.mrf.mxu1 }
 0x6ff   : > { %v1958_v55 = vpop.f32.mrf.mxu1 }
 0x701   : > { %v3187_v59 = vpop.f32.mrf.mxu0 }
 0x703   : > { %v3188_v62 = vpop.f32.mrf.mxu0 }
 0x704   : > { %v3189_v22 = vadd.f32 %v3188_v62, %v3187_v59  ;;  %v2199_v59 = vld [vmem:[#allocation6 + $0xd80] sm:$0xff] }
 0x705   : > { %v2192_v62 = vld [vmem:[#allocation2 + $0x6] sm:$0xff] }
 0x706   : > { %v3190_v23 = vpop.f32.mrf.mxu0  ;;  %v1884_v24 = vadd.f32 %v3189_v22, %v2752_v21  ;;  %v2231_v22 = vld [vmem:[#allocation6 + $0xe80] sm:$0xff] }
 0x708   : > { %v3191_v25 = vpop.f32.mrf.mxu0  ;;  %v1959_v27 = vadd.f32 %v1958_v55, %v1884_v24  ;;  %v2465_v24 = vld [vmem:[#allocation6 + $0x1078] sm:$0xff] }
 0x709   : > { %v3192_v28 = vadd.f32 %v3191_v25, %v3190_v23  ;;  %v2449_v23 = vld [vmem:[#allocation6 + $0xff8] sm:$0xff]  ;;  %v2448_v25 = vld [vmem:[#allocation6 + $0xff0] sm:$0xff] }
 0x70a   : > { %v1967_v30 = vmax.f32 %v1959_v27, 0.0  ;;  %v2433_v55 = vld [vmem:[#allocation6 + $0xf78] sm:$0xff]  ;;  %v2432_v27 = vld [vmem:[#allocation6 + $0xf70] sm:$0xff] }
 0x70b   : > { %v1889_v31 = vadd.f32 %v3192_v28, %v2752_v21  ;;  %v2232_v21 = vld [vmem:[#allocation6 + $0xe88] sm:$0xff] }
 0x70c   : > { %v4265_v32 = vadd.f32 %v1967_v30, %v4255_v26  ;;  %v2447_v28 = vld [vmem:[#allocation6 + $0xfe8] sm:$0xff] }
 0x70d   : > { %v1964_v29 = vadd.f32 %v3658_v20, %v1889_v31  ;;  %v2194_v20 = vld [vmem:[#allocation2 + $0xf] sm:$0xff] }
 0x70e   : > { %1971 = vst [vmem:[#allocation2 + $0x18] sm:$0xff] %v4265_v32  ;;  %3691 = vmatprep.mubr.f32.mxu1 %v4265_v32  ;;  %v2431_v30 = vld [vmem:[#allocation6 + $0xf68] sm:$0xff]  ;;  %v2446_v31 = vld [vmem:[#allocation6 + $0xfe0] sm:$0xff] }
 0x70f   : > { %v1968_v33 = vmax.f32 %v1964_v29, 0.0  ;;  %v2430_v29 = vld [vmem:[#allocation6 + $0xf60] sm:$0xff] }
 0x711   : > { %v4270_v34 = vadd.f32 %v1968_v33, %v4260_v10  ;;  %v2228_v10 = vld [vmem:[#allocation6 + $0xe68] sm:$0xff]  ;;  %v2445_v33 = vld [vmem:[#allocation6 + $0xfd8] sm:$0xff] }
 0x713   : > { %1972 = vst [vmem:[#allocation2 + $0x20] sm:$0xff] %v4270_v34  ;;  %3692 = vmatmul.mubr.f32.vlgmr.msra.gmra.mxu1 %v4270_v34 }
 0x714   : > { %3695 = vmatpush3.msra.mxu1 %v2246_v19  ;;  %v2233_v19 = vld [vmem:[#allocation6 + $0xe90] sm:$0xff] }
 0x715   : > { %3696 = vmatprep.subr.mxu1 %v2245_v36  ;;  %v1975_v26 = vld [vmem:[#allocation2 + $0x15] sm:$0xff] }
 0x716   : > { %v1973_v16 = vld [vmem:[#allocation2 + $0x12] sm:$0xff]  ;;  %3697 = vmatpush3.msra.mxu1 %v2245_v36  ;;  %2100 = vmatprep.mubr.f32.mxu0 %v1975_v26  ;;  %v2429_v36 = vld [vmem:[#allocation6 + $0xf58] sm:$0xff] }
 0x717   : > { %3698 = vmatprep.subr.mxu1 %v2244_v35  ;;  %2101 = vmatmul.mubr.f32.vlgmr.msra.gmra.mxu0 %v1973_v16 }
 0x718   : > { %3699 = vmatpush3.msra.mxu1 %v2244_v35  ;;  %3268 = vmatpush3.msra.mxu0 %v2214_v37  ;;  %v2444_v35 = vld [vmem:[#allocation6 + $0xfd0] sm:$0xff] }
 0x719   : > { %3700 = vmatprep.subr.mxu1 %v2243_v38  ;;  %3269 = vmatprep.subr.mxu0 %v2229_v39 }
 0x71a   : > { %v1976_v15 = vld [vmem:[#allocation2 + $0x1d] sm:$0xff]  ;;  %3701 = vmatpush3.msra.mxu1 %v2243_v38  ;;  %3270 = vmatpush3.msra.mxu0 %v2213_v40  ;;  %v2753_v38 = vld [vmem:[#allocation8 + $0x8] ss:$0 sm:$0xff] }
 0x71b   : > { %v1974_v18 = vld [vmem:[#allocation2 + $0x1a] sm:$0xff]  ;;  %2105 = vmatprep.mubr.f32.mxu0 %v1976_v15  ;;  %3271 = vmatprep.subr.mxu0 %v2228_v10 }
 0x71c   : > { %2106 = vmatmul.mubr.f32.gmra.mxu0 %v1974_v18  ;;  %3702 = vmatprep.subr.mxu1 %v2242_v51 }
 0x71d   : > { %3272 = vmatpush3.msra.mxu0 %v2212_v41  ;;  %3703 = vmatpush3.msra.mxu1 %v2242_v51  ;;  %v2463_v51 = vld [vmem:[#allocation6 + $0x1068] sm:$0xff] }
 0x71e   : > { %3273 = vmatprep.subr.mxu0 %v2227_v42  ;;  %3704 = vmatprep.subr.mxu1 %v2241_v54 }
 0x71f   : > { %3274 = vmatpush3.msra.mxu0 %v2211_v43  ;;  %3705 = vmatpush3.msra.mxu1 %v2241_v54 }
 0x720   : > { %3275 = vmatprep.subr.mxu0 %v2226_v44  ;;  %3706 = vmatprep.subr.mxu1 %v2240_v58 }
 0x721   : > { %3276 = vmatpush3.msra.mxu0 %v2210_v45  ;;  %3707 = vmatpush3.msra.mxu1 %v2240_v58  ;;  %v2443_v58 = vld [vmem:[#allocation6 + $0xfc8] sm:$0xff] }
 0x722   : > { %3277 = vmatprep.subr.mxu0 %v2225_v47  ;;  %3708 = vmatprep.subr.mxu1 %v2239_v63 }
 0x723   : > { %3278 = vmatpush3.msra.mxu0 %v2209_v48  ;;  %3709 = vmatpush3.msra.mxu1 %v2239_v63  ;;  %v2442_v63 = vld [vmem:[#allocation6 + $0xfc0] sm:$0xff] }
 0x724   : > { %3279 = vmatprep.subr.mxu0 %v2224_v49  ;;  %3710 = vmatprep.subr.mxu1 %v2238_v52 }
 0x725   : > { %3280 = vmatpush3.msra.mxu0 %v2208_v50  ;;  %3711 = vmatpush3.msra.mxu1 %v2238_v52  ;;  %v2464_v50 = vld [vmem:[#allocation6 + $0x1070] sm:$0xff]  ;;  %v2441_v52 = vld [vmem:[#allocation6 + $0xfb8] sm:$0xff] }
 0x726   : > { %3281 = vmatprep.subr.mxu0 %v2223_v53  ;;  %3712 = vmatprep.subr.mxu1 %v2237_v4  ;;  %v2193_v53 = vld [vmem:[#allocation2 + $0xe] sm:$0xff] }
 0x727   : > { %3282 = vmatpush3.msra.mxu0 %v2207_v56  ;;  %3713 = vmatpush3.msra.mxu1 %v2237_v4  ;;  %v2461_v56 = vld [vmem:[#allocation6 + $0x1058] sm:$0xff]  ;;  %v2440_v4 = vld [vmem:[#allocation6 + $0xfb0] sm:$0xff] }
 0x728   : > { %3283 = vmatprep.subr.mxu0 %v2222_v57  ;;  %3714 = vmatprep.subr.mxu1 %v2236_v7  ;;  %v2460_v57 = vld [vmem:[#allocation6 + $0x1050] sm:$0xff] }
 0x729   : > { %3284 = vmatpush3.msra.mxu0 %v2206_v60  ;;  %3715 = vmatpush3.msra.mxu1 %v2236_v7  ;;  %v2459_v60 = vld [vmem:[#allocation6 + $0x1048] sm:$0xff] }
 0x72a   : > { %3285 = vmatprep.subr.mxu0 %v2221_v61  ;;  %3716 = vmatprep.subr.mxu1 %v2235_v11  ;;  %v2427_v61 = vld [vmem:[#allocation6 + $0xf48] sm:$0xff] }
 0x72b   : > { %3286 = vmatpush3.msra.mxu0 %v2205_v0  ;;  %3717 = vmatpush3.msra.mxu1 %v2235_v11  ;;  %v2458_v0 = vld [vmem:[#allocation6 + $0x1040] sm:$0xff]  ;;  %v2439_v7 = vld [vmem:[#allocation6 + $0xfa8] sm:$0xff] }
 0x72c   : > { %3287 = vmatprep.subr.mxu0 %v2220_v1  ;;  %3718 = vmatprep.subr.mxu1 %v2234_v17  ;;  %v2426_v1 = vld [vmem:[#allocation6 + $0xf40] sm:$0xff] }
 0x72d   : > { %3288 = vmatpush3.msra.mxu0 %v2204_v2  ;;  %3719 = vmatpush3.msra.mxu1 %v2234_v17  ;;  %v2457_v2 = vld [vmem:[#allocation6 + $0x1038] sm:$0xff]  ;;  %v2438_v11 = vld [vmem:[#allocation6 + $0xfa0] sm:$0xff] }
 0x72e   : > { %3289 = vmatprep.subr.mxu0 %v2219_v3  ;;  %3720 = vmatprep.subr.mxu1 %v2233_v19  ;;  %v2425_v3 = vld [vmem:[#allocation6 + $0xf38] sm:$0xff] }
 0x72f   : > { %3290 = vmatpush3.msra.mxu0 %v2203_v5  ;;  %2319 = vmatprep.mubr.f32.mxu0 %v2194_v20  ;;  %v2456_v5 = vld [vmem:[#allocation6 + $0x1030] sm:$0xff]  ;;  %v2437_v17 = vld [vmem:[#allocation6 + $0xf98] sm:$0xff] }
 0x730   : > { %3291 = vmatprep.subr.mxu0 %v2218_v6  ;;  %3721 = vmatpush3.msra.mxu1 %v2233_v19  ;;  %v2424_v6 = vld [vmem:[#allocation6 + $0xf30] sm:$0xff] }
 0x731   : > { %3292 = vmatpush3.msra.mxu0 %v2202_v8  ;;  %3722 = vmatprep.subr.mxu1 %v2232_v21  ;;  %v2455_v8 = vld [vmem:[#allocation6 + $0x1028] sm:$0xff]  ;;  %v2436_v19 = vld [vmem:[#allocation6 + $0xf90] sm:$0xff] }
 0x732   : > { %3293 = vmatprep.subr.mxu0 %v2217_v9  ;;  %3723 = vmatpush3.msra.mxu1 %v2232_v21  ;;  %v2423_v9 = vld [vmem:[#allocation6 + $0xf28] sm:$0xff]  ;;  %v2420_v20 = vld [vmem:[#allocation6 + $0xf10] sm:$0xff] }
 0x733   : > { %3294 = vmatpush3.msra.mxu0 %v2201_v13  ;;  %3724 = vmatprep.subr.mxu1 %v2231_v22  ;;  %v2454_v13 = vld [vmem:[#allocation6 + $0x1020] sm:$0xff]  ;;  %v2451_v21 = vld [vmem:[#allocation6 + $0x1008] sm:$0xff] }
 0x734   : > { %3295 = vmatprep.subr.mxu0 %v2216_v14  ;;  %3725 = vmatpush3.msra.mxu1 %v2231_v22  ;;  %v2422_v14 = vld [vmem:[#allocation6 + $0xf20] sm:$0xff]  ;;  %v2419_v22 = vld [vmem:[#allocation6 + $0xf08] sm:$0xff] }
 0x735   : > { %3296 = vmatpush3.msra.mxu0 %v2200_v46  ;;  %3729 = vmatprep.subr.mxu1 %v2465_v24  ;;  %v2453_v46 = vld [vmem:[#allocation6 + $0x1018] sm:$0xff] }
 0x736   : > { %3297 = vmatprep.subr.mxu0 %v2215_v12  ;;  %v2421_v12 = vld [vmem:[#allocation6 + $0xf18] sm:$0xff] }
 0x737   : > { %3298 = vmatpush3.msra.mxu0 %v2199_v59  ;;  %v2452_v59 = vld [vmem:[#allocation6 + $0x1010] sm:$0xff] }
 0x738   : > { %2320 = vmatmul.mubr.f32.vlgmr.msra.gmra.mxu0 %v2192_v62  ;;  %3323 = vmatprep.subr.mxu0 %v2449_v23  ;;  %v2435_v62 = vld [vmem:[#allocation6 + $0xf88] sm:$0xff]  ;;  %v2434_v23 = vld [vmem:[#allocation6 + $0xf80] sm:$0xff] }
 0x739   : > { %3324 = vmatpush3.msra.mxu0 %v2433_v55  ;;  %v2418_v55 = vld [vmem:[#allocation6 + $0xf00] sm:$0xff] }
 0x73a   : > { %3325 = vmatprep.subr.mxu0 %v2448_v25 }
 0x73b   : > { %3326 = vmatpush3.msra.mxu0 %v2432_v27 }
 0x73c   : > { %3327 = vmatprep.subr.mxu0 %v2447_v28 }
 0x73d   : > { %3328 = vmatpush3.msra.mxu0 %v2431_v30  ;;  %v2754_v30 = vld [vmem:[#allocation8 + $0x9] ss:$0 sm:$0xff] }
 0x73e   : > { %3329 = vmatprep.subr.mxu0 %v2446_v31 }
 0x73f   : > { %3330 = vmatpush3.msra.mxu0 %v2430_v29 }
 0x740   : > { %3331 = vmatprep.subr.mxu0 %v2445_v33 }
 0x741   : > { %3332 = vmatpush3.msra.mxu0 %v2429_v36 }
 0x742   : > { %3333 = vmatprep.subr.mxu0 %v2444_v35 }
 0x7d3   : > { %v3693_v16 = vpop.f32.mrf.mxu1 }
 0x7d5   : > { %v2177_v15 = vpop.f32.mrf.mxu1 }
 0x7d7   : > { %v3243_v37 = vpop.f32.mrf.mxu0 }
 0x7d9   : > { %v3244_v26 = vpop.f32.mrf.mxu0 }
 0x7da   : > { %v3245_v39 = vadd.f32 %v3244_v26, %v3243_v37 }
 0x7dc   : > { %v3246_v40 = vpop.f32.mrf.mxu0  ;;  %v2103_v10 = vadd.f32 %v3245_v39, %v2753_v38 }
 0x7de   : > { %v3247_v18 = vpop.f32.mrf.mxu0  ;;  %v2178_v41 = vadd.f32 %v2177_v15, %v2103_v10 }
 0x7df   : > { %v3248_v42 = vadd.f32 %v3247_v18, %v3246_v40 }
 0x7e0   : > { %v2186_v43 = vmax.f32 %v2178_v41, 0.0 }
 0x7e1   : > { %v2108_v44 = vadd.f32 %v3248_v42, %v2753_v38 }
 0x7e2   : > { %v4275_v45 = vadd.f32 %v2186_v43, %v4265_v32  ;;  %v2462_v32 = vld [vmem:[#allocation6 + $0x1060] sm:$0xff] }
 0x7e3   : > { %v2183_v47 = vadd.f32 %v3693_v16, %v2108_v44 }
 0x7e4   : > { %2190 = vst [vmem:[#allocation2 + $0x18] sm:$0xff] %v4275_v45  ;;  %3726 = vmatprep.mubr.f32.mxu1 %v4275_v45 }
 0x7e5   : > { %v2187_v48 = vmax.f32 %v2183_v47, 0.0 }
 0x7e7   : > { %v4280_v49 = vadd.f32 %v2187_v48, %v4270_v34  ;;  %v2428_v34 = vld [vmem:[#allocation6 + $0xf50] sm:$0xff]  ;;  %v2755_v48 = vld [vmem:[#allocation8 + $0xa] ss:$0 sm:$0xff] }
 0x7e8   : > { %3334 = vmatpush3.msra.mxu0 %v2428_v34 }
 0x7e9   : > { %3727 = vmatmul.mubr.f32.vlgmr.msra.gmra.mxu1 %v4280_v49  ;;  %3335 = vmatprep.subr.mxu0 %v2443_v58 }
 0x7ea   : > { %3730 = vmatpush3.msra.mxu1 %v2465_v24  ;;  %3336 = vmatpush3.msra.mxu0 %v2427_v61  ;;  %v2450_v24 = vld [vmem:[#allocation6 + $0x1000] sm:$0xff] }
 0x7eb   : > { %3731 = vmatprep.subr.mxu1 %v2464_v50  ;;  %v2195_v54 = vld [vmem:[#allocation2 + $0x17] sm:$0xff]  ;;  %3337 = vmatprep.subr.mxu0 %v2442_v63 }
 0x7ec   : > { %3732 = vmatpush3.msra.mxu1 %v2464_v50  ;;  %2324 = vmatprep.mubr.f32.mxu0 %v2195_v54 }
 0x7ed   : > { %3733 = vmatprep.subr.mxu1 %v2463_v51  ;;  %2325 = vmatmul.mubr.f32.gmra.mxu0 %v2193_v53 }
 0x7ee   : > { %3734 = vmatpush3.msra.mxu1 %v2463_v51  ;;  %3338 = vmatpush3.msra.mxu0 %v2426_v1 }
 0x7ef   : > { %3735 = vmatprep.subr.mxu1 %v2462_v32  ;;  %3339 = vmatprep.subr.mxu0 %v2441_v52 }
 0x7f0   : > { %3736 = vmatpush3.msra.mxu1 %v2462_v32  ;;  %3340 = vmatpush3.msra.mxu0 %v2425_v3 }
 0x7f1   : > { %3737 = vmatprep.subr.mxu1 %v2461_v56  ;;  %3341 = vmatprep.subr.mxu0 %v2440_v4 }
 0x7f2   : > { %3738 = vmatpush3.msra.mxu1 %v2461_v56  ;;  %3342 = vmatpush3.msra.mxu0 %v2424_v6 }
 0x7f3   : > { %3739 = vmatprep.subr.mxu1 %v2460_v57  ;;  %3343 = vmatprep.subr.mxu0 %v2439_v7 }
 0x7f4   : > { %3740 = vmatpush3.msra.mxu1 %v2460_v57  ;;  %3344 = vmatpush3.msra.mxu0 %v2423_v9 }
 0x7f5   : > { %3741 = vmatprep.subr.mxu1 %v2459_v60  ;;  %3345 = vmatprep.subr.mxu0 %v2438_v11 }
 0x7f6   : > { %3742 = vmatpush3.msra.mxu1 %v2459_v60  ;;  %3346 = vmatpush3.msra.mxu0 %v2422_v14 }
 0x7f7   : > { %3743 = vmatprep.subr.mxu1 %v2458_v0  ;;  %3347 = vmatprep.subr.mxu0 %v2437_v17 }
 0x7f8   : > { %3744 = vmatpush3.msra.mxu1 %v2458_v0  ;;  %3348 = vmatpush3.msra.mxu0 %v2421_v12  ;;  %v3299_v25 = vpop.f32.mrf.mxu0 }
 0x7f9   : > { %3745 = vmatprep.subr.mxu1 %v2457_v2  ;;  %3349 = vmatprep.subr.mxu0 %v2436_v19 }
 0x7fa   : > { %3746 = vmatpush3.msra.mxu1 %v2457_v2  ;;  %3350 = vmatpush3.msra.mxu0 %v2420_v20  ;;  %v3300_v27 = vpop.f32.mrf.mxu0 }
 0x7fb   : > { %3747 = vmatprep.subr.mxu1 %v2456_v5  ;;  %3351 = vmatprep.subr.mxu0 %v2435_v62  ;;  %v3301_v28 = vadd.f32 %v3300_v27, %v3299_v25 }
 0x7fc   : > { %3748 = vmatpush3.msra.mxu1 %v2456_v5  ;;  %3352 = vmatpush3.msra.mxu0 %v2419_v22 }
 0x7fd   : > { %3749 = vmatprep.subr.mxu1 %v2455_v8  ;;  %3353 = vmatprep.subr.mxu0 %v2434_v23  ;;  %v2322_v31 = vadd.f32 %v3301_v28, %v2754_v30 }
 0x7fe   : > { %3750 = vmatpush3.msra.mxu1 %v2455_v8  ;;  %3354 = vmatpush3.msra.mxu0 %v2418_v55 }
 0x7ff   : > { %3751 = vmatprep.subr.mxu1 %v2454_v13 }
 0x800   : > { %3752 = vmatpush3.msra.mxu1 %v2454_v13 }
 0x801   : > { %3753 = vmatprep.subr.mxu1 %v2453_v46 }
 0x802   : > { %3754 = vmatpush3.msra.mxu1 %v2453_v46 }
 0x803   : > { %3755 = vmatprep.subr.mxu1 %v2452_v59 }
 0x804   : > { %3756 = vmatpush3.msra.mxu1 %v2452_v59 }
 0x805   : > { %3757 = vmatprep.subr.mxu1 %v2451_v21 }
 0x806   : > { %3758 = vmatpush3.msra.mxu1 %v2451_v21 }
 0x807   : > { %3759 = vmatprep.subr.mxu1 %v2450_v24 }
 0x808   : > { %3760 = vmatpush3.msra.mxu1 %v2450_v24 }
 0x8a9   : > { %v3728_v29 = vpop.f32.mrf.mxu1 }
 0x8ab   : > { %v2396_v33 = vpop.f32.mrf.mxu1 }
 0x8ac   : > { %v2397_v36 = vadd.f32 %v2396_v33, %v2322_v31 }
 0x8ad   : > { %v3302_v35 = vpop.f32.mrf.mxu0 }
 0x8ae   : > { %v2405_v37 = vmax.f32 %v2397_v36, 0.0 }
 0x8af   : > { %v3303_v26 = vpop.f32.mrf.mxu0 }
 0x8b0   : > { %v2407_v16 = vadd.f32 %v2405_v37, %v4275_v45  ;;  %v3304_v38 = vadd.f32 %v3303_v26, %v3302_v35 }
 0x8b2   : > { %2409 = vst [vmem:[#allocation2 + $0x18] sm:$0xff] %v2407_v16  ;;  %3761 = vmatprep.mubr.f32.mxu1 %v2407_v16  ;;  %v2327_v39 = vadd.f32 %v3304_v38, %v2754_v30 }
 0x8b4   : > { %v2402_v40 = vadd.f32 %v3728_v29, %v2327_v39 }
 0x8b6   : > { %v2406_v10 = vmax.f32 %v2402_v40, 0.0 }
 0x8b8   : > { %v2408_v15 = vadd.f32 %v2406_v10, %v4280_v49 }
 0x8b9   : > { %v2413_v18 = vld [vmem:[#allocation2 + $0x17] sm:$0xff] }
 0x8ba   : > { %v2411_v41 = vld [vmem:[#allocation2 + $0x16] sm:$0xff]  ;;  %2538 = vmatprep.mubr.f32.mxu0 %v2413_v18  ;;  %2410 = vst [vmem:[#allocation2 + $0x20] sm:$0xff] %v2408_v15  ;;  %3762 = vmatmul.mubr.f32.vlgmr.msra.gmra.mxu1 %v2408_v15 }
 0x8bb   : > { %2539 = vmatmul.mubr.f32.vlgmr.msra.gmra.mxu0 %v2411_v41 }
 0x8c1   : > { %v2414_v42 = vld [vmem:[#allocation2 + $0x1f] sm:$0xff] }
 0x8c2   : > { %v2412_v43 = vld [vmem:[#allocation2 + $0x1e] sm:$0xff]  ;;  %2543 = vmatprep.mubr.f32.mxu0 %v2414_v42 }
 0x8c3   : > { %2544 = vmatmul.mubr.f32.gmra.mxu0 %v2412_v43 }
 0x97a   : > { %v3763_v45 = vpop.f32.mrf.mxu1 }
 0x97b   : > { %v3355_v44 = vpop.f32.mrf.mxu0 }
 0x97c   : > { %v2615_v49 = vpop.f32.mrf.mxu1 }
 0x97d   : > { %v3356_v47 = vpop.f32.mrf.mxu0 }
 0x97e   : > { %v3357_v50 = vadd.f32 %v3356_v47, %v3355_v44 }
 0x980   : > { %v2541_v51 = vadd.f32 %v3357_v50, %v2755_v48 }
 0x982   : > { %v2616_v53 = vadd.f32 %v2615_v49, %v2541_v51 }
 0x983   : > { %v3358_v54 = vpop.f32.mrf.mxu0 }
 0x984   : > { %2624 = vst [vmem:[%s217_s18] sm:$0xff] %v2616_v53 }
 0x985   : > { %v3359_v32 = vpop.f32.mrf.mxu0 }
 0x986   : > { %v3360_v56 = vadd.f32 %v3359_v32, %v3358_v54 }
 0x988   : > { %v2546_v57 = vadd.f32 %v3360_v56, %v2755_v48 }
 0x98a   : > { %v2621_v34 = vadd.f32 %v3763_v45, %v2546_v57 }
 0x98c   : > { %2625 = vst [vmem:[%s217_s18 + $0x8] sm:$0xff] %v2621_v34 }
 0x98d   : > { %3931 = shalt.err (!%p3928_p5)
}
 0x98e   : > { %s3932_s23 = scalar_lea.hbm %s4293_s5, 256  ;;  %s3936_s4 = scalar_lea.hbm %s4339_s3, 512 }
 0x98f   : > { %p3933_p11 = scmp.ne.s32.totalorder %s4293_s5, %s3932_s23  ;;  %p3937_p4 = scmp.lt.s32.totalorder %s4293_s5, %s4339_s3 }
 0x990   : > { %p3938_p6 = scmp.lt.s32.totalorder %s3936_s4, %s3932_s23 }
 0x991   : > { %p3934_p9 = pnand %p3933_p11, %p4354_p2 }
 0x992   : > { %p3939_p8 = por %p3938_p6, %p3937_p4 }
 0x993   : > { %p3935_p1 = pneg %p3934_p9 }
 0x995   : > { %p3940_p3 = pnand %p3939_p8, %p3935_p1 }
 0x997   : > { %3943 = shalt.err (!%p3940_p3)
}
 0x998   : > { %s3997_s6 = smov 128   ;;  %s3998_s18 = smov 8  }
 0x999   : > { %3774 = dma.vmem_to_hbm [thread:$0]  (%p4354_p2), %s4288_s20, 256, %s4293_s5, %s2627_s7, %s3997_s6, %s3997_s6, %s3998_s18  }
 0x99a PF: > { %s2655_s27 = sand.u32 1, %s3974_s12   ;;  %p4355_p7 = scmp.ne.s32.totalorder %s4345_s19, 0 }
 0x99b   : > { %p4356_p12 = scmp.ge.s32.totalorder %s3986_s15, 2  ;;  %s2656_s28 = scalar_lea.sflag [#allocation5], %s2655_s27 }
 0x99d   : > { %p3788_p13 = pnand %p4356_p12, %p4355_p7 }
 0x99f   : > { %p3789_p10 = pneg %p3788_p13 }
 0x9a1   : > { %3969 = dma.done.wait (%p3789_p10), %s2656_s28, 256  }
 0x9a2   : > { %3971 = vsyncadd (%p3789_p10), %s2656_s28, 4294967040  ;;  %p17_p0 = scmp.ge.s32.totalorder %s4102_s10, 4   ;;  %s4357_s12 = smov %s3978_s13 }
 0x9a3   : > { %s4358_s13 = smov %s3982_s14  ;;  %s4359_s14 = smov %s4111_s21 }
 0x9a4   : > { %s4360_s15 = smov %s4102_s10  ;;  %19 = sbr.rel (!%p17_p0) target bundleno = 6 (0x6), region = 105 }
 0x9a9   :  { %2661 = vsyncpa [#allocation4], 1 }
 0x9aa   :  { %2663 = vsyncpa [#allocation4 + $0x1], 1 }
 0x9ab   :  { %2664 = vsyncpa [#allocation7], 1 }
 0x9ac   :  { %2665 = vsyncpa [#allocation5], 1 }
 0x9ad   :  { %2667 = vsyncpa [#allocation5 + $0x1], 1 }

</bundles_post_ra>
